<compile_context>
chip_gen: v7x
topology: tpu7x:2x2x1
jax: 0.10.0
libtpu: 0.0.40
codegen_flags: <defaults>
</compile_context>

<pallas_src>
import jax
import jax.numpy as jnp
import numpy as np
from jax.experimental import pallas as pl
from jax.experimental.pallas import tpu as pltpu


def _dsab_kernel(x_ref, ph_ref, pw_ref, eh_ref, ew_ref,
                 w1_ref, b1_ref, w2_ref, b2_ref,
                 hg_ref, hb_ref, wg_ref, wb_ref,
                 m_ref, mt_ref, o_ref):
    xb = x_ref[...]                              # (R, HW), kept in input dtype
    R, HW = xb.shape
    H = ph_ref.shape[1]
    W = pw_ref.shape[1]
    NG = m_ref.shape[0]                          # number of GroupNorm groups in block
    Gc = R // NG                                 # rows (channels) per group

    # ---- global average pooling over W (-> hx) and over H (-> wx) on the MXU ----
    hx = jnp.dot(xb, ph_ref[...], preferred_element_type=jnp.float32)   # (R, H) f32
    wx = jnp.dot(xb, pw_ref[...], preferred_element_type=jnp.float32)   # (R, W) f32

    w1 = w1_ref[...]
    b1 = b1_ref[...]
    w2 = w2_ref[...]
    b2 = b2_ref[...]
    M = m_ref[...]
    MT = mt_ref[...]

    def dwconv_silu(v, w, b):
        # Depthwise "same" Conv1d (cross-correlation) + y*sigmoid(y).
        # v: (R, L) f32, w: (R, K) f32, b: (R, 1) f32.
        Rr, L = v.shape
        K = w.shape[1]
        p = K // 2
        z = jnp.zeros((Rr, p), v.dtype)
        vp = jnp.concatenate([z, v, z], axis=1)          # (R, L + 2p)
        acc = b + w[:, 0:1] * vp[:, 0:L]
        for k in range(1, K):                            # VPU FMAs on shifted views
            acc = acc + w[:, k:k + 1] * vp[:, k:k + L]
        return acc * jax.nn.sigmoid(acc)

    def gn_sigmoid(v, gamma, beta):
        # GroupNorm over groups of Gc consecutive rows (x L elements), then sigmoid.
        L = v.shape[1]
        n = float(Gc * L)
        s = jnp.sum(v, axis=1, keepdims=True)                                # (R, 1)
        g_mean = jnp.dot(M, s, preferred_element_type=jnp.float32) / n       # (NG, 1)
        mean_r = jnp.dot(MT, g_mean, preferred_element_type=jnp.float32)     # (R, 1)
        d = v - mean_r
        ds = jnp.sum(d * d, axis=1, keepdims=True)                           # centered 2-pass var
        g_var = jnp.dot(M, ds, preferred_element_type=jnp.float32) / n
        var_r = jnp.dot(MT, g_var, preferred_element_type=jnp.float32)
        y = d * jax.lax.rsqrt(var_r + 1e-5) * gamma + beta
        return jax.nn.sigmoid(y)

    h_attn = gn_sigmoid(dwconv_silu(dwconv_silu(hx, w1, b1), w2, b2),
                        hg_ref[...], hb_ref[...])                            # (R, H) f32
    w_attn = gn_sigmoid(dwconv_silu(dwconv_silu(wx, w1, b1), w2, b2),
                        wg_ref[...], wb_ref[...])                            # (R, W) f32

    # ---- broadcast attn maps back to the lane-dense (R, H*W) layout (one-hot matmuls) ----
    h_full = jnp.dot(h_attn.astype(xb.dtype), eh_ref[...])                   # (R, HW)
    w_full = jnp.dot(w_attn.astype(xb.dtype), ew_ref[...])                   # (R, HW)

    o_ref[...] = (xb * h_full * w_full).astype(o_ref.dtype)


def dsab_pallas(x, w3, b3, w5, b5, w7, b7, w9, b9,
                h_gamma, h_beta, w_gamma, w_beta, *, block_b=None):
    B, C, H, W = x.shape
    assert C % 4 == 0
    G = C // 4
    HW = H * W
    dtype = x.dtype
    itemsize = x.dtype.itemsize

    # ---- lane-dense layout: flatten spatial onto the lane axis ----
    xf = x.reshape(B * C, HW)

    # ---- batch blocking heuristic (amortize per-step overhead, keep >=2 grid steps) ----
    if block_b is None:
        target = 2 * 1024 * 1024
        per_img = C * HW * itemsize
        block_b = max(1, min(B, target // max(1, per_img)))
        if B >= 2:
            block_b = min(block_b, max(1, B // 2))   # leave >=2 steps for v7x megacore

    def _ok(bb):
        return bb >= 1 and B % bb == 0 and ((bb * C) % 8 == 0 or bb == B)

    while block_b > 1 and not _ok(block_b):
        block_b -= 1
    if not _ok(block_b):
        block_b = B
    Rblk = block_b * C
    grid = (B // block_b,)

    # ---- fused depthwise-conv parameters ----
    # channels [0:2G] run dconv3 -> dconv5, channels [2G:4G] run dconv7 -> dconv9.
    # Zero-pad the smaller kernels so one conv pass covers all C channels.
    K1 = max(w3.shape[1], w7.shape[1])
    K2 = max(w5.shape[1], w9.shape[1])

    def pad_k(wt, K):
        k = wt.shape[1]
        off = (K - k) // 2
        return jnp.pad(wt, ((0, 0), (off, K - k - off)))

    w_p1 = jnp.concatenate([pad_k(w3, K1), pad_k(w3, K1),
                            pad_k(w7, K1), pad_k(w7, K1)], axis=0).astype(jnp.float32)
    b_p1 = jnp.concatenate([b3, b3, b7, b7]).reshape(C, 1).astype(jnp.float32)
    w_p2 = jnp.concatenate([pad_k(w5, K2), pad_k(w5, K2),
                            pad_k(w9, K2), pad_k(w9, K2)], axis=0).astype(jnp.float32)
    b_p2 = jnp.concatenate([b5, b5, b9, b9]).reshape(C, 1).astype(jnp.float32)

    def per_row(a):          # tile per-channel params across the batch block rows
        return jnp.tile(a, (block_b, 1))

    W1, B1 = per_row(w_p1), per_row(b_p1)
    W2, B2 = per_row(w_p2), per_row(b_p2)
    HG = per_row(h_gamma.reshape(C, 1).astype(jnp.float32))
    HB = per_row(h_beta.reshape(C, 1).astype(jnp.float32))
    WG = per_row(w_gamma.reshape(C, 1).astype(jnp.float32))
    WB = per_row(w_beta.reshape(C, 1).astype(jnp.float32))

    # ---- constant pooling / expansion matrices ----
    hw = np.arange(HW)
    row_of, col_of = hw // W, hw % W
    ph = (row_of[:, None] == np.arange(H)[None, :]).astype(np.float32) / float(W)   # (HW, H)
    pw = (col_of[:, None] == np.arange(W)[None, :]).astype(np.float32) / float(H)   # (HW, W)
    eh = (np.arange(H)[:, None] == row_of[None, :]).astype(np.float32)              # (H, HW)
    ew = (np.arange(W)[:, None] == col_of[None, :]).astype(np.float32)              # (W, HW)
    ph = jnp.asarray(ph, dtype)
    pw = jnp.asarray(pw, dtype)
    eh = jnp.asarray(eh, dtype)
    ew = jnp.asarray(ew, dtype)

    # ---- GroupNorm group-indicator matrices (built once, passed as constants) ----
    NG = 4 * block_b
    gid = np.arange(Rblk) // G
    Mnp = (np.arange(NG)[:, None] == gid[None, :]).astype(np.float32)               # (NG, Rblk)
    M = jnp.asarray(Mnp)
    MT = jnp.asarray(np.ascontiguousarray(Mnp.T))

    x_spec = pl.BlockSpec((Rblk, HW), lambda i: (i, 0))

    def const_spec(a):
        return pl.BlockSpec(a.shape, lambda i: (0, 0))

    params = (ph, pw, eh, ew, W1, B1, W2, B2, HG, HB, WG, WB, M, MT)

    flops = int(4 * B * C * HW * (H + W)                 # pooling + expansion matmuls
                + 2 * B * C * (H + W) * (K1 + K2)        # depthwise conv MACs
                + 6 * B * C * HW)                        # epilogue / GN elementwise
    transcendentals = int(3 * B * C * (H + W))
    bytes_accessed = int(2 * B * C * HW * itemsize)

    out = pl.pallas_call(
        _dsab_kernel,
        out_shape=jax.ShapeDtypeStruct((B * C, HW), dtype),
        grid=grid,
        in_specs=[x_spec] + [const_spec(a) for a in params],
        out_specs=x_spec,
        compiler_params=pltpu.CompilerParams(
            dimension_semantics=("parallel",),
            vmem_limit_bytes=32 * 1024 * 1024),
        cost_estimate=pl.CostEstimate(flops=flops,
                                      transcendentals=transcendentals,
                                      bytes_accessed=bytes_accessed),
    )(xf, *params)
    return out.reshape(B, C, H, W)


# ---------- plain-JAX reference (mirrors the PyTorch forward) ----------
def dsab_ref(x, w3, b3, w5, b5, w7, b7, w9, b9, hg, hb, wg, wb):
    B, C, H, W = x.shape
    G = C // 4

    def dwconv(v, w, b):
        K = w.shape[1]
        p = K // 2
        L = v.shape[-1]
        vp = jnp.pad(v, ((0, 0), (0, 0), (p, p)))
        out = b[None, :, None]
        for k in range(K):
            out = out + w[None, :, k:k + 1] * vp[:, :, k:k + L]
        return out

    def cs(v, w, b):
        y = dwconv(v, w, b)
        return y * jax.nn.sigmoid(y)

    def branch(v):
        parts = [v[:, i * G:(i + 1) * G] for i in range(4)]
        p0 = cs(cs(parts[0], w3, b3), w5, b5)
        p1 = cs(cs(parts[1], w3, b3), w5, b5)
        p2 = cs(cs(parts[2], w7, b7), w9, b9)
        p3 = cs(cs(parts[3], w7, b7), w9, b9)
        return jnp.concatenate([p0, p1, p2, p3], axis=1)

    def gn_sig(v, gamma, beta, eps=1e-5):
        Bb, Cc, L = v.shape
        vg = v.reshape(Bb, 4, (Cc // 4) * L)
        m = vg.mean(-1, keepdims=True)
        var = ((vg - m) ** 2).mean(-1, keepdims=True)
        vn = ((vg - m) / jnp.sqrt(var + eps)).reshape(Bb, Cc, L)
        return jax.nn.sigmoid(vn * gamma[None, :, None] + beta[None, :, None])

    hx_attn = gn_sig(branch(x.mean(axis=3)), hg, hb)   # (B, C, H)
    wx_attn = gn_sig(branch(x.mean(axis=2)), wg, wb)   # (B, C, W)
    return x * hx_attn[:, :, :, None] * wx_attn[:, :, None, :]


if __name__ == "__main__":
    key = jax.random.PRNGKey(0)
    B, C, H, W = 2, 32, 16, 16          # in_ch = 32, spatial_kernel_sizes = (3, 5, 7, 9)
    G = C // 4
    keys = jax.random.split(key, 10)

    x = jax.random.normal(keys[0], (B, C, H, W), jnp.float32)

    def conv_params(k, K):
        w = jax.random.normal(k, (G, K), jnp.float32) / float(K)     # Conv1d weight (G,1,K) squeezed
        b = 0.1 * jax.random.normal(jax.random.fold_in(k, 1), (G,), jnp.float32)
        return w, b

    w3, b3 = conv_params(keys[1], 3)
    w5, b5 = conv_params(keys[2], 5)
    w7, b7 = conv_params(keys[3], 7)
    w9, b9 = conv_params(keys[4], 9)
    h_gamma = 1.0 + 0.1 * jax.random.normal(keys[5], (C,), jnp.float32)
    h_beta = 0.1 * jax.random.normal(keys[6], (C,), jnp.float32)
    w_gamma = 1.0 + 0.1 * jax.random.normal(keys[7], (C,), jnp.float32)
    w_beta = 0.1 * jax.random.normal(keys[8], (C,), jnp.float32)

    out = dsab_pallas(x, w3, b3, w5, b5, w7, b7, w9, b9,
                      h_gamma, h_beta, w_gamma, w_beta)
    out = jax.block_until_ready(out)

    ref = dsab_ref(x, w3, b3, w5, b5, w7, b7, w9, b9,
                   h_gamma, h_beta, w_gamma, w_beta)
    err = float(jnp.max(jnp.abs(out - ref)))
    assert err < 1e-4, f"max abs error {err}"
    print("KERNEL_OK")
</pallas_src>

<mosaic_0001>
module attributes {stable_mosaic.version = 11 : i64} {
  func.func @_dsab_kernel(%arg0: i32, %arg1: memref<32x256xf32, #tpu.memory_space<vmem>>, %arg2: memref<256x16xf32, #tpu.memory_space<vmem>>, %arg3: memref<256x16xf32, #tpu.memory_space<vmem>>, %arg4: memref<16x256xf32, #tpu.memory_space<vmem>>, %arg5: memref<16x256xf32, #tpu.memory_space<vmem>>, %arg6: memref<32x7xf32, #tpu.memory_space<vmem>>, %arg7: memref<32x1xf32, #tpu.memory_space<vmem>>, %arg8: memref<32x9xf32, #tpu.memory_space<vmem>>, %arg9: memref<32x1xf32, #tpu.memory_space<vmem>>, %arg10: memref<32x1xf32, #tpu.memory_space<vmem>>, %arg11: memref<32x1xf32, #tpu.memory_space<vmem>>, %arg12: memref<32x1xf32, #tpu.memory_space<vmem>>, %arg13: memref<32x1xf32, #tpu.memory_space<vmem>>, %arg14: memref<4x32xf32, #tpu.memory_space<vmem>>, %arg15: memref<32x4xf32, #tpu.memory_space<vmem>>, %arg16: memref<32x256xf32, #tpu.memory_space<vmem>>) attributes {dimension_semantics = [#tpu.dimension_semantics<parallel>], iteration_bounds = array<i64: 2>, scalar_prefetch = 0 : i64, scratch_operands = 0 : i64, tpu.core_type = #tpu.core_type<tc>, window_params = [{transform_indices = @transform_0, window_bounds = array<i64: 32, 256>}, {pipeline_mode = #tpu.pipeline_mode<synchronous>, transform_indices = @transform_1, window_bounds = array<i64: 256, 16>}, {pipeline_mode = #tpu.pipeline_mode<synchronous>, transform_indices = @transform_2, window_bounds = array<i64: 256, 16>}, {pipeline_mode = #tpu.pipeline_mode<synchronous>, transform_indices = @transform_3, window_bounds = array<i64: 16, 256>}, {pipeline_mode = #tpu.pipeline_mode<synchronous>, transform_indices = @transform_4, window_bounds = array<i64: 16, 256>}, {pipeline_mode = #tpu.pipeline_mode<synchronous>, transform_indices = @transform_5, window_bounds = array<i64: 32, 7>}, {pipeline_mode = #tpu.pipeline_mode<synchronous>, transform_indices = @transform_6, window_bounds = array<i64: 32, 1>}, {pipeline_mode = #tpu.pipeline_mode<synchronous>, transform_indices = @transform_7, window_bounds = array<i64: 32, 9>}, {pipeline_mode = #tpu.pipeline_mode<synchronous>, transform_indices = @transform_8, window_bounds = array<i64: 32, 1>}, {pipeline_mode = #tpu.pipeline_mode<synchronous>, transform_indices = @transform_9, window_bounds = array<i64: 32, 1>}, {pipeline_mode = #tpu.pipeline_mode<synchronous>, transform_indices = @transform_10, window_bounds = array<i64: 32, 1>}, {pipeline_mode = #tpu.pipeline_mode<synchronous>, transform_indices = @transform_11, window_bounds = array<i64: 32, 1>}, {pipeline_mode = #tpu.pipeline_mode<synchronous>, transform_indices = @transform_12, window_bounds = array<i64: 32, 1>}, {pipeline_mode = #tpu.pipeline_mode<synchronous>, transform_indices = @transform_13, window_bounds = array<i64: 4, 32>}, {pipeline_mode = #tpu.pipeline_mode<synchronous>, transform_indices = @transform_14, window_bounds = array<i64: 32, 4>}, {transform_indices = @transform_15, window_bounds = array<i64: 32, 256>}]} {
    %c0 = arith.constant 0 : index
    %c0_0 = arith.constant 0 : index
    %0 = vector.load %arg1[%c0, %c0_0] : memref<32x256xf32, #tpu.memory_space<vmem>>, vector<32x256xf32>
    %c0_1 = arith.constant 0 : index
    %c0_2 = arith.constant 0 : index
    %1 = vector.load %arg2[%c0_1, %c0_2] : memref<256x16xf32, #tpu.memory_space<vmem>>, vector<256x16xf32>
    %cst = arith.constant dense<0.000000e+00> : vector<32x16xf32>
    %2 = tpu.matmul %0, %1, %cst {dimension_numbers = #tpu.dot_dimension_numbers<[1], [0], [0], [1], [0, 0, 1, 1], [], []>} : vector<32x256xf32>, vector<256x16xf32>, vector<32x16xf32> -> vector<32x16xf32>
    %c0_3 = arith.constant 0 : index
    %c0_4 = arith.constant 0 : index
    %3 = vector.load %arg3[%c0_3, %c0_4] : memref<256x16xf32, #tpu.memory_space<vmem>>, vector<256x16xf32>
    %cst_5 = arith.constant dense<0.000000e+00> : vector<32x16xf32>
    %4 = tpu.matmul %0, %3, %cst_5 {dimension_numbers = #tpu.dot_dimension_numbers<[1], [0], [0], [1], [0, 0, 1, 1], [], []>} : vector<32x256xf32>, vector<256x16xf32>, vector<32x16xf32> -> vector<32x16xf32>
    %c0_6 = arith.constant 0 : index
    %c0_7 = arith.constant 0 : index
    %5 = vector.load %arg6[%c0_6, %c0_7] : memref<32x7xf32, #tpu.memory_space<vmem>>, vector<32x7xf32>
    %c0_8 = arith.constant 0 : index
    %c0_9 = arith.constant 0 : index
    %6 = vector.load %arg7[%c0_8, %c0_9] : memref<32x1xf32, #tpu.memory_space<vmem>>, vector<32x1xf32>
    %c0_10 = arith.constant 0 : index
    %c0_11 = arith.constant 0 : index
    %7 = vector.load %arg8[%c0_10, %c0_11] : memref<32x9xf32, #tpu.memory_space<vmem>>, vector<32x9xf32>
    %c0_12 = arith.constant 0 : index
    %c0_13 = arith.constant 0 : index
    %8 = vector.load %arg9[%c0_12, %c0_13] : memref<32x1xf32, #tpu.memory_space<vmem>>, vector<32x1xf32>
    %c0_14 = arith.constant 0 : index
    %c0_15 = arith.constant 0 : index
    %9 = vector.load %arg14[%c0_14, %c0_15] : memref<4x32xf32, #tpu.memory_space<vmem>>, vector<4x32xf32>
    %c0_16 = arith.constant 0 : index
    %c0_17 = arith.constant 0 : index
    %10 = vector.load %arg15[%c0_16, %c0_17] : memref<32x4xf32, #tpu.memory_space<vmem>>, vector<32x4xf32>
    %cst_18 = arith.constant 0.000000e+00 : f32
    %11 = vector.broadcast %cst_18 : f32 to vector<32x3xf32>
    %12 = tpu.concatenate %11, %2, %11 in 1 : vector<32x3xf32>, vector<32x16xf32>, vector<32x3xf32> -> vector<32x22xf32>
    %13 = vector.extract_strided_slice %5 {offsets = [0, 0], sizes = [32, 1], strides = [1, 1]} : vector<32x7xf32> to vector<32x1xf32>
    %14 = vector.extract_strided_slice %12 {offsets = [0, 0], sizes = [32, 16], strides = [1, 1]} : vector<32x22xf32> to vector<32x16xf32>
    %15 = vector.broadcast %13 : vector<32x1xf32> to vector<32x16xf32>
    %16 = arith.mulf %15, %14 : vector<32x16xf32>
    %17 = vector.broadcast %6 : vector<32x1xf32> to vector<32x16xf32>
    %18 = arith.addf %17, %16 : vector<32x16xf32>
    %19 = vector.extract_strided_slice %5 {offsets = [0, 1], sizes = [32, 1], strides = [1, 1]} : vector<32x7xf32> to vector<32x1xf32>
    %20 = vector.extract_strided_slice %12 {offsets = [0, 1], sizes = [32, 16], strides = [1, 1]} : vector<32x22xf32> to vector<32x16xf32>
    %21 = vector.broadcast %19 : vector<32x1xf32> to vector<32x16xf32>
    %22 = arith.mulf %21, %20 : vector<32x16xf32>
    %23 = arith.addf %18, %22 : vector<32x16xf32>
    %24 = vector.extract_strided_slice %5 {offsets = [0, 2], sizes = [32, 1], strides = [1, 1]} : vector<32x7xf32> to vector<32x1xf32>
    %25 = vector.extract_strided_slice %12 {offsets = [0, 2], sizes = [32, 16], strides = [1, 1]} : vector<32x22xf32> to vector<32x16xf32>
    %26 = vector.broadcast %24 : vector<32x1xf32> to vector<32x16xf32>
    %27 = arith.mulf %26, %25 : vector<32x16xf32>
    %28 = arith.addf %23, %27 : vector<32x16xf32>
    %29 = vector.extract_strided_slice %5 {offsets = [0, 3], sizes = [32, 1], strides = [1, 1]} : vector<32x7xf32> to vector<32x1xf32>
    %30 = vector.extract_strided_slice %12 {offsets = [0, 3], sizes = [32, 16], strides = [1, 1]} : vector<32x22xf32> to vector<32x16xf32>
    %31 = vector.broadcast %29 : vector<32x1xf32> to vector<32x16xf32>
    %32 = arith.mulf %31, %30 : vector<32x16xf32>
    %33 = arith.addf %28, %32 : vector<32x16xf32>
    %34 = vector.extract_strided_slice %5 {offsets = [0, 4], sizes = [32, 1], strides = [1, 1]} : vector<32x7xf32> to vector<32x1xf32>
    %35 = vector.extract_strided_slice %12 {offsets = [0, 4], sizes = [32, 16], strides = [1, 1]} : vector<32x22xf32> to vector<32x16xf32>
    %36 = vector.broadcast %34 : vector<32x1xf32> to vector<32x16xf32>
    %37 = arith.mulf %36, %35 : vector<32x16xf32>
    %38 = arith.addf %33, %37 : vector<32x16xf32>
    %39 = vector.extract_strided_slice %5 {offsets = [0, 5], sizes = [32, 1], strides = [1, 1]} : vector<32x7xf32> to vector<32x1xf32>
    %40 = vector.extract_strided_slice %12 {offsets = [0, 5], sizes = [32, 16], strides = [1, 1]} : vector<32x22xf32> to vector<32x16xf32>
    %41 = vector.broadcast %39 : vector<32x1xf32> to vector<32x16xf32>
    %42 = arith.mulf %41, %40 : vector<32x16xf32>
    %43 = arith.addf %38, %42 : vector<32x16xf32>
    %44 = vector.extract_strided_slice %5 {offsets = [0, 6], sizes = [32, 1], strides = [1, 1]} : vector<32x7xf32> to vector<32x1xf32>
    %45 = vector.extract_strided_slice %12 {offsets = [0, 6], sizes = [32, 16], strides = [1, 1]} : vector<32x22xf32> to vector<32x16xf32>
    %46 = vector.broadcast %44 : vector<32x1xf32> to vector<32x16xf32>
    %47 = arith.mulf %46, %45 : vector<32x16xf32>
    %48 = arith.addf %43, %47 : vector<32x16xf32>
    %49 = arith.negf %48 : vector<32x16xf32>
    %50 = math.exp %49 : vector<32x16xf32>
    %cst_19 = arith.constant 1.000000e+00 : f32
    %51 = vector.broadcast %cst_19 : f32 to vector<32x16xf32>
    %52 = arith.addf %51, %50 : vector<32x16xf32>
    %53 = arith.divf %51, %52 : vector<32x16xf32>
    %54 = arith.mulf %48, %53 : vector<32x16xf32>
    %cst_20 = arith.constant 0.000000e+00 : f32
    %55 = vector.broadcast %cst_20 : f32 to vector<32x4xf32>
    %56 = tpu.concatenate %55, %54, %55 in 1 : vector<32x4xf32>, vector<32x16xf32>, vector<32x4xf32> -> vector<32x24xf32>
    %57 = vector.extract_strided_slice %7 {offsets = [0, 0], sizes = [32, 1], strides = [1, 1]} : vector<32x9xf32> to vector<32x1xf32>
    %58 = vector.extract_strided_slice %56 {offsets = [0, 0], sizes = [32, 16], strides = [1, 1]} : vector<32x24xf32> to vector<32x16xf32>
    %59 = vector.broadcast %57 : vector<32x1xf32> to vector<32x16xf32>
    %60 = arith.mulf %59, %58 : vector<32x16xf32>
    %61 = vector.broadcast %8 : vector<32x1xf32> to vector<32x16xf32>
    %62 = arith.addf %61, %60 : vector<32x16xf32>
    %63 = vector.extract_strided_slice %7 {offsets = [0, 1], sizes = [32, 1], strides = [1, 1]} : vector<32x9xf32> to vector<32x1xf32>
    %64 = vector.extract_strided_slice %56 {offsets = [0, 1], sizes = [32, 16], strides = [1, 1]} : vector<32x24xf32> to vector<32x16xf32>
    %65 = vector.broadcast %63 : vector<32x1xf32> to vector<32x16xf32>
    %66 = arith.mulf %65, %64 : vector<32x16xf32>
    %67 = arith.addf %62, %66 : vector<32x16xf32>
    %68 = vector.extract_strided_slice %7 {offsets = [0, 2], sizes = [32, 1], strides = [1, 1]} : vector<32x9xf32> to vector<32x1xf32>
    %69 = vector.extract_strided_slice %56 {offsets = [0, 2], sizes = [32, 16], strides = [1, 1]} : vector<32x24xf32> to vector<32x16xf32>
    %70 = vector.broadcast %68 : vector<32x1xf32> to vector<32x16xf32>
    %71 = arith.mulf %70, %69 : vector<32x16xf32>
    %72 = arith.addf %67, %71 : vector<32x16xf32>
    %73 = vector.extract_strided_slice %7 {offsets = [0, 3], sizes = [32, 1], strides = [1, 1]} : vector<32x9xf32> to vector<32x1xf32>
    %74 = vector.extract_strided_slice %56 {offsets = [0, 3], sizes = [32, 16], strides = [1, 1]} : vector<32x24xf32> to vector<32x16xf32>
    %75 = vector.broadcast %73 : vector<32x1xf32> to vector<32x16xf32>
    %76 = arith.mulf %75, %74 : vector<32x16xf32>
    %77 = arith.addf %72, %76 : vector<32x16xf32>
    %78 = vector.extract_strided_slice %7 {offsets = [0, 4], sizes = [32, 1], strides = [1, 1]} : vector<32x9xf32> to vector<32x1xf32>
    %79 = vector.extract_strided_slice %56 {offsets = [0, 4], sizes = [32, 16], strides = [1, 1]} : vector<32x24xf32> to vector<32x16xf32>
    %80 = vector.broadcast %78 : vector<32x1xf32> to vector<32x16xf32>
    %81 = arith.mulf %80, %79 : vector<32x16xf32>
    %82 = arith.addf %77, %81 : vector<32x16xf32>
    %83 = vector.extract_strided_slice %7 {offsets = [0, 5], sizes = [32, 1], strides = [1, 1]} : vector<32x9xf32> to vector<32x1xf32>
    %84 = vector.extract_strided_slice %56 {offsets = [0, 5], sizes = [32, 16], strides = [1, 1]} : vector<32x24xf32> to vector<32x16xf32>
    %85 = vector.broadcast %83 : vector<32x1xf32> to vector<32x16xf32>
    %86 = arith.mulf %85, %84 : vector<32x16xf32>
    %87 = arith.addf %82, %86 : vector<32x16xf32>
    %88 = vector.extract_strided_slice %7 {offsets = [0, 6], sizes = [32, 1], strides = [1, 1]} : vector<32x9xf32> to vector<32x1xf32>
    %89 = vector.extract_strided_slice %56 {offsets = [0, 6], sizes = [32, 16], strides = [1, 1]} : vector<32x24xf32> to vector<32x16xf32>
    %90 = vector.broadcast %88 : vector<32x1xf32> to vector<32x16xf32>
    %91 = arith.mulf %90, %89 : vector<32x16xf32>
    %92 = arith.addf %87, %91 : vector<32x16xf32>
    %93 = vector.extract_strided_slice %7 {offsets = [0, 7], sizes = [32, 1], strides = [1, 1]} : vector<32x9xf32> to vector<32x1xf32>
    %94 = vector.extract_strided_slice %56 {offsets = [0, 7], sizes = [32, 16], strides = [1, 1]} : vector<32x24xf32> to vector<32x16xf32>
    %95 = vector.broadcast %93 : vector<32x1xf32> to vector<32x16xf32>
    %96 = arith.mulf %95, %94 : vector<32x16xf32>
    %97 = arith.addf %92, %96 : vector<32x16xf32>
    %98 = vector.extract_strided_slice %7 {offsets = [0, 8], sizes = [32, 1], strides = [1, 1]} : vector<32x9xf32> to vector<32x1xf32>
    %99 = vector.extract_strided_slice %56 {offsets = [0, 8], sizes = [32, 16], strides = [1, 1]} : vector<32x24xf32> to vector<32x16xf32>
    %100 = vector.broadcast %98 : vector<32x1xf32> to vector<32x16xf32>
    %101 = arith.mulf %100, %99 : vector<32x16xf32>
    %102 = arith.addf %97, %101 : vector<32x16xf32>
    %103 = arith.negf %102 : vector<32x16xf32>
    %104 = math.exp %103 : vector<32x16xf32>
    %cst_21 = arith.constant 1.000000e+00 : f32
    %105 = vector.broadcast %cst_21 : f32 to vector<32x16xf32>
    %106 = arith.addf %105, %104 : vector<32x16xf32>
    %107 = arith.divf %105, %106 : vector<32x16xf32>
    %108 = arith.mulf %102, %107 : vector<32x16xf32>
    %c0_22 = arith.constant 0 : index
    %c0_23 = arith.constant 0 : index
    %109 = vector.load %arg10[%c0_22, %c0_23] : memref<32x1xf32, #tpu.memory_space<vmem>>, vector<32x1xf32>
    %c0_24 = arith.constant 0 : index
    %c0_25 = arith.constant 0 : index
    %110 = vector.load %arg11[%c0_24, %c0_25] : memref<32x1xf32, #tpu.memory_space<vmem>>, vector<32x1xf32>
    %cst_26 = arith.constant dense<0.000000e+00> : vector<32xf32>
    %111 = vector.multi_reduction <add>, %108, %cst_26 [1] : vector<32x16xf32> to vector<32xf32>
    %112 = vector.shape_cast %111 : vector<32xf32> to vector<32x1xf32>
    %cst_27 = arith.constant dense<0.000000e+00> : vector<4x1xf32>
    %113 = tpu.matmul %9, %112, %cst_27 {dimension_numbers = #tpu.dot_dimension_numbers<[1], [0], [0], [1], [0, 0, 1, 1], [], []>} : vector<4x32xf32>, vector<32x1xf32>, vector<4x1xf32> -> vector<4x1xf32>
    %cst_28 = arith.constant 1.280000e+02 : f32
    %114 = vector.broadcast %cst_28 : f32 to vector<4x1xf32>
    %115 = arith.divf %113, %114 : vector<4x1xf32>
    %cst_29 = arith.constant dense<0.000000e+00> : vector<32x1xf32>
    %116 = tpu.matmul %10, %115, %cst_29 {dimension_numbers = #tpu.dot_dimension_numbers<[1], [0], [0], [1], [0, 0, 1, 1], [], []>} : vector<32x4xf32>, vector<4x1xf32>, vector<32x1xf32> -> vector<32x1xf32>
    %117 = vector.broadcast %116 : vector<32x1xf32> to vector<32x16xf32>
    %118 = arith.subf %108, %117 : vector<32x16xf32>
    %119 = arith.mulf %118, %118 : vector<32x16xf32>
    %cst_30 = arith.constant dense<0.000000e+00> : vector<32xf32>
    %120 = vector.multi_reduction <add>, %119, %cst_30 [1] : vector<32x16xf32> to vector<32xf32>
    %121 = vector.shape_cast %120 : vector<32xf32> to vector<32x1xf32>
    %cst_31 = arith.constant dense<0.000000e+00> : vector<4x1xf32>
    %122 = tpu.matmul %9, %121, %cst_31 {dimension_numbers = #tpu.dot_dimension_numbers<[1], [0], [0], [1], [0, 0, 1, 1], [], []>} : vector<4x32xf32>, vector<32x1xf32>, vector<4x1xf32> -> vector<4x1xf32>
    %cst_32 = arith.constant 1.280000e+02 : f32
    %123 = vector.broadcast %cst_32 : f32 to vector<4x1xf32>
    %124 = arith.divf %122, %123 : vector<4x1xf32>
    %cst_33 = arith.constant dense<0.000000e+00> : vector<32x1xf32>
    %125 = tpu.matmul %10, %124, %cst_33 {dimension_numbers = #tpu.dot_dimension_numbers<[1], [0], [0], [1], [0, 0, 1, 1], [], []>} : vector<32x4xf32>, vector<4x1xf32>, vector<32x1xf32> -> vector<32x1xf32>
    %cst_34 = arith.constant 9.99999974E-6 : f32
    %126 = vector.broadcast %cst_34 : f32 to vector<32x1xf32>
    %127 = arith.addf %125, %126 : vector<32x1xf32>
    %128 = math.rsqrt %127 : vector<32x1xf32>
    %129 = vector.broadcast %128 : vector<32x1xf32> to vector<32x16xf32>
    %130 = arith.mulf %118, %129 : vector<32x16xf32>
    %131 = vector.broadcast %109 : vector<32x1xf32> to vector<32x16xf32>
    %132 = arith.mulf %130, %131 : vector<32x16xf32>
    %133 = vector.broadcast %110 : vector<32x1xf32> to vector<32x16xf32>
    %134 = arith.addf %132, %133 : vector<32x16xf32>
    %135 = arith.negf %134 : vector<32x16xf32>
    %136 = math.exp %135 : vector<32x16xf32>
    %cst_35 = arith.constant 1.000000e+00 : f32
    %137 = vector.broadcast %cst_35 : f32 to vector<32x16xf32>
    %138 = arith.addf %137, %136 : vector<32x16xf32>
    %139 = arith.divf %137, %138 : vector<32x16xf32>
    %cst_36 = arith.constant 0.000000e+00 : f32
    %140 = vector.broadcast %cst_36 : f32 to vector<32x3xf32>
    %141 = tpu.concatenate %140, %4, %140 in 1 : vector<32x3xf32>, vector<32x16xf32>, vector<32x3xf32> -> vector<32x22xf32>
    %142 = vector.extract_strided_slice %5 {offsets = [0, 0], sizes = [32, 1], strides = [1, 1]} : vector<32x7xf32> to vector<32x1xf32>
    %143 = vector.extract_strided_slice %141 {offsets = [0, 0], sizes = [32, 16], strides = [1, 1]} : vector<32x22xf32> to vector<32x16xf32>
    %144 = vector.broadcast %142 : vector<32x1xf32> to vector<32x16xf32>
    %145 = arith.mulf %144, %143 : vector<32x16xf32>
    %146 = vector.broadcast %6 : vector<32x1xf32> to vector<32x16xf32>
    %147 = arith.addf %146, %145 : vector<32x16xf32>
    %148 = vector.extract_strided_slice %5 {offsets = [0, 1], sizes = [32, 1], strides = [1, 1]} : vector<32x7xf32> to vector<32x1xf32>
    %149 = vector.extract_strided_slice %141 {offsets = [0, 1], sizes = [32, 16], strides = [1, 1]} : vector<32x22xf32> to vector<32x16xf32>
    %150 = vector.broadcast %148 : vector<32x1xf32> to vector<32x16xf32>
    %151 = arith.mulf %150, %149 : vector<32x16xf32>
    %152 = arith.addf %147, %151 : vector<32x16xf32>
    %153 = vector.extract_strided_slice %5 {offsets = [0, 2], sizes = [32, 1], strides = [1, 1]} : vector<32x7xf32> to vector<32x1xf32>
    %154 = vector.extract_strided_slice %141 {offsets = [0, 2], sizes = [32, 16], strides = [1, 1]} : vector<32x22xf32> to vector<32x16xf32>
    %155 = vector.broadcast %153 : vector<32x1xf32> to vector<32x16xf32>
    %156 = arith.mulf %155, %154 : vector<32x16xf32>
    %157 = arith.addf %152, %156 : vector<32x16xf32>
    %158 = vector.extract_strided_slice %5 {offsets = [0, 3], sizes = [32, 1], strides = [1, 1]} : vector<32x7xf32> to vector<32x1xf32>
    %159 = vector.extract_strided_slice %141 {offsets = [0, 3], sizes = [32, 16], strides = [1, 1]} : vector<32x22xf32> to vector<32x16xf32>
    %160 = vector.broadcast %158 : vector<32x1xf32> to vector<32x16xf32>
    %161 = arith.mulf %160, %159 : vector<32x16xf32>
    %162 = arith.addf %157, %161 : vector<32x16xf32>
    %163 = vector.extract_strided_slice %5 {offsets = [0, 4], sizes = [32, 1], strides = [1, 1]} : vector<32x7xf32> to vector<32x1xf32>
    %164 = vector.extract_strided_slice %141 {offsets = [0, 4], sizes = [32, 16], strides = [1, 1]} : vector<32x22xf32> to vector<32x16xf32>
    %165 = vector.broadcast %163 : vector<32x1xf32> to vector<32x16xf32>
    %166 = arith.mulf %165, %164 : vector<32x16xf32>
    %167 = arith.addf %162, %166 : vector<32x16xf32>
    %168 = vector.extract_strided_slice %5 {offsets = [0, 5], sizes = [32, 1], strides = [1, 1]} : vector<32x7xf32> to vector<32x1xf32>
    %169 = vector.extract_strided_slice %141 {offsets = [0, 5], sizes = [32, 16], strides = [1, 1]} : vector<32x22xf32> to vector<32x16xf32>
    %170 = vector.broadcast %168 : vector<32x1xf32> to vector<32x16xf32>
    %171 = arith.mulf %170, %169 : vector<32x16xf32>
    %172 = arith.addf %167, %171 : vector<32x16xf32>
    %173 = vector.extract_strided_slice %5 {offsets = [0, 6], sizes = [32, 1], strides = [1, 1]} : vector<32x7xf32> to vector<32x1xf32>
    %174 = vector.extract_strided_slice %141 {offsets = [0, 6], sizes = [32, 16], strides = [1, 1]} : vector<32x22xf32> to vector<32x16xf32>
    %175 = vector.broadcast %173 : vector<32x1xf32> to vector<32x16xf32>
    %176 = arith.mulf %175, %174 : vector<32x16xf32>
    %177 = arith.addf %172, %176 : vector<32x16xf32>
    %178 = arith.negf %177 : vector<32x16xf32>
    %179 = math.exp %178 : vector<32x16xf32>
    %cst_37 = arith.constant 1.000000e+00 : f32
    %180 = vector.broadcast %cst_37 : f32 to vector<32x16xf32>
    %181 = arith.addf %180, %179 : vector<32x16xf32>
    %182 = arith.divf %180, %181 : vector<32x16xf32>
    %183 = arith.mulf %177, %182 : vector<32x16xf32>
    %cst_38 = arith.constant 0.000000e+00 : f32
    %184 = vector.broadcast %cst_38 : f32 to vector<32x4xf32>
    %185 = tpu.concatenate %184, %183, %184 in 1 : vector<32x4xf32>, vector<32x16xf32>, vector<32x4xf32> -> vector<32x24xf32>
    %186 = vector.extract_strided_slice %7 {offsets = [0, 0], sizes = [32, 1], strides = [1, 1]} : vector<32x9xf32> to vector<32x1xf32>
    %187 = vector.extract_strided_slice %185 {offsets = [0, 0], sizes = [32, 16], strides = [1, 1]} : vector<32x24xf32> to vector<32x16xf32>
    %188 = vector.broadcast %186 : vector<32x1xf32> to vector<32x16xf32>
    %189 = arith.mulf %188, %187 : vector<32x16xf32>
    %190 = vector.broadcast %8 : vector<32x1xf32> to vector<32x16xf32>
    %191 = arith.addf %190, %189 : vector<32x16xf32>
    %192 = vector.extract_strided_slice %7 {offsets = [0, 1], sizes = [32, 1], strides = [1, 1]} : vector<32x9xf32> to vector<32x1xf32>
    %193 = vector.extract_strided_slice %185 {offsets = [0, 1], sizes = [32, 16], strides = [1, 1]} : vector<32x24xf32> to vector<32x16xf32>
    %194 = vector.broadcast %192 : vector<32x1xf32> to vector<32x16xf32>
    %195 = arith.mulf %194, %193 : vector<32x16xf32>
    %196 = arith.addf %191, %195 : vector<32x16xf32>
    %197 = vector.extract_strided_slice %7 {offsets = [0, 2], sizes = [32, 1], strides = [1, 1]} : vector<32x9xf32> to vector<32x1xf32>
    %198 = vector.extract_strided_slice %185 {offsets = [0, 2], sizes = [32, 16], strides = [1, 1]} : vector<32x24xf32> to vector<32x16xf32>
    %199 = vector.broadcast %197 : vector<32x1xf32> to vector<32x16xf32>
    %200 = arith.mulf %199, %198 : vector<32x16xf32>
    %201 = arith.addf %196, %200 : vector<32x16xf32>
    %202 = vector.extract_strided_slice %7 {offsets = [0, 3], sizes = [32, 1], strides = [1, 1]} : vector<32x9xf32> to vector<32x1xf32>
    %203 = vector.extract_strided_slice %185 {offsets = [0, 3], sizes = [32, 16], strides = [1, 1]} : vector<32x24xf32> to vector<32x16xf32>
    %204 = vector.broadcast %202 : vector<32x1xf32> to vector<32x16xf32>
    %205 = arith.mulf %204, %203 : vector<32x16xf32>
    %206 = arith.addf %201, %205 : vector<32x16xf32>
    %207 = vector.extract_strided_slice %7 {offsets = [0, 4], sizes = [32, 1], strides = [1, 1]} : vector<32x9xf32> to vector<32x1xf32>
    %208 = vector.extract_strided_slice %185 {offsets = [0, 4], sizes = [32, 16], strides = [1, 1]} : vector<32x24xf32> to vector<32x16xf32>
    %209 = vector.broadcast %207 : vector<32x1xf32> to vector<32x16xf32>
    %210 = arith.mulf %209, %208 : vector<32x16xf32>
    %211 = arith.addf %206, %210 : vector<32x16xf32>
    %212 = vector.extract_strided_slice %7 {offsets = [0, 5], sizes = [32, 1], strides = [1, 1]} : vector<32x9xf32> to vector<32x1xf32>
    %213 = vector.extract_strided_slice %185 {offsets = [0, 5], sizes = [32, 16], strides = [1, 1]} : vector<32x24xf32> to vector<32x16xf32>
    %214 = vector.broadcast %212 : vector<32x1xf32> to vector<32x16xf32>
    %215 = arith.mulf %214, %213 : vector<32x16xf32>
    %216 = arith.addf %211, %215 : vector<32x16xf32>
    %217 = vector.extract_strided_slice %7 {offsets = [0, 6], sizes = [32, 1], strides = [1, 1]} : vector<32x9xf32> to vector<32x1xf32>
    %218 = vector.extract_strided_slice %185 {offsets = [0, 6], sizes = [32, 16], strides = [1, 1]} : vector<32x24xf32> to vector<32x16xf32>
    %219 = vector.broadcast %217 : vector<32x1xf32> to vector<32x16xf32>
    %220 = arith.mulf %219, %218 : vector<32x16xf32>
    %221 = arith.addf %216, %220 : vector<32x16xf32>
    %222 = vector.extract_strided_slice %7 {offsets = [0, 7], sizes = [32, 1], strides = [1, 1]} : vector<32x9xf32> to vector<32x1xf32>
    %223 = vector.extract_strided_slice %185 {offsets = [0, 7], sizes = [32, 16], strides = [1, 1]} : vector<32x24xf32> to vector<32x16xf32>
    %224 = vector.broadcast %222 : vector<32x1xf32> to vector<32x16xf32>
    %225 = arith.mulf %224, %223 : vector<32x16xf32>
    %226 = arith.addf %221, %225 : vector<32x16xf32>
    %227 = vector.extract_strided_slice %7 {offsets = [0, 8], sizes = [32, 1], strides = [1, 1]} : vector<32x9xf32> to vector<32x1xf32>
    %228 = vector.extract_strided_slice %185 {offsets = [0, 8], sizes = [32, 16], strides = [1, 1]} : vector<32x24xf32> to vector<32x16xf32>
    %229 = vector.broadcast %227 : vector<32x1xf32> to vector<32x16xf32>
    %230 = arith.mulf %229, %228 : vector<32x16xf32>
    %231 = arith.addf %226, %230 : vector<32x16xf32>
    %232 = arith.negf %231 : vector<32x16xf32>
    %233 = math.exp %232 : vector<32x16xf32>
    %cst_39 = arith.constant 1.000000e+00 : f32
    %234 = vector.broadcast %cst_39 : f32 to vector<32x16xf32>
    %235 = arith.addf %234, %233 : vector<32x16xf32>
    %236 = arith.divf %234, %235 : vector<32x16xf32>
    %237 = arith.mulf %231, %236 : vector<32x16xf32>
    %c0_40 = arith.constant 0 : index
    %c0_41 = arith.constant 0 : index
    %238 = vector.load %arg12[%c0_40, %c0_41] : memref<32x1xf32, #tpu.memory_space<vmem>>, vector<32x1xf32>
    %c0_42 = arith.constant 0 : index
    %c0_43 = arith.constant 0 : index
    %239 = vector.load %arg13[%c0_42, %c0_43] : memref<32x1xf32, #tpu.memory_space<vmem>>, vector<32x1xf32>
    %cst_44 = arith.constant dense<0.000000e+00> : vector<32xf32>
    %240 = vector.multi_reduction <add>, %237, %cst_44 [1] : vector<32x16xf32> to vector<32xf32>
    %241 = vector.shape_cast %240 : vector<32xf32> to vector<32x1xf32>
    %cst_45 = arith.constant dense<0.000000e+00> : vector<4x1xf32>
    %242 = tpu.matmul %9, %241, %cst_45 {dimension_numbers = #tpu.dot_dimension_numbers<[1], [0], [0], [1], [0, 0, 1, 1], [], []>} : vector<4x32xf32>, vector<32x1xf32>, vector<4x1xf32> -> vector<4x1xf32>
    %cst_46 = arith.constant 1.280000e+02 : f32
    %243 = vector.broadcast %cst_46 : f32 to vector<4x1xf32>
    %244 = arith.divf %242, %243 : vector<4x1xf32>
    %cst_47 = arith.constant dense<0.000000e+00> : vector<32x1xf32>
    %245 = tpu.matmul %10, %244, %cst_47 {dimension_numbers = #tpu.dot_dimension_numbers<[1], [0], [0], [1], [0, 0, 1, 1], [], []>} : vector<32x4xf32>, vector<4x1xf32>, vector<32x1xf32> -> vector<32x1xf32>
    %246 = vector.broadcast %245 : vector<32x1xf32> to vector<32x16xf32>
    %247 = arith.subf %237, %246 : vector<32x16xf32>
    %248 = arith.mulf %247, %247 : vector<32x16xf32>
    %cst_48 = arith.constant dense<0.000000e+00> : vector<32xf32>
    %249 = vector.multi_reduction <add>, %248, %cst_48 [1] : vector<32x16xf32> to vector<32xf32>
    %250 = vector.shape_cast %249 : vector<32xf32> to vector<32x1xf32>
    %cst_49 = arith.constant dense<0.000000e+00> : vector<4x1xf32>
    %251 = tpu.matmul %9, %250, %cst_49 {dimension_numbers = #tpu.dot_dimension_numbers<[1], [0], [0], [1], [0, 0, 1, 1], [], []>} : vector<4x32xf32>, vector<32x1xf32>, vector<4x1xf32> -> vector<4x1xf32>
    %cst_50 = arith.constant 1.280000e+02 : f32
    %252 = vector.broadcast %cst_50 : f32 to vector<4x1xf32>
    %253 = arith.divf %251, %252 : vector<4x1xf32>
    %cst_51 = arith.constant dense<0.000000e+00> : vector<32x1xf32>
    %254 = tpu.matmul %10, %253, %cst_51 {dimension_numbers = #tpu.dot_dimension_numbers<[1], [0], [0], [1], [0, 0, 1, 1], [], []>} : vector<32x4xf32>, vector<4x1xf32>, vector<32x1xf32> -> vector<32x1xf32>
    %cst_52 = arith.constant 9.99999974E-6 : f32
    %255 = vector.broadcast %cst_52 : f32 to vector<32x1xf32>
    %256 = arith.addf %254, %255 : vector<32x1xf32>
    %257 = math.rsqrt %256 : vector<32x1xf32>
    %258 = vector.broadcast %257 : vector<32x1xf32> to vector<32x16xf32>
    %259 = arith.mulf %247, %258 : vector<32x16xf32>
    %260 = vector.broadcast %238 : vector<32x1xf32> to vector<32x16xf32>
    %261 = arith.mulf %259, %260 : vector<32x16xf32>
    %262 = vector.broadcast %239 : vector<32x1xf32> to vector<32x16xf32>
    %263 = arith.addf %261, %262 : vector<32x16xf32>
    %264 = arith.negf %263 : vector<32x16xf32>
    %265 = math.exp %264 : vector<32x16xf32>
    %cst_53 = arith.constant 1.000000e+00 : f32
    %266 = vector.broadcast %cst_53 : f32 to vector<32x16xf32>
    %267 = arith.addf %266, %265 : vector<32x16xf32>
    %268 = arith.divf %266, %267 : vector<32x16xf32>
    %c0_54 = arith.constant 0 : index
    %c0_55 = arith.constant 0 : index
    %269 = vector.load %arg4[%c0_54, %c0_55] : memref<16x256xf32, #tpu.memory_space<vmem>>, vector<16x256xf32>
    %cst_56 = arith.constant dense<0.000000e+00> : vector<32x256xf32>
    %270 = tpu.matmul %139, %269, %cst_56 {dimension_numbers = #tpu.dot_dimension_numbers<[1], [0], [0], [1], [0, 0, 1, 1], [], []>} : vector<32x16xf32>, vector<16x256xf32>, vector<32x256xf32> -> vector<32x256xf32>
    %c0_57 = arith.constant 0 : index
    %c0_58 = arith.constant 0 : index
    %271 = vector.load %arg5[%c0_57, %c0_58] : memref<16x256xf32, #tpu.memory_space<vmem>>, vector<16x256xf32>
    %cst_59 = arith.constant dense<0.000000e+00> : vector<32x256xf32>
    %272 = tpu.matmul %268, %271, %cst_59 {dimension_numbers = #tpu.dot_dimension_numbers<[1], [0], [0], [1], [0, 0, 1, 1], [], []>} : vector<32x16xf32>, vector<16x256xf32>, vector<32x256xf32> -> vector<32x256xf32>
    %273 = arith.mulf %0, %270 : vector<32x256xf32>
    %274 = arith.mulf %273, %272 : vector<32x256xf32>
    %c0_60 = arith.constant 0 : index
    %c0_61 = arith.constant 0 : index
    %275 = vector.load %arg16[%c0_60, %c0_61] : memref<32x256xf32, #tpu.memory_space<vmem>>, vector<32x256xf32>
    tpu.vector_store %arg16[%c0_60, %c0_61], %274 {strides = array<i32>} : memref<32x256xf32, #tpu.memory_space<vmem>>, vector<32x256xf32>,
    return
  }
  func.func @transform_0(%arg0: i32) -> (i32, i32) {
    %c0_i32 = arith.constant 0 : i32
    %c0_i32_0 = arith.constant 0 : i32
    return %arg0, %c0_i32 : i32, i32
  }
  func.func @transform_1(%arg0: i32) -> (i32, i32) {
    %c0_i32 = arith.constant 0 : i32
    %c0_i32_0 = arith.constant 0 : i32
    %c0_i32_1 = arith.constant 0 : i32
    return %c0_i32, %c0_i32_0 : i32, i32
  }
  func.func @transform_2(%arg0: i32) -> (i32, i32) {
    %c0_i32 = arith.constant 0 : i32
    %c0_i32_0 = arith.constant 0 : i32
    %c0_i32_1 = arith.constant 0 : i32
    return %c0_i32, %c0_i32_0 : i32, i32
  }
  func.func @transform_3(%arg0: i32) -> (i32, i32) {
    %c0_i32 = arith.constant 0 : i32
    %c0_i32_0 = arith.constant 0 : i32
    %c0_i32_1 = arith.constant 0 : i32
    return %c0_i32, %c0_i32_0 : i32, i32
  }
  func.func @transform_4(%arg0: i32) -> (i32, i32) {
    %c0_i32 = arith.constant 0 : i32
    %c0_i32_0 = arith.constant 0 : i32
    %c0_i32_1 = arith.constant 0 : i32
    return %c0_i32, %c0_i32_0 : i32, i32
  }
  func.func @transform_5(%arg0: i32) -> (i32, i32) {
    %c0_i32 = arith.constant 0 : i32
    %c0_i32_0 = arith.constant 0 : i32
    %c0_i32_1 = arith.constant 0 : i32
    return %c0_i32, %c0_i32_0 : i32, i32
  }
  func.func @transform_6(%arg0: i32) -> (i32, i32) {
    %c0_i32 = arith.constant 0 : i32
    %c0_i32_0 = arith.constant 0 : i32
    %c0_i32_1 = arith.constant 0 : i32
    return %c0_i32, %c0_i32_0 : i32, i32
  }
  func.func @transform_7(%arg0: i32) -> (i32, i32) {
    %c0_i32 = arith.constant 0 : i32
    %c0_i32_0 = arith.constant 0 : i32
    %c0_i32_1 = arith.constant 0 : i32
    return %c0_i32, %c0_i32_0 : i32, i32
  }
  func.func @transform_8(%arg0: i32) -> (i32, i32) {
    %c0_i32 = arith.constant 0 : i32
    %c0_i32_0 = arith.constant 0 : i32
    %c0_i32_1 = arith.constant 0 : i32
    return %c0_i32, %c0_i32_0 : i32, i32
  }
  func.func @transform_9(%arg0: i32) -> (i32, i32) {
    %c0_i32 = arith.constant 0 : i32
    %c0_i32_0 = arith.constant 0 : i32
    %c0_i32_1 = arith.constant 0 : i32
    return %c0_i32, %c0_i32_0 : i32, i32
  }
  func.func @transform_10(%arg0: i32) -> (i32, i32) {
    %c0_i32 = arith.constant 0 : i32
    %c0_i32_0 = arith.constant 0 : i32
    %c0_i32_1 = arith.constant 0 : i32
    return %c0_i32, %c0_i32_0 : i32, i32
  }
  func.func @transform_11(%arg0: i32) -> (i32, i32) {
    %c0_i32 = arith.constant 0 : i32
    %c0_i32_0 = arith.constant 0 : i32
    %c0_i32_1 = arith.constant 0 : i32
    return %c0_i32, %c0_i32_0 : i32, i32
  }
  func.func @transform_12(%arg0: i32) -> (i32, i32) {
    %c0_i32 = arith.constant 0 : i32
    %c0_i32_0 = arith.constant 0 : i32
    %c0_i32_1 = arith.constant 0 : i32
    return %c0_i32, %c0_i32_0 : i32, i32
  }
  func.func @transform_13(%arg0: i32) -> (i32, i32) {
    %c0_i32 = arith.constant 0 : i32
    %c0_i32_0 = arith.constant 0 : i32
    %c0_i32_1 = arith.constant 0 : i32
    return %c0_i32, %c0_i32_0 : i32, i32
  }
  func.func @transform_14(%arg0: i32) -> (i32, i32) {
    %c0_i32 = arith.constant 0 : i32
    %c0_i32_0 = arith.constant 0 : i32
    %c0_i32_1 = arith.constant 0 : i32
    return %c0_i32, %c0_i32_0 : i32, i32
  }
  func.func @transform_15(%arg0: i32) -> (i32, i32) {
    %c0_i32 = arith.constant 0 : i32
    %c0_i32_0 = arith.constant 0 : i32
    return %arg0, %c0_i32 : i32, i32
  }
}

</mosaic_0001>

<bundles_post_ra>
// kernel: tpu_custom_call.1
= control target key start
LH: loop header
LB: loop body
LE: loop exit
PB: predicated region body
PF: predicated region fallthrough
CT: control target
= control target key end

     0   :  { %s5474_s0 = inlined_call_operand.vmem [shape: f32[64,256], index: 0, kind: input, shape index: {}]   ;;  %s5475_s1 = inlined_call_operand.vmem [shape: f32[256,16], index: 1, kind: input, shape index: {}]   ;;  %s5476_s2 = inlined_call_operand.vmem [shape: f32[256,16], index: 2, kind: input, shape index: {}]   ;;  %s5477_s3 = inlined_call_operand.vmem [shape: f32[16,256], index: 3, kind: input, shape index: {}]   ;;  %s5478_s4 = inlined_call_operand.vmem [shape: f32[16,256], index: 4, kind: input, shape index: {}]   ;;  %s5479_s5 = inlined_call_operand.vmem [shape: f32[32,7], index: 5, kind: input, shape index: {}]   ;;  %s5480_s6 = inlined_call_operand.vmem [shape: f32[32,1], index: 6, kind: input, shape index: {}]   ;;  %s5481_s7 = inlined_call_operand.vmem [shape: f32[32,9], index: 7, kind: input, shape index: {}]   ;;  %s5482_s8 = inlined_call_operand.vmem [shape: f32[32,1], index: 8, kind: input, shape index: {}]   ;;  %s5483_s9 = inlined_call_operand.vmem [shape: f32[32,1], index: 9, kind: input, shape index: {}]   ;;  %s5484_s10 = inlined_call_operand.vmem [shape: f32[32,1], index: 10, kind: input, shape index: {}]   ;;  %s5485_s11 = inlined_call_operand.vmem [shape: f32[32,1], index: 11, kind: input, shape index: {}]   ;;  %s5486_s12 = inlined_call_operand.vmem [shape: f32[32,1], index: 12, kind: input, shape index: {}]   ;;  %s5487_s13 = inlined_call_operand.vmem [shape: f32[4,32], index: 13, kind: input, shape index: {}]   ;;  %s5488_s14 = inlined_call_operand.vmem [shape: f32[32,4], index: 14, kind: input, shape index: {}]   ;;  %s5489_s15 = inlined_call_operand.hbm [shape: f32[64,256], index: 15, kind: output, shape index: {}]  }
   0x1   :  { %5559 = sst [smem:[#allocation55_spill]] %s5489_s15 }
   0x2   :  { %20 = vsyncpa [#allocation3], 0 }
   0x3   :  { %22 = vsyncpa [#allocation3 + $0x1], 0  ;;  %s4038_s18 = smov 0   ;;  %s4040_s19 = smov 0  }
   0x4   :  { %s4042_s20 = smov 0   ;;  %s4044_s21 = smov 0  }
   0x5 LB: > { %5560 = sst [smem:[#allocation5_spill]] %s3919_s18  ;;  %s4059_s22 = sadd.s32 4294967295, %s3931_s21   ;;  %s3931_s21 = sphi %s4044_s21, %s5670_s21   ;;  %s3927_s20 = sphi %s4042_s20, %s5672_s20   ;;  %s3923_s19 = sphi %s4040_s19, %s5674_s19   ;;  %s3919_s18 = sphi %s4038_s18, %s5673_s18  }
   0x6   : > { %5561 = sst [smem:[#allocation6_spill]] %s3927_s20  ;;  %s3268_s23 = sadd.s32 4294967294, %s3931_s21  }
   0x7   : > { %5562 = sst [smem:[#allocation7_spill]] %s3931_s21  ;;  %s4063_s24 = sadd.s32 1, %s3931_s21  }
   0x8   : > { %5563 = sst [smem:[#allocation8_spill]] %s4063_s24  ;;  %s355_s25 = sadd.s32 1, %s3927_s20 }
   0x9   : > { %s352_s26 = ssub.s32 %s3931_s21, %s4063_s24  ;;  %p365_p0 = scmp.ne.s32.totalorder %s3927_s20, %s3923_s19 }
   0xa   : > { %p353_p1 = scmp.eq.s32.totalorder %s352_s26, 0  ;;  %p366_p2 = scmp.eq.s32.totalorder %s4059_s22, 1 }
   0xb   : > { %p371_p3 = scmp.ne.s32.totalorder %s3923_s19, %s3919_s18  ;;  %p372_p4 = scmp.eq.s32.totalorder %s3268_s23, 1 }
   0xc   : > { %s4074_s27 = scalar_select %p353_p1, %s3927_s20, %s355_s25  }
   0xd   : > { %p4076_p5 = por %p366_p2, %p365_p0  ;;  %p4080_p6 = por %p372_p4, %p371_p3 }
   0xe   : > { %5564 = sst [smem:[#allocation9_spill]] %s4074_s27  ;;  %p3271_p7 = scmp.ge.s32.totalorder %s3931_s21, 1 }
   0xf   : > { %s5566_s29 = scalar_select %p4080_p6, 1, 0 }
  0x10   : > { %p442_p8 = scmp.lt.s32.totalorder %s3931_s21, 3 }
  0x11   : > { %5567 = sst [smem:[#allocation10_spill]] %s5566_s29 }
  0x12   : > { %p443_p9 = pnand %p3271_p7, %p442_p8 }
  0x14   : > { %446 = sbr.rel (%p443_p9) target bundleno = 3320 (0xcf8), region = 80 }
  0x1b   : > { %v523_v0 = vld [vmem:[%s5475_s1 + $0x80] sm:$0xff]  ;;  %v524_v1 = vld [vmem:[%s5475_s1 + $0x88] sm:$0xff]  ;;  %s3273_s27 = sshll.u32 %s4059_s22, 2  ;;  %v525_v5 = vld [vmem:[%s5475_s1 + $0x90] sm:$0xff]  ;;  %v3933_v7 = vmov 2   ;;  %v3934_v8 = vmov 1  }
  0x1c   : > { %v507_v2 = vld [vmem:[%s5475_s1] sm:$0xff]  ;;  %v3545_v3 = vpack.c.bf16 %v524_v1, %v523_v0  ;;  %v508_v4 = vld [vmem:[%s5475_s1 + $0x8] sm:$0xff]  ;;  %v526_v6 = vld [vmem:[%s5475_s1 + $0x98] sm:$0xff]  ;;  %p492_p10 = scmp.lt.s32.totalorder %s3273_s27, 7  ;;  %3705 = vset.pattern.permute.xlu1 %v3933_v7  ;;  %3704 = vset.pattern.permute.xlu0 %v3934_v8  ;;  %v3935_v54 = vmov 3   ;;  %v3936_v60 = vmov 4  }
  0x1d   : > { %v3547_v9 = vpack.c.bf16 %v508_v4, %v507_v2  ;;  %v3549_v10 = vpack.c.bf16 %v526_v6, %v525_v5  ;;  %v509_v11 = vld [vmem:[%s5475_s1 + $0x10] sm:$0xff]  ;;  %v510_v12 = vld [vmem:[%s5475_s1 + $0x18] sm:$0xff]  ;;  %v527_v13 = vld [vmem:[%s5475_s1 + $0xa0] sm:$0xff]  ;;  %v3937_v63 = vmov 5   ;;  %v3938_v1 = vmov 6   ;;  %s5497_s29 = smov 3  }
  0x1e   : > { %3546 = vmatprep.subr.bf16.mxu0 %v3545_v3  ;;  %v528_v14 = vld [vmem:[%s5475_s1 + $0xa8] sm:$0xff]  ;;  %s5676_s27 = smov (!%p492_p10, %s3273_s27), 7  ;;  %v3551_v15 = vpack.c.bf16 %v510_v12, %v509_v11  ;;  %v511_v17 = vld [vmem:[%s5475_s1 + $0x20] sm:$0xff]  ;;  %v529_v19 = vld [vmem:[%s5475_s1 + $0xb0] sm:$0xff]  ;;  %vm778_vm0 = vcmask 23552   ;;  %vm783_vm1 = vcmask 154624  }
  0x1f   : > { %3548 = vmatpush3.bf16.msra.mxu0 %v3547_v9  ;;  %v3553_v16 = vpack.c.bf16 %v528_v14, %v527_v13  ;;  %v512_v18 = vld [vmem:[%s5475_s1 + $0x28] sm:$0xff]  ;;  %s3338_s24 = sshll.u32 %s5676_s27, 4  ;;  %v530_v20 = vld [vmem:[%s5475_s1 + $0xb8] sm:$0xff]  ;;  %v513_v23 = vld [vmem:[%s5475_s1 + $0x30] sm:$0xff]  ;;  %v5499_v13 = vmov 0   ;;  %s3941_s18 = smov 127  }
  0x20   : > { %3550 = vmatprep.subr.bf16.mxu0 %v3549_v10  ;;  %s4134_s15 = scalar_lea.vmem %s5474_s0, %s3338_s24  ;;  %v3555_v21 = vpack.c.bf16 %v512_v18, %v511_v17  ;;  %v3557_v22 = vpack.c.bf16 %v530_v20, %v529_v19  ;;  %v514_v24 = vld [vmem:[%s5475_s1 + $0x38] sm:$0xff]  ;;  %v531_v25 = vld [vmem:[%s5475_s1 + $0xc0] sm:$0xff]  ;;  %v532_v26 = vld [vmem:[%s5475_s1 + $0xc8] sm:$0xff]  ;;  %s3942_s21 = smov 126   ;;  %vm1120_vm2 = vcmask 31744   ;;  %vm1125_vm3 = vcmask 162816  }
  0x21   : > { %v500_v27 = vld [vmem:[%s4134_s15 + $0x8] sm:$0xff]  ;;  %v3559_v28 = vpack.c.bf16 %v514_v24, %v513_v23  ;;  %v3561_v29 = vpack.c.bf16 %v532_v26, %v531_v25  ;;  %v515_v30 = vld [vmem:[%s5475_s1 + $0x40] sm:$0xff]  ;;  %v533_v33 = vld [vmem:[%s5475_s1 + $0xd0] sm:$0xff]  ;;  %s5508_s24 = smov 125   ;;  %s5506_s23 = smov 124   ;;  %vm1534_vm4 = vcmask 130048  }
  0x22   : > { %603 = vmatprep.mubr.f32.mxu0 %v500_v27  ;;  %720 = vmatprep.mubr.f32.mxu1 %v500_v27  ;;  %v516_v31 = vld [vmem:[%s5475_s1 + $0x48] sm:$0xff]  ;;  %v4158_v32 = vld [vmem:[%s5479_s5] sm:$0xff]  ;;  %v534_v34 = vld [vmem:[%s5475_s1 + $0xd8] sm:$0xff]  ;;  %s5504_s25 = smov 123   ;;  %s5502_s26 = smov 122   ;;  %vm3953_vm5 = vmmov 0  }
  0x23   : > { %3552 = vmatpush3.bf16.msra.mxu0 %v3551_v15  ;;  %877 = vperm.xlu1 %3705, %v4158_v32   ;;  %v4171_v35 = vld [vmem:[%s5479_s5 + $0x8] sm:$0xff]  ;;  %v3563_v36 = vpack.c.bf16 %v516_v31, %v515_v30  ;;  %v3565_v37 = vpack.c.bf16 %v534_v34, %v533_v33  ;;  %v517_v38 = vld [vmem:[%s5475_s1 + $0x50] sm:$0xff]  ;;  %v518_v39 = vld [vmem:[%s5475_s1 + $0x58] sm:$0xff]  ;;  %s3949_s17 = smov 4   ;;  %s5611_s30 = smov 125   ;;  %vm1547_vm6 = vcmask 261120  }
  0x24   : > { %3554 = vmatprep.subr.bf16.mxu0 %v3553_v16  ;;  %837 = vperm.xlu0 %3704, %v4158_v32   ;;  %v535_v40 = vld [vmem:[%s5475_s1 + $0xe0] sm:$0xff]  ;;  %v536_v41 = vld [vmem:[%s5475_s1 + $0xe8] sm:$0xff]  ;;  %v3567_v42 = vpack.c.bf16 %v518_v39, %v517_v38  ;;  %v4190_v43 = vld [vmem:[%s5479_s5 + $0x18] sm:$0xff]  ;;  %s5612_s27 = smov 124   ;;  %vm1635_vm7 = vcmask 1043456  }
  0x25   : > { %v3569_v44 = vpack.c.bf16 %v536_v41, %v535_v40  ;;  %v519_v45 = vld [vmem:[%s5475_s1 + $0x60] sm:$0xff]  ;;  %v520_v46 = vld [vmem:[%s5475_s1 + $0x68] sm:$0xff]  ;;  %v4201_v47 = vld [vmem:[%s5479_s5 + $0x10] sm:$0xff] }
  0x26   : > { %v537_v48 = vld [vmem:[%s5475_s1 + $0xf0] sm:$0xff]  ;;  %v538_v49 = vld [vmem:[%s5475_s1 + $0xf8] sm:$0xff]  ;;  %v3571_v50 = vpack.c.bf16 %v520_v46, %v519_v45  ;;  %v4224_v56 = vld [vmem:[%s4134_s15] sm:$0xff] }
  0x27   : > { %3556 = vmatpush3.bf16.msra.mxu0 %v3555_v21  ;;  %881 = vperm.xlu1 %3705, %v4171_v35   ;;  %v3573_v51 = vpack.c.bf16 %v538_v49, %v537_v48  ;;  %v521_v52 = vld [vmem:[%s5475_s1 + $0x70] sm:$0xff]  ;;  %v522_v53 = vld [vmem:[%s5475_s1 + $0x78] sm:$0xff]  ;;  %v4238_v59 = vld [vmem:[%s4134_s15 + $0x28] sm:$0xff] }
  0x28   : > { %3558 = vmatprep.subr.bf16.mxu0 %v3557_v22  ;;  %841 = vperm.xlu0 %3704, %v4171_v35   ;;  %v3575_v55 = vpack.c.bf16 %v522_v53, %v521_v52  ;;  %v4228_v57 = vld [vmem:[%s4134_s15 + $0x18] sm:$0xff]  ;;  %v4235_v58 = vld [vmem:[%s4134_s15 + $0x10] sm:$0xff]  ;;  %v4246_v61 = vld [vmem:[%s4134_s15 + $0x20] sm:$0xff] }
  0x29   : > { %v4249_v62 = vld [vmem:[%s4134_s15 + $0x38] sm:$0xff]  ;;  %v4257_v0 = vld [vmem:[%s4134_s15 + $0x30] sm:$0xff]  ;;  %v746_v17 = vld [vmem:[%s5480_s6 + $0x8] sm:$0xff] }
  0x2a   : > { %v745_v18 = vld [vmem:[%s5480_s6] sm:$0xff]  ;;  %v748_v19 = vld [vmem:[%s5480_s6 + $0x18] sm:$0xff]  ;;  %v747_v20 = vld [vmem:[%s5480_s6 + $0x10] sm:$0xff] }
  0x2b   : > { %3560 = vmatpush3.bf16.msra.mxu0 %v3559_v28  ;;  %3706 = vset.pattern.permute.xlu1 %v3934_v8 }
  0x2c   : > { %3562 = vmatprep.subr.bf16.mxu0 %v3561_v29  ;;  %845 = vperm.xlu0 %3704, %v4201_v47  }
  0x2d   : > { %849 = vperm.xlu1 %3706, %v4190_v43  }
  0x2f   : > { %3564 = vmatpush3.bf16.msra.mxu0 %v3563_v36 }
  0x30   : > { %3566 = vmatprep.subr.bf16.mxu0 %v3565_v37  ;;  %3709 = vset.pattern.permute.xlu0 %v3933_v7 }
  0x31   : > { %3707 = vset.pattern.permute.xlu1 %v3935_v54  ;;  %889 = vperm.xlu0 %3709, %v4190_v43  }
  0x32   : > { %921 = vperm.xlu1 %3707, %v4171_v35  }
  0x33   : > { %3568 = vmatpush3.bf16.msra.mxu0 %v3567_v42 }
  0x34   : > { %3570 = vmatprep.subr.bf16.mxu0 %v3569_v44 }
  0x35   : > { %3710 = vset.pattern.permute.xlu0 %v3935_v54 }
  0x36   : > { %3708 = vset.pattern.permute.xlu1 %v3933_v7  ;;  %917 = vperm.xlu0 %3710, %v4158_v32  }
  0x37   : > { %3572 = vmatpush3.bf16.msra.mxu0 %v3571_v50  ;;  %885 = vperm.xlu1 %3708, %v4201_v47  }
  0x38   : > { %3574 = vmatprep.subr.bf16.mxu0 %v3573_v51 }
  0x3a   : > { %925 = vperm.xlu0 %3710, %v4201_v47  }
  0x3b   : > { %3576 = vmatpush3.bf16.msra.mxu0 %v3575_v55  ;;  %3711 = vset.pattern.permute.xlu1 %v3936_v60 }
  0x3c   : > { %957 = vperm.xlu1 %3711, %v4158_v32  }
  0x3e   : > { %604 = vmatmul.mubr.f32.vlgmr.msra.gmra.mrb[0].mxu0 %v4224_v56  ;;  %3714 = vset.pattern.permute.xlu0 %v3937_v63 }
  0x3f   : > { %608 = vmatprep.mubr.f32.mxu0 %v4228_v57  ;;  %1001 = vperm.xlu0 %3714, %v4171_v35  }
  0x40   : > { %961 = vperm.xlu1 %3711, %v4171_v35  }
  0x42   : > { %609 = vmatmul.mubr.f32.gmra.mrb[2].mxu0 %v4235_v58 }
  0x43   : > { %613 = vmatprep.mubr.f32.mxu0 %v4238_v59  ;;  %3715 = vset.pattern.permute.xlu0 %v3936_v60 }
  0x44   : > { %3712 = vset.pattern.permute.xlu1 %v3935_v54  ;;  %965 = vperm.xlu0 %3715, %v4201_v47  }
  0x45   : > { %929 = vperm.xlu1 %3712, %v4190_v43  }
  0x46   : > { %614 = vmatmul.mubr.f32.gmra.mrb[4].mxu0 %v4246_v61 }
  0x47   : > { %618 = vmatprep.mubr.f32.mxu0 %v4249_v62 }
  0x48   : > { %3718 = vset.pattern.permute.xlu0 %v3938_v1 }
  0x49   : > { %3713 = vset.pattern.permute.xlu1 %v3937_v63  ;;  %1041 = vperm.xlu0 %3718, %v4171_v35  }
  0x4a   : > { %619 = vmatmul.mubr.f32.gmra.mrb[6].mxu0 %v4257_v0  ;;  %997 = vperm.xlu1 %3713, %v4158_v32  }
  0x4e   : > { %3716 = vset.pattern.permute.xlu1 %v3936_v60 }
  0x4f   : > { %969 = vperm.xlu1 %3716, %v4190_v43  }
  0x53   : > { %3717 = vset.pattern.permute.xlu1 %v3938_v1 }
  0x54   : > { %1037 = vperm.xlu1 %3717, %v4158_v32  }
  0x58   : > { %3719 = vset.pattern.permute.xlu1 %v3937_v63 }
  0x59   : > { %1005 = vperm.xlu1 %3719, %v4201_v47  }
  0x5d   : > { %1009 = vperm.xlu1 %3719, %v4190_v43  }
  0x61   : > { %3720 = vset.pattern.permute.xlu1 %v3938_v1 }
  0xa2   : > { %v4302_v21 = vpop.permute.xlu1 %877 }
  0xa3   : > { %v4312_v26 = vpop.permute.xlu0 %837 }
  0xa6   : > { %v4304_v22 = vpop.permute.xlu1 %881 }
  0xa7   : > { %v4316_v28 = vpop.permute.xlu0 %841 }
  0xab   : > { %v4322_v31 = vpop.permute.xlu0 %845 }
  0xac   : > { %v4306_v23 = vpop.permute.xlu1 %849 }
  0xb1   : > { %v4308_v24 = vpop.permute.xlu1 %921 }
  0xb6   : > { %v4310_v25 = vpop.permute.xlu1 %885 }
  0xbb   : > { %v4314_v27 = vpop.permute.xlu1 %957 }
  0xbf   : > { %v4318_v29 = vpop.permute.xlu1 %961 }
  0xc4   : > { %v4320_v30 = vpop.permute.xlu1 %929 }
  0xc9   : > { %v4326_v33 = vpop.permute.xlu1 %997 }
 0x111   : > { %v3373_v2 = vpop.f32.mrb[0].mxu0 }
 0x112   : > { %v3374_v3 = vpop.f32.mrb[1].mxu0 }
 0x113   : > { %v3375_v4 = vadd.f32 %v3374_v3, %v3373_v2 }
 0x115   : > { %v3376_v5 = vpop.f32.mrb[2].mxu0  ;;  %766 = vrot.lane.b32.xlu1 %v3375_v4, %s5497_s29 }
 0x116   : > { %v3377_v6 = vpop.f32.mrb[3].mxu0 }
 0x117   : > { %v3378_v9 = vadd.f32 %v3377_v6, %v3376_v5 }
 0x119   : > { %768 = vrot.lane.b32.xlu0 %v3378_v9, %s5497_s29  ;;  %1049 = vperm.xlu1 %3720, %v4190_v43   ;;  %v3379_v10 = vpop.f32.mrb[4].mxu0 }
 0x11a   : > { %v3380_v11 = vpop.f32.mrb[5].mxu0 }
 0x11b   : > { %v3381_v12 = vadd.f32 %v3380_v11, %v3379_v10 }
 0x11d   : > { %1045 = vperm.xlu0 %3718, %v4201_v47   ;;  %3722 = vset.pattern.permute.xlu1 %v5499_v13  ;;  %v3382_v14 = vpop.f32.mrb[6].mxu0 }
 0x11e   : > { %795 = vperm.xlu1 %3722, %v4171_v35   ;;  %v3383_v15 = vpop.f32.mrb[7].mxu0  ;;  %v4330_v35 = vpop.permute.xlu1 %969 }
 0x11f   : > { %v3384_v16 = vadd.f32 %v3383_v15, %v3382_v14 }
 0x121   : > { %3721 = vset.pattern.permute.xlu0 %v5499_v13 }
 0x122   : > { %790 = vperm.xlu0 %3721, %v4158_v32   ;;  %770 = vrot.lane.b32.xlu1 %v3381_v12, %s5497_s29  ;;  %v4324_v32 = vpop.permute.xlu0 %889  ;;  %v4334_v37 = vpop.permute.xlu1 %1037 }
 0x126   : > { %819 = vperm.xlu0 %3721, %v746_v17   ;;  %772 = vrot.lane.b32.xlu1 %v3384_v16, %s5497_s29  ;;  %v4328_v34 = vpop.permute.xlu0 %917  ;;  %v4338_v39 = vpop.permute.xlu1 %1005  ;;  %s5619_s29 = smov 3  }
 0x12a   : > { %814 = vperm.xlu1 %3722, %v745_v18   ;;  %805 = vperm.xlu0 %3721, %v4190_v43   ;;  %v4332_v36 = vpop.permute.xlu0 %925  ;;  %v4342_v41 = vpop.permute.xlu1 %1009 }
 0x12e   : > { %800 = vperm.xlu1 %3722, %v4201_v47   ;;  %829 = vperm.xlu0 %3721, %v748_v19   ;;  %v4336_v38 = vpop.permute.xlu0 %1001 }
 0x132   : > { %824 = vperm.xlu1 %3722, %v747_v20   ;;  %3724 = vset.pattern.permute.xlu0 %v3934_v8  ;;  %v4340_v40 = vpop.permute.xlu0 %965 }
 0x136   : > { %3723 = vset.pattern.permute.xlu1 %v3934_v8  ;;  %v4344_v42 = vpop.permute.xlu0 %1041 }
 0x187   : > { %v767_v43 = vpop.permute.xlu1 %766 }
 0x188   : > { %v779_v44 = vsel %vm778_vm0, 0.0, %v767_v43 }
 0x189   : > { %v4348_v45 = vsel %vm783_vm1, %v779_v44, 0.0 }
 0x18a   : > { %v852_v46 = vmul.f32 %v4312_v26, %v4348_v45  ;;  %v892_v51 = vmul.f32 %v4302_v21, %v4348_v45  ;;  %v932_v53 = vmul.f32 %v4328_v34, %v4348_v45  ;;  %v972_v2 = vmul.f32 %v4314_v27, %v4348_v45 }
 0x18b   : > { %v769_v47 = vpop.permute.xlu0 %768  ;;  %v1012_v5 = vmul.f32 %v4326_v33, %v4348_v45  ;;  %v1052_v10 = vmul.f32 %v4334_v37, %v4348_v45 }
 0x18c   : > { %v780_v48 = vsel %vm778_vm0, 0.0, %v769_v47  ;;  %860 = vrot.lane.b32.xlu1 %v852_v46, %s3941_s18 }
 0x18d   : > { %v4355_v49 = vsel %vm783_vm1, %v780_v48, 0.0 }
 0x18e   : > { %v853_v50 = vmul.f32 %v4316_v28, %v4355_v49  ;;  %v893_v52 = vmul.f32 %v4304_v22, %v4355_v49  ;;  %v933_v55 = vmul.f32 %v4308_v24, %v4355_v49  ;;  %v973_v4 = vmul.f32 %v4318_v29, %v4355_v49 }
 0x18f   : > { %v1013_v9 = vmul.f32 %v4336_v38, %v4355_v49  ;;  %v1053_v14 = vmul.f32 %v4344_v42, %v4355_v49 }
 0x190   : > { %862 = vrot.lane.b32.xlu0 %v853_v50, %s3941_s18  ;;  %900 = vrot.lane.b32.xlu1 %v892_v51, %s3942_s21 }
 0x194   : > { %902 = vrot.lane.b32.xlu0 %v893_v52, %s3942_s21  ;;  %940 = vrot.lane.b32.xlu1 %v932_v53, %s5508_s24 }
 0x198   : > { %942 = vrot.lane.b32.xlu0 %v933_v55, %s5508_s24  ;;  %980 = vrot.lane.b32.xlu1 %v972_v2, %s5506_s23  ;;  %v4375_v3 = vpop.permute.xlu1 %1049  ;;  %v4440_v2 = vld [vmem:[%s5481_s7] sm:$0xff] }
 0x199   : > { %5568 = vst [vmem:[#allocation11_spill] sm:$0xff] %v4375_v3 }
 0x19c   : > { %982 = vrot.lane.b32.xlu0 %v973_v4, %s5506_s23  ;;  %1020 = vrot.lane.b32.xlu1 %v1012_v5, %s5504_s25  ;;  %v4429_v52 = vpop.permute.xlu0 %1045  ;;  %v4449_v5 = vld [vmem:[%s5481_s7 + $0x8] sm:$0xff] }
 0x19d   : > { %v4383_v6 = vpop.permute.xlu1 %795 }
 0x19e   : > { %5569 = vst [vmem:[#allocation12_spill] sm:$0xff] %v4383_v6 }
 0x1a0   : > { %1022 = vrot.lane.b32.xlu0 %v1013_v9, %s5504_s25  ;;  %1060 = vrot.lane.b32.xlu1 %v1052_v10, %s5502_s26  ;;  %v4457_v9 = vld [vmem:[%s5481_s7 + $0x10] sm:$0xff]  ;;  %v4464_v10 = vld [vmem:[%s5481_s7 + $0x18] sm:$0xff] }
 0x1a1   : > { %v771_v11 = vpop.permute.xlu1 %770 }
 0x1a2   : > { %v781_v12 = vsel %vm778_vm0, 0.0, %v771_v11 }
 0x1a3   : > { %v4395_v15 = vsel %vm783_vm1, %v781_v12, 0.0 }
 0x1a4   : > { %1062 = vrot.lane.b32.xlu0 %v1053_v14, %s5502_s26  ;;  %v854_v16 = vmul.f32 %v4322_v31, %v4395_v15  ;;  %v894_v20 = vmul.f32 %v4310_v25, %v4395_v15  ;;  %v934_v44 = vmul.f32 %v4332_v36, %v4395_v15  ;;  %v974_v47 = vmul.f32 %v4340_v40, %v4395_v15 }
 0x1a5   : > { %v773_v17 = vpop.permute.xlu1 %772  ;;  %v1014_v50 = vmul.f32 %v4338_v39, %v4395_v15  ;;  %v1054_v53 = vmul.f32 %v4429_v52, %v4395_v15  ;;  %v5510_v14 = vmov 8  }
 0x1a6   : > { %v782_v18 = vsel %vm778_vm0, 0.0, %v773_v17  ;;  %864 = vrot.lane.b32.xlu1 %v854_v16, %s3941_s18 }
 0x1a7   : > { %v4403_v19 = vsel %vm783_vm1, %v782_v18, 0.0 }
 0x1a8   : > { %v855_v43 = vmul.f32 %v4306_v23, %v4403_v19  ;;  %v895_v46 = vmul.f32 %v4324_v32, %v4403_v19  ;;  %v935_v48 = vmul.f32 %v4320_v30, %v4403_v19  ;;  %v975_v51 = vmul.f32 %v4330_v35, %v4403_v19 }
 0x1a9   : > { %v1015_v55 = vmul.f32 %v4342_v41, %v4403_v19  ;;  %v1055_v4 = vmul.f32 %v4375_v3, %v4403_v19 }
 0x1aa   : > { %904 = vrot.lane.b32.xlu1 %v894_v20, %s3942_s21  ;;  %866 = vrot.lane.b32.xlu0 %v855_v43, %s3941_s18 }
 0x1ae   : > { %944 = vrot.lane.b32.xlu1 %v934_v44, %s5508_s24  ;;  %906 = vrot.lane.b32.xlu0 %v895_v46, %s3942_s21 }
 0x1b2   : > { %984 = vrot.lane.b32.xlu1 %v974_v47, %s5506_s23  ;;  %946 = vrot.lane.b32.xlu0 %v935_v48, %s5508_s24  ;;  %v809_v48 = vmul.f32 %v4383_v6, %v4355_v49  ;;  %v641_v49 = vld [vmem:[%s5476_s2 + $0x88] sm:$0xff]  ;;  %s5555_s24 = smov 120  }
 0x1b6   : > { %1024 = vrot.lane.b32.xlu1 %v1014_v50, %s5504_s25  ;;  %986 = vrot.lane.b32.xlu0 %v975_v51, %s5506_s23  ;;  %s5614_s23 = smov 123  }
 0x1ba   : > { %1064 = vrot.lane.b32.xlu1 %v1054_v53, %s5502_s26  ;;  %1026 = vrot.lane.b32.xlu0 %v1015_v55, %s5504_s25  ;;  %s5616_s25 = smov 122  }
 0x1be   : > { %1066 = vrot.lane.b32.xlu0 %v1055_v4, %s5502_s26  ;;  %1179 = vperm.xlu1 %3723, %v4440_v2   ;;  %s5557_s26 = smov 121  }
 0x1c2   : > { %3725 = vset.pattern.permute.xlu1 %v3933_v7  ;;  %1183 = vperm.xlu0 %3724, %v4449_v5  }
 0x1c3   : > { %1219 = vperm.xlu1 %3725, %v4440_v2  }
 0x1c6   : > { %1187 = vperm.xlu0 %3724, %v4457_v9  }
 0x1c7   : > { %1223 = vperm.xlu1 %3725, %v4449_v5  }
 0x1ca   : > { %3729 = vset.pattern.permute.xlu0 %v3933_v7 }
 0x1cb   : > { %3726 = vset.pattern.permute.xlu1 %v3934_v8  ;;  %1231 = vperm.xlu0 %3729, %v4464_v10   ;;  %v4492_v8 = vpop.permute.xlu0 %790 }
 0x1cc   : > { %1191 = vperm.xlu1 %3726, %v4464_v10   ;;  %5570 = vst [vmem:[#allocation13_spill] sm:$0xff] %v4492_v8 }
 0x1cf   : > { %3730 = vset.pattern.permute.xlu0 %v3935_v54  ;;  %v4500_v11 = vpop.permute.xlu0 %819 }
 0x1d0   : > { %3727 = vset.pattern.permute.xlu1 %v3935_v54  ;;  %1259 = vperm.xlu0 %3730, %v4440_v2   ;;  %5572 = vst [vmem:[#allocation15_spill] sm:$0xff] %v4500_v11  ;;  %v833_v55 = vadd.f32 %v4500_v11, %v809_v48  ;;  %v642_v48 = vld [vmem:[%s5476_s2 + $0x90] sm:$0xff] }
 0x1d1   : > { %1263 = vperm.xlu1 %3727, %v4449_v5  }
 0x1d4   : > { %1267 = vperm.xlu0 %3730, %v4457_v9  }
 0x1d5   : > { %3728 = vset.pattern.permute.xlu1 %v3933_v7  ;;  %v5501_v7 = vmov 7  }
 0x1d6   : > { %1227 = vperm.xlu1 %3728, %v4457_v9  }
 0x1d8   : > { %3734 = vset.pattern.permute.xlu0 %v3937_v63 }
 0x1d9   : > { %1343 = vperm.xlu0 %3734, %v4449_v5  }
 0x1da   : > { %3731 = vset.pattern.permute.xlu1 %v3936_v60 }
 0x1db   : > { %1299 = vperm.xlu1 %3731, %v4440_v2  }
 0x1dd   : > { %3735 = vset.pattern.permute.xlu0 %v3936_v60 }
 0x1de   : > { %1307 = vperm.xlu0 %3735, %v4457_v9  }
 0x1df   : > { %1303 = vperm.xlu1 %3731, %v4449_v5  }
 0x1e2   : > { %3738 = vset.pattern.permute.xlu0 %v3938_v1 }
 0x1e3   : > { %3732 = vset.pattern.permute.xlu1 %v3935_v54  ;;  %1383 = vperm.xlu0 %3738, %v4449_v5   ;;  %v4496_v54 = vpop.permute.xlu1 %814 }
 0x1e4   : > { %1271 = vperm.xlu1 %3732, %v4464_v10   ;;  %5571 = vst [vmem:[#allocation14_spill] sm:$0xff] %v4496_v54 }
 0x1e7   : > { %1391 = vperm.xlu0 %3738, %v4464_v10   ;;  %v4504_v12 = vpop.permute.xlu1 %800 }
 0x1e8   : > { %3733 = vset.pattern.permute.xlu1 %v3937_v63  ;;  %5573 = vst [vmem:[#allocation16_spill] sm:$0xff] %v4504_v12 }
 0x1e9   : > { %1339 = vperm.xlu1 %3733, %v4440_v2  }
 0x1eb   : > { %3742 = vset.pattern.permute.xlu0 %v5501_v7  ;;  %v4511_v16 = vpop.permute.xlu1 %824 }
 0x1ec   : > { %1419 = vperm.xlu0 %3742, %v4440_v2   ;;  %5575 = vst [vmem:[#allocation18_spill] sm:$0xff] %v4511_v16 }
 0x1ed   : > { %3736 = vset.pattern.permute.xlu1 %v3936_v60  ;;  %v4508_v60 = vpop.permute.xlu0 %805 }
 0x1ee   : > { %1311 = vperm.xlu1 %3736, %v4464_v10   ;;  %5574 = vst [vmem:[#allocation17_spill] sm:$0xff] %v4508_v60 }
 0x1f0   : > { %1427 = vperm.xlu0 %3742, %v4457_v9  }
 0x1f1   : > { %v4514_v17 = vpop.permute.xlu0 %829 }
 0x1f2   : > { %3737 = vset.pattern.permute.xlu1 %v3938_v1  ;;  %5576 = vst [vmem:[#allocation19_spill] sm:$0xff] %v4514_v17 }
 0x1f3   : > { %1379 = vperm.xlu1 %3737, %v4440_v2  }
 0x1f4   : > { %3746 = vset.pattern.permute.xlu0 %v5510_v14 }
 0x1f7   : > { %3739 = vset.pattern.permute.xlu1 %v3937_v63  ;;  %v808_v63 = vmul.f32 %v4492_v8, %v4348_v45 }
 0x1f8   : > { %1347 = vperm.xlu1 %3739, %v4457_v9  }
 0x1f9   : > { %v832_v47 = vadd.f32 %v4496_v54, %v808_v63  ;;  %v640_v63 = vld [vmem:[%s5476_s2 + $0x80] sm:$0xff] }
 0x1fc   : > { %1351 = vperm.xlu1 %3739, %v4464_v10  }
 0x1fe   : > { %v861_v18 = vpop.permute.xlu1 %860 }
 0x1ff   : > { %v872_v50 = vadd.f32 %v861_v18, %v832_v47  ;;  %v624_v18 = vld [vmem:[%s5476_s2] sm:$0xff] }
 0x200   : > { %3740 = vset.pattern.permute.xlu1 %v5501_v7 }
 0x201   : > { %1423 = vperm.xlu1 %3740, %v4449_v5  }
 0x202   : > { %v863_v20 = vpop.permute.xlu0 %862  ;;  %v901_v43 = vpop.permute.xlu1 %900 }
 0x203   : > { %v912_v4 = vadd.f32 %v901_v43, %v872_v50  ;;  %v643_v50 = vld [vmem:[%s5476_s2 + $0x98] sm:$0xff] }
 0x205   : > { %3741 = vset.pattern.permute.xlu1 %v3938_v1  ;;  %v873_v1 = vadd.f32 %v863_v20, %v833_v55  ;;  %v3577_v20 = vpack.c.bf16 %v641_v49, %v640_v63 }
 0x206   : > { %v903_v44 = vpop.permute.xlu0 %902  ;;  %v941_v46 = vpop.permute.xlu1 %940  ;;  %1387 = vperm.xlu1 %3741, %v4457_v9  }
 0x207   : > { %v952_v45 = vadd.f32 %v941_v46, %v912_v4  ;;  %v913_v47 = vadd.f32 %v903_v44, %v873_v1  ;;  %v625_v46 = vld [vmem:[%s5476_s2 + $0x8] sm:$0xff]  ;;  %v3581_v4 = vpack.c.bf16 %v643_v50, %v642_v48  ;;  %v626_v44 = vld [vmem:[%s5476_s2 + $0x10] sm:$0xff]  ;;  %3578 = vmatprep.subr.bf16.mxu1 %v3577_v20 }
 0x208   : > { %v3579_v55 = vpack.c.bf16 %v625_v46, %v624_v18  ;;  %v5577_v18 = vmov 7   ;;  %v644_v46 = vld [vmem:[%s5476_s2 + $0xa0] sm:$0xff] }
 0x20a   : > { %v943_v51 = vpop.permute.xlu0 %942  ;;  %v981_v53 = vpop.permute.xlu1 %980  ;;  %3743 = vset.pattern.permute.xlu1 %v5510_v14  ;;  %3580 = vmatpush3.bf16.msra.mxu1 %v3579_v55 }
 0x20b   : > { %1459 = vperm.xlu1 %3743, %v4440_v2   ;;  %v992_v43 = vadd.f32 %v981_v53, %v952_v45  ;;  %v627_v53 = vld [vmem:[%s5476_s2 + $0x18] sm:$0xff]  ;;  %v953_v1 = vadd.f32 %v943_v51, %v913_v47  ;;  %3582 = vmatprep.subr.bf16.mxu1 %v3581_v4  ;;  %v645_v51 = vld [vmem:[%s5476_s2 + $0xa8] sm:$0xff] }
 0x20c   : > { %v3583_v14 = vpack.c.bf16 %v627_v53, %v626_v44  ;;  %v629_v47 = vld [vmem:[%s5476_s2 + $0x28] sm:$0xff]  ;;  %v5578_v44 = vmov 8   ;;  %v646_v53 = vld [vmem:[%s5476_s2 + $0xb0] sm:$0xff] }
 0x20e   : > { %v983_v13 = vpop.permute.xlu0 %982  ;;  %v1021_v7 = vpop.permute.xlu1 %1020  ;;  %3584 = vmatpush3.bf16.msra.mxu1 %v3583_v14  ;;  %v630_v14 = vld [vmem:[%s5476_s2 + $0x30] sm:$0xff] }
 0x20f   : > { %1463 = vperm.xlu1 %3743, %v4449_v5   ;;  %v1032_v45 = vadd.f32 %v1021_v7, %v992_v43  ;;  %v993_v11 = vadd.f32 %v983_v13, %v953_v1  ;;  %v628_v7 = vld [vmem:[%s5476_s2 + $0x20] sm:$0xff]  ;;  %v3585_v13 = vpack.c.bf16 %v645_v51, %v644_v46  ;;  %v5579_v51 = vmov 0  }
 0x210   : > { %v3587_v50 = vpack.c.bf16 %v629_v47, %v628_v7  ;;  %v810_v7 = vmul.f32 %v4504_v12, %v4395_v15  ;;  %v649_v15 = vld [vmem:[%s5476_s2 + $0xc8] sm:$0xff] }
 0x211   : > { %3586 = vmatprep.subr.bf16.mxu1 %v3585_v13 }
 0x212   : > { %v1023_v63 = vpop.permute.xlu0 %1022  ;;  %v1061_v49 = vpop.permute.xlu1 %1060  ;;  %3588 = vmatpush3.bf16.msra.mxu1 %v3587_v50 }
 0x213   : > { %v4553_v6 = vadd.f32 %v1061_v49, %v1032_v45  ;;  %3744 = vset.pattern.permute.xlu1 %v5577_v18  ;;  %v1033_v43 = vadd.f32 %v1023_v63, %v993_v11  ;;  %v647_v11 = vld [vmem:[%s5476_s2 + $0xb8] sm:$0xff] }
 0x214   : > { %1431 = vperm.xlu1 %3744, %v4464_v10   ;;  %v3589_v45 = vpack.c.bf16 %v647_v11, %v646_v53  ;;  %v631_v63 = vld [vmem:[%s5476_s2 + $0x38] sm:$0xff] }
 0x215   : > { %v3276_v20 = vmul.f32 -1.442695, %v4553_v6  ;;  %v3591_v49 = vpack.c.bf16 %v631_v63, %v630_v14  ;;  %v648_v14 = vld [vmem:[%s5476_s2 + $0xc0] sm:$0xff] }
 0x216   : > { %v1063_v48 = vpop.permute.xlu0 %1062  ;;  %3590 = vmatprep.subr.bf16.mxu1 %v3589_v45 }
 0x217   : > { %3749 = vpow2.f32 %v3276_v20  ;;  %v4570_v55 = vadd.f32 %v1063_v48, %v1033_v43  ;;  %3592 = vmatpush3.bf16.msra.mxu1 %v3591_v49  ;;  %v811_v20 = vmul.f32 %v4508_v60, %v4403_v19  ;;  %v834_v48 = vadd.f32 %v4511_v16, %v810_v7  ;;  %v633_v49 = vld [vmem:[%s5476_s2 + $0x48] sm:$0xff] }
 0x218   : > { %v865_v4 = vpop.permute.xlu1 %864  ;;  %3745 = vset.pattern.permute.xlu1 %v5578_v44  ;;  %v3593_v19 = vpack.c.bf16 %v649_v15, %v648_v14 }
 0x219   : > { %v3277_v1 = vmul.f32 -1.442695, %v4570_v55  ;;  %1467 = vperm.xlu1 %3745, %v4457_v9   ;;  %v874_v44 = vadd.f32 %v865_v4, %v834_v48  ;;  %v835_v45 = vadd.f32 %v4514_v17, %v811_v20  ;;  %v632_v4 = vld [vmem:[%s5476_s2 + $0x40] sm:$0xff]  ;;  %v651_v20 = vld [vmem:[%s5476_s2 + $0xd8] sm:$0xff] }
 0x21a   : > { %3594 = vmatprep.subr.bf16.mxu1 %v3593_v19 }
 0x21b   : > { %3751 = vpow2.f32 %v3277_v1 }
 0x21c   : > { %v867_v18 = vpop.permute.xlu0 %866  ;;  %v905_v46 = vpop.permute.xlu1 %904 }
 0x21d   : > { %3747 = vset.pattern.permute.xlu1 %v5579_v51  ;;  %v914_v63 = vadd.f32 %v905_v46, %v874_v44  ;;  %v875_v48 = vadd.f32 %v867_v18, %v835_v45  ;;  %v650_v46 = vld [vmem:[%s5476_s2 + $0xd0] sm:$0xff] }
 0x21e   : > { %v3597_v15 = vpack.c.bf16 %v651_v20, %v650_v46  ;;  %v634_v18 = vld [vmem:[%s5476_s2 + $0x50] sm:$0xff] }
 0x220   : > { %v907_v13 = vpop.permute.xlu0 %906  ;;  %v945_v47 = vpop.permute.xlu1 %944 }
 0x221   : > { %v3750_v43 = vpop.eup %3749  ;;  %v915_v44 = vadd.f32 %v907_v13, %v875_v48  ;;  %v652_v13 = vld [vmem:[%s5476_s2 + $0xe0] sm:$0xff] }
 0x222   : > { %v1088_v50 = vadd.f32 1.0, %v3750_v43  ;;  %v3595_v43 = vpack.c.bf16 %v633_v49, %v632_v4  ;;  %v636_v49 = vld [vmem:[%s5476_s2 + $0x60] sm:$0xff] }
 0x224   : > { %3753 = vrcp.f32 %v1088_v50  ;;  %v947_v53 = vpop.permute.xlu0 %946  ;;  %v985_v11 = vpop.permute.xlu1 %984  ;;  %v954_v50 = vadd.f32 %v945_v47, %v914_v63  ;;  %3596 = vmatpush3.bf16.msra.mxu1 %v3595_v43  ;;  %v635_v47 = vld [vmem:[%s5476_s2 + $0x58] sm:$0xff] }
 0x225   : > { %v3752_v1 = vpop.eup %3751  ;;  %v955_v45 = vadd.f32 %v947_v53, %v915_v44  ;;  %3598 = vmatprep.subr.bf16.mxu1 %v3597_v15  ;;  %v654_v15 = vld [vmem:[%s5476_s2 + $0xf0] sm:$0xff] }
 0x226   : > { %v1089_v7 = vadd.f32 1.0, %v3752_v1  ;;  %v994_v14 = vadd.f32 %v985_v11, %v954_v50  ;;  %v3599_v1 = vpack.c.bf16 %v635_v47, %v634_v18  ;;  %v653_v11 = vld [vmem:[%s5476_s2 + $0xe8] sm:$0xff]  ;;  %v638_v18 = vld [vmem:[%s5476_s2 + $0x70] sm:$0xff] }
 0x227   : > { %v3601_v53 = vpack.c.bf16 %v653_v11, %v652_v13 }
 0x228   : > { %3755 = vrcp.f32 %v1089_v7  ;;  %v987_v60 = vpop.permute.xlu0 %986  ;;  %v1025_v16 = vpop.permute.xlu1 %1024  ;;  %3600 = vmatpush3.bf16.msra.mxu1 %v3599_v1  ;;  %v639_v1 = vld [vmem:[%s5476_s2 + $0x78] sm:$0xff] }
 0x229   : > { %v1034_v63 = vadd.f32 %v1025_v16, %v994_v14  ;;  %v995_v7 = vadd.f32 %v987_v60, %v955_v45  ;;  %v637_v16 = vld [vmem:[%s5476_s2 + $0x68] sm:$0xff]  ;;  %3602 = vmatprep.subr.bf16.mxu1 %v3601_v53  ;;  %v655_v60 = vld [vmem:[%s5476_s2 + $0xf8] sm:$0xff] }
 0x22a   : > { %v3603_v50 = vpack.c.bf16 %v637_v16, %v636_v49 }
 0x22c   : > { %v1027_v19 = vpop.permute.xlu0 %1026  ;;  %v1065_v4 = vpop.permute.xlu1 %1064  ;;  %3604 = vmatpush3.bf16.msra.mxu1 %v3603_v50 }
 0x22d   : > { %v1074_v43 = vadd.f32 %v1065_v4, %v1034_v63  ;;  %v1035_v20 = vadd.f32 %v1027_v19, %v995_v7  ;;  %v3607_v63 = vpack.c.bf16 %v639_v1, %v638_v18 }
 0x22e   : > { %v3754_v48 = vpop.eup %3753 }
 0x22f   : > { %v1100_v46 = vmul.f32 %v3754_v48, %v4553_v6  ;;  %v3278_v44 = vmul.f32 -1.442695, %v1074_v43  ;;  %v3605_v6 = vpack.c.bf16 %v655_v60, %v654_v15 }
 0x230   : > { %v1067_v14 = vpop.permute.xlu0 %1066 }
 0x231   : > { %3757 = vpow2.f32 %v3278_v44  ;;  %v1075_v47 = vadd.f32 %v1067_v14, %v1035_v20  ;;  %1108 = vrot.lane.b32.xlu1 %v1100_v46, %s3949_s17  ;;  %3606 = vmatprep.subr.bf16.mxu1 %v3605_v6 }
 0x232   : > { %v3756_v45 = vpop.eup %3755  ;;  %3608 = vmatpush3.bf16.msra.mxu1 %v3607_v63 }
 0x233   : > { %v1101_v19 = vmul.f32 %v3756_v45, %v4570_v55  ;;  %v3279_v4 = vmul.f32 -1.442695, %v1075_v47  ;;  %v753_v55 = vld [vmem:[%s5482_s8] sm:$0xff] }
 0x235   : > { %3759 = vpow2.f32 %v3279_v4  ;;  %1110 = vrot.lane.b32.xlu0 %v1101_v19, %s3949_s17  ;;  %1132 = vperm.xlu1 %3747, %v4440_v2  }
 0x236   : > { %721 = vmatmul.mubr.f32.vlgmr.msra.gmra.mrb[0].mxu1 %v4224_v56 }
 0x237   : > { %725 = vmatprep.mubr.f32.mxu1 %v4228_v57 }
 0x239   : > { %1471 = vperm.xlu0 %3746, %v4464_v10   ;;  %1137 = vperm.xlu1 %3747, %v4449_v5  }
 0x23a   : > { %726 = vmatmul.mubr.f32.gmra.mrb[2].mxu1 %v4235_v58  ;;  %v756_v58 = vld [vmem:[%s5482_s8 + $0x18] sm:$0xff] }
 0x23b   : > { %v3758_v13 = vpop.eup %3757  ;;  %730 = vmatprep.mubr.f32.mxu1 %v4238_v59 }
 0x23c   : > { %v1090_v11 = vadd.f32 1.0, %v3758_v13 }
 0x23d   : > { %3748 = vset.pattern.permute.xlu0 %v5579_v51  ;;  %v4657_v2 = vpop.permute.xlu1 %1179 }
 0x23e   : > { %5580 = vst [vmem:[#allocation20_spill] sm:$0xff] %v4657_v2  ;;  %3761 = vrcp.f32 %v1090_v11  ;;  %1156 = vperm.xlu0 %3748, %v753_v55   ;;  %731 = vmatmul.mubr.f32.gmra.mrb[4].mxu1 %v4246_v61 }
 0x23f   : > { %v3760_v56 = vpop.eup %3759  ;;  %735 = vmatprep.mubr.f32.mxu1 %v4249_v62 }
 0x240   : > { %v1091_v57 = vadd.f32 1.0, %v3760_v56 }
 0x241   : > { %v4693_v20 = vpop.permute.xlu0 %1183 }
 0x242   : > { %3763 = vrcp.f32 %v1091_v57  ;;  %1147 = vperm.xlu0 %3748, %v4464_v10   ;;  %v4662_v5 = vpop.permute.xlu1 %1219  ;;  %736 = vmatmul.mubr.f32.gmra.mrb[6].mxu1 %v4257_v0  ;;  %v754_v10 = vld [vmem:[%s5482_s8 + $0x8] sm:$0xff]  ;;  %5590 = vst [vmem:[#allocation30_spill] sm:$0xff] %v4693_v20 }
 0x243   : > { %5581 = vst [vmem:[#allocation21_spill] sm:$0xff] %v4662_v5 }
 0x245   : > { %v4697_v14 = vpop.permute.xlu0 %1187 }
 0x246   : > { %1171 = vperm.xlu0 %3748, %v756_v58   ;;  %v4668_v59 = vpop.permute.xlu1 %1223  ;;  %5592 = vst [vmem:[#allocation32_spill] sm:$0xff] %v4697_v14 }
 0x247   : > { %5582 = vst [vmem:[#allocation22_spill] sm:$0xff] %v4668_v59 }
 0x248   : > { %v3762_v51 = vpop.eup %3761 }
 0x249   : > { %v1102_v49 = vmul.f32 %v3762_v51, %v1074_v43  ;;  %v755_v43 = vld [vmem:[%s5482_s8 + $0x10] sm:$0xff] }
 0x24a   : > { %v4701_v15 = vpop.permute.xlu0 %1231 }
 0x24b   : > { %1112 = vrot.lane.b32.xlu1 %v1102_v49, %s3949_s17  ;;  %v4671_v61 = vpop.permute.xlu1 %1191  ;;  %5594 = vst [vmem:[#allocation34_spill] sm:$0xff] %v4701_v15 }
 0x24c   : > { %5583 = vst [vmem:[#allocation23_spill] sm:$0xff] %v4671_v61  ;;  %v3764_v62 = vpop.eup %3763 }
 0x24d   : > { %v1103_v7 = vmul.f32 %v3764_v62, %v1075_v47 }
 0x24f   : > { %1114 = vrot.lane.b32.xlu1 %v1103_v7, %s3949_s17  ;;  %v4705_v18 = vpop.permute.xlu0 %1259 }
 0x250   : > { %v4677_v53 = vpop.permute.xlu1 %1263  ;;  %5596 = vst [vmem:[#allocation36_spill] sm:$0xff] %v4705_v18 }
 0x251   : > { %5584 = vst [vmem:[#allocation24_spill] sm:$0xff] %v4677_v53 }
 0x253   : > { %1161 = vperm.xlu1 %3747, %v754_v10   ;;  %v4709_v6 = vpop.permute.xlu0 %1267 }
 0x254   : > { %5598 = vst [vmem:[#allocation38_spill] sm:$0xff] %v4709_v6 }
 0x255   : > { %v4679_v0 = vpop.permute.xlu1 %1227 }
 0x256   : > { %5585 = vst [vmem:[#allocation25_spill] sm:$0xff] %v4679_v0 }
 0x257   : > { %1142 = vperm.xlu1 %3747, %v4457_v9  }
 0x258   : > { %v4713_v45 = vpop.permute.xlu0 %1343 }
 0x259   : > { %5600 = vst [vmem:[#allocation40_spill] sm:$0xff] %v4713_v45 }
 0x25a   : > { %v4685_v16 = vpop.permute.xlu1 %1299 }
 0x25b   : > { %5586 = vst [vmem:[#allocation26_spill] sm:$0xff] %v4685_v16  ;;  %1166 = vperm.xlu1 %3747, %v755_v43  }
 0x25d   : > { %v4717_v19 = vpop.permute.xlu0 %1307 }
 0x25e   : > { %v4687_v48 = vpop.permute.xlu1 %1303  ;;  %5602 = vst [vmem:[#allocation42_spill] sm:$0xff] %v4717_v19 }
 0x25f   : > { %5587 = vst [vmem:[#allocation27_spill] sm:$0xff] %v4687_v48 }
 0x262   : > { %v4721_v13 = vpop.permute.xlu0 %1383 }
 0x263   : > { %v4689_v50 = vpop.permute.xlu1 %1271  ;;  %5604 = vst [vmem:[#allocation44_spill] sm:$0xff] %v4721_v13 }
 0x264   : > { %5588 = vst [vmem:[#allocation28_spill] sm:$0xff] %v4689_v50 }
 0x266   : > { %v4725_v11 = vpop.permute.xlu0 %1391 }
 0x267   : > { %5606 = vst [vmem:[#allocation46_spill] sm:$0xff] %v4725_v11 }
 0x268   : > { %v4691_v46 = vpop.permute.xlu1 %1339 }
 0x269   : > { %5589 = vst [vmem:[#allocation29_spill] sm:$0xff] %v4691_v46 }
 0x26b   : > { %v4729_v57 = vpop.permute.xlu0 %1419 }
 0x26c   : > { %5608 = vst [vmem:[#allocation48_spill] sm:$0xff] %v4729_v57 }
 0x26d   : > { %v4695_v44 = vpop.permute.xlu1 %1311 }
 0x26e   : > { %5591 = vst [vmem:[#allocation31_spill] sm:$0xff] %v4695_v44 }
 0x26f   : > { %v4733_v51 = vpop.permute.xlu0 %1427 }
 0x270   : > { %5610 = vst [vmem:[#allocation50_spill] sm:$0xff] %v4733_v51 }
 0x272   : > { %v4699_v9 = vpop.permute.xlu1 %1379 }
 0x273   : > { %5593 = vst [vmem:[#allocation33_spill] sm:$0xff] %v4699_v9 }
 0x277   : > { %v4703_v60 = vpop.permute.xlu1 %1347 }
 0x278   : > { %5595 = vst [vmem:[#allocation35_spill] sm:$0xff] %v4703_v60 }
 0x27b   : > { %v4707_v47 = vpop.permute.xlu1 %1351 }
 0x27c   : > { %5597 = vst [vmem:[#allocation37_spill] sm:$0xff] %v4707_v47 }
 0x280   : > { %v4711_v1 = vpop.permute.xlu1 %1423 }
 0x281   : > { %5599 = vst [vmem:[#allocation39_spill] sm:$0xff] %v4711_v1 }
 0x285   : > { %v4715_v63 = vpop.permute.xlu1 %1387 }
 0x286   : > { %5601 = vst [vmem:[#allocation41_spill] sm:$0xff] %v4715_v63 }
 0x28a   : > { %v4719_v4 = vpop.permute.xlu1 %1459 }
 0x28b   : > { %5603 = vst [vmem:[#allocation43_spill] sm:$0xff] %v4719_v4 }
 0x28e   : > { %v4723_v55 = vpop.permute.xlu1 %1463 }
 0x28f   : > { %5605 = vst [vmem:[#allocation45_spill] sm:$0xff] %v4723_v55 }
 0x293   : > { %v4727_v56 = vpop.permute.xlu1 %1431 }
 0x294   : > { %5607 = vst [vmem:[#allocation47_spill] sm:$0xff] %v4727_v56 }
 0x298   : > { %v4731_v58 = vpop.permute.xlu1 %1467 }
 0x299   : > { %5609 = vst [vmem:[#allocation49_spill] sm:$0xff] %v4731_v58 }
 0x2a3   : > { %v1109_v49 = vpop.permute.xlu1 %1108 }
 0x2a4   : > { %v1121_v62 = vsel %vm1120_vm2, 0.0, %v1109_v49 }
 0x2a5   : > { %v4737_v7 = vsel %vm1125_vm3, %v1121_v62, 0.0 }
 0x2a6   : > { %v1194_v10 = vmul.f32 %v4657_v2, %v4737_v7  ;;  %v1234_v49 = vmul.f32 %v4662_v5, %v4737_v7 }
 0x2a7   : > { %v1111_v43 = vpop.permute.xlu0 %1110 }
 0x2a8   : > { %v1122_v17 = vsel %vm1120_vm2, 0.0, %v1111_v43  ;;  %1202 = vrot.lane.b32.xlu1 %v1194_v10, %s3941_s18  ;;  %v1274_v43 = vmul.f32 %v4705_v18, %v4737_v7  ;;  %v1314_v10 = vmul.f32 %v4685_v16, %v4737_v7 }
 0x2a9   : > { %v4744_v12 = vsel %vm1125_vm3, %v1122_v17, 0.0 }
 0x2aa   : > { %v1195_v54 = vmul.f32 %v4693_v20, %v4744_v12  ;;  %v1235_v62 = vmul.f32 %v4668_v59, %v4744_v12  ;;  %v1275_v17 = vmul.f32 %v4677_v53, %v4744_v12  ;;  %v1355_v16 = vmul.f32 %v4713_v45, %v4744_v12 }
 0x2ac   : > { %1204 = vrot.lane.b32.xlu0 %v1195_v54, %s3941_s18  ;;  %1242 = vrot.lane.b32.xlu1 %v1234_v49, %s3942_s21  ;;  %v1315_v49 = vmul.f32 %v4687_v48, %v4744_v12 }
 0x2b0   : > { %1244 = vrot.lane.b32.xlu0 %v1235_v62, %s3942_s21  ;;  %1282 = vrot.lane.b32.xlu1 %v1274_v43, %s5611_s30  ;;  %v1354_v62 = vmul.f32 %v4691_v46, %v4737_v7  ;;  %v1395_v46 = vmul.f32 %v4721_v13, %v4744_v12 }
 0x2b4   : > { %1284 = vrot.lane.b32.xlu0 %v1275_v17, %s5611_s30  ;;  %1322 = vrot.lane.b32.xlu1 %v1314_v10, %s5612_s27  ;;  %v4764_v54 = vpop.permute.xlu1 %1132  ;;  %v1394_v17 = vmul.f32 %v4699_v9, %v4737_v7 }
 0x2b5   : > { %5613 = vst [vmem:[#allocation51_spill] sm:$0xff] %v4764_v54 }
 0x2b8   : > { %1324 = vrot.lane.b32.xlu0 %v1315_v49, %s5612_s27  ;;  %1362 = vrot.lane.b32.xlu1 %v1354_v62, %s5614_s23  ;;  %v4772_v43 = vpop.permute.xlu1 %1137  ;;  %v1434_v49 = vmul.f32 %v4729_v57, %v4737_v7 }
 0x2b9   : > { %5615 = vst [vmem:[#allocation52_spill] sm:$0xff] %v4772_v43 }
 0x2bc   : > { %1364 = vrot.lane.b32.xlu0 %v1355_v16, %s5614_s23  ;;  %1402 = vrot.lane.b32.xlu1 %v1394_v17, %s5616_s25  ;;  %v1435_v16 = vmul.f32 %v4711_v1, %v4744_v12  ;;  %v1474_v17 = vmul.f32 %v4719_v4, %v4737_v7 }
 0x2bd   : > { %v1113_v10 = vpop.permute.xlu1 %1112 }
 0x2be   : > { %v1123_v62 = vsel %vm1120_vm2, 0.0, %v1113_v10 }
 0x2bf   : > { %v4792_v9 = vsel %vm1125_vm3, %v1123_v62, 0.0 }
 0x2c0   : > { %1404 = vrot.lane.b32.xlu0 %v1395_v46, %s5616_s25  ;;  %1442 = vrot.lane.b32.xlu1 %v1434_v49, %s5557_s26  ;;  %v1475_v46 = vmul.f32 %v4723_v55, %v4744_v12  ;;  %v1196_v10 = vmul.f32 %v4697_v14, %v4792_v9 }
 0x2c1   : > { %v1115_v45 = vpop.permute.xlu1 %1114 }
 0x2c2   : > { %v1124_v13 = vsel %vm1120_vm2, 0.0, %v1115_v45  ;;  %v1236_v45 = vmul.f32 %v4679_v0, %v4792_v9 }
 0x2c3   : > { %v4802_v49 = vsel %vm1125_vm3, %v1124_v13, 0.0 }
 0x2c4   : > { %1444 = vrot.lane.b32.xlu0 %v1435_v16, %s5557_s26  ;;  %1482 = vrot.lane.b32.xlu1 %v1474_v17, %s5555_s24  ;;  %v1197_v62 = vmul.f32 %v4671_v61, %v4802_v49  ;;  %v1276_v16 = vmul.f32 %v4709_v6, %v4792_v9  ;;  %v1237_v13 = vmul.f32 %v4701_v15, %v4802_v49 }
 0x2c5   : > { %v1316_v17 = vmul.f32 %v4717_v19, %v4792_v9 }
 0x2c8   : > { %1484 = vrot.lane.b32.xlu0 %v1475_v46, %s5555_s24  ;;  %1206 = vrot.lane.b32.xlu1 %v1196_v10, %s3941_s18  ;;  %v1277_v46 = vmul.f32 %v4689_v50, %v4802_v49  ;;  %v1356_v10 = vmul.f32 %v4703_v60, %v4792_v9 }
 0x2cc   : > { %1246 = vrot.lane.b32.xlu1 %v1236_v45, %s3942_s21  ;;  %1208 = vrot.lane.b32.xlu0 %v1197_v62, %s3941_s18  ;;  %v1317_v45 = vmul.f32 %v4695_v44, %v4802_v49  ;;  %v1396_v62 = vmul.f32 %v4715_v63, %v4792_v9 }
 0x2d0   : > { %1286 = vrot.lane.b32.xlu1 %v1276_v16, %s5611_s30  ;;  %1248 = vrot.lane.b32.xlu0 %v1237_v13, %s3942_s21  ;;  %v1357_v16 = vmul.f32 %v4707_v47, %v4802_v49  ;;  %v1436_v13 = vmul.f32 %v4733_v51, %v4792_v9 }
 0x2d4   : > { %1326 = vrot.lane.b32.xlu1 %v1316_v17, %s5612_s27  ;;  %1288 = vrot.lane.b32.xlu0 %v1277_v46, %s5611_s30  ;;  %v1397_v17 = vmul.f32 %v4725_v11, %v4802_v49  ;;  %v1476_v46 = vmul.f32 %v4731_v58, %v4792_v9 }
 0x2d8   : > { %1366 = vrot.lane.b32.xlu1 %v1356_v10, %s5614_s23  ;;  %1328 = vrot.lane.b32.xlu0 %v1317_v45, %s5612_s27  ;;  %v1437_v10 = vmul.f32 %v4727_v56, %v4802_v49  ;;  %v4848_v45 = vpop.permute.xlu0 %1471 }
 0x2d9   : > { %5617 = vst [vmem:[#allocation53_spill] sm:$0xff] %v4848_v45 }
 0x2dc   : > { %1406 = vrot.lane.b32.xlu1 %v1396_v62, %s5616_s25  ;;  %1368 = vrot.lane.b32.xlu0 %v1357_v16, %s5614_s23  ;;  %v1477_v62 = vmul.f32 %v4848_v45, %v4802_v49  ;;  %v4853_v16 = vpop.permute.xlu1 %1161  ;;  %v4857_v58 = vpop.permute.xlu0 %1156 }
 0x2dd   : > { %5618 = vst [vmem:[#allocation54_spill] sm:$0xff] %v4857_v58 }
 0x2e0   : > { %1446 = vrot.lane.b32.xlu1 %v1436_v13, %s5557_s26  ;;  %1408 = vrot.lane.b32.xlu0 %v1397_v17, %s5616_s25  ;;  %v4863_v63 = vpop.permute.xlu0 %1147 }
 0x2e4   : > { %1486 = vrot.lane.b32.xlu1 %v1476_v46, %s5555_s24  ;;  %1448 = vrot.lane.b32.xlu0 %v1437_v10, %s5557_s26  ;;  %v4859_v46 = vpop.permute.xlu1 %1142 }
 0x2e8   : > { %1488 = vrot.lane.b32.xlu0 %v1477_v62, %s5555_s24  ;;  %v4867_v62 = vpop.permute.xlu1 %1166 }
 0x309   : > { %v3417_v13 = vpop.f32.mrb[0].mxu1 }
 0x30a   : > { %v3418_v17 = vpop.f32.mrb[1].mxu1 }
 0x30b   : > { %v4855_v51 = vadd.f32 %v3418_v17, %v3417_v13  ;;  %v4871_v17 = vpop.permute.xlu0 %1171 }
 0x30d   : > { %v3420_v56 = vpop.f32.mrb[2].mxu1 }
 0x30e   : > { %v3421_v55 = vpop.f32.mrb[3].mxu1 }
 0x30f   : > { %v4861_v10 = vadd.f32 %v3421_v55, %v3420_v56  ;;  %v1150_v56 = vmul.f32 %v4764_v54, %v4737_v7 }
 0x311   : > { %v3423_v4 = vpop.f32.mrb[4].mxu1 }
 0x312   : > { %v3424_v11 = vpop.f32.mrb[5].mxu1 }
 0x313   : > { %v4865_v45 = vadd.f32 %v3424_v11, %v3423_v4  ;;  %v1174_v4 = vadd.f32 %v4857_v58, %v1150_v56  ;;  %v1151_v11 = vmul.f32 %v4772_v43, %v4744_v12 }
 0x315   : > { %v3426_v1 = vpop.f32.mrb[6].mxu1  ;;  %v1175_v15 = vadd.f32 %v4853_v16, %v1151_v11 }
 0x316   : > { %v3427_v57 = vpop.f32.mrb[7].mxu1 }
 0x317   : > { %v4869_v13 = vadd.f32 %v3427_v57, %v3426_v1 }
 0x31a   : > { %v1203_v47 = vpop.permute.xlu1 %1202 }
 0x31b   : > { %v1214_v48 = vadd.f32 %v1203_v47, %v1174_v4 }
 0x31e   : > { %v1205_v60 = vpop.permute.xlu0 %1204  ;;  %v1243_v44 = vpop.permute.xlu1 %1242 }
 0x31f   : > { %v1254_v0 = vadd.f32 %v1243_v44, %v1214_v48  ;;  %v1215_v53 = vadd.f32 %v1205_v60, %v1175_v15 }
 0x322   : > { %v1245_v19 = vpop.permute.xlu0 %1244  ;;  %v1283_v55 = vpop.permute.xlu1 %1282 }
 0x323   : > { %v1294_v18 = vadd.f32 %v1283_v55, %v1254_v0  ;;  %v1255_v59 = vadd.f32 %v1245_v19, %v1215_v53 }
 0x326   : > { %v1285_v50 = vpop.permute.xlu0 %1284  ;;  %v1323_v6 = vpop.permute.xlu1 %1322 }
 0x327   : > { %v1334_v5 = vadd.f32 %v1323_v6, %v1294_v18  ;;  %v1295_v7 = vadd.f32 %v1285_v50, %v1255_v59 }
 0x32a   : > { %v1325_v1 = vpop.permute.xlu0 %1324  ;;  %v1363_v57 = vpop.permute.xlu1 %1362 }
 0x32b   : > { %v1374_v54 = vadd.f32 %v1363_v57, %v1334_v5  ;;  %v1335_v56 = vadd.f32 %v1325_v1, %v1295_v7 }
 0x32e   : > { %v1365_v61 = vpop.permute.xlu0 %1364  ;;  %v1403_v14 = vpop.permute.xlu1 %1402 }
 0x32f   : > { %v1414_v58 = vadd.f32 %v1403_v14, %v1374_v54  ;;  %v1375_v8 = vadd.f32 %v1365_v61, %v1335_v56 }
 0x332   : > { %v1405_v20 = vpop.permute.xlu0 %1404  ;;  %v1443_v2 = vpop.permute.xlu1 %1442 }
 0x333   : > { %v1454_v12 = vadd.f32 %v1443_v2, %v1414_v58  ;;  %v1415_v43 = vadd.f32 %v1405_v20, %v1375_v8  ;;  %v1152_v2 = vmul.f32 %v4859_v46, %v4792_v9  ;;  %v1153_v20 = vmul.f32 %v4863_v63, %v4802_v49 }
 0x335   : > { %v1176_v6 = vadd.f32 %v4867_v62, %v1152_v2  ;;  %v1177_v1 = vadd.f32 %v4871_v17, %v1153_v20 }
 0x336   : > { %v1445_v47 = vpop.permute.xlu0 %1444  ;;  %v1483_v4 = vpop.permute.xlu1 %1482 }
 0x337   : > { %v1494_v3 = vadd.f32 %v1483_v4, %v1454_v12  ;;  %v1455_v11 = vadd.f32 %v1445_v47, %v1415_v43 }
 0x339   : > { %v3280_v48 = vmul.f32 -1.442695, %v1494_v3 }
 0x33a   : > { %v1485_v44 = vpop.permute.xlu0 %1484  ;;  %v1207_v0 = vpop.permute.xlu1 %1206 }
 0x33b   : > { %3765 = vpow2.f32 %v3280_v48  ;;  %v1495_v15 = vadd.f32 %v1485_v44, %v1455_v11  ;;  %v1216_v58 = vadd.f32 %v1207_v0, %v1176_v6 }
 0x33d   : > { %v3281_v53 = vmul.f32 -1.442695, %v1495_v15 }
 0x33e   : > { %v1209_v60 = vpop.permute.xlu0 %1208  ;;  %v1247_v59 = vpop.permute.xlu1 %1246 }
 0x33f   : > { %3767 = vpow2.f32 %v3281_v53  ;;  %v1256_v57 = vadd.f32 %v1247_v59, %v1216_v58  ;;  %v1217_v7 = vadd.f32 %v1209_v60, %v1177_v1 }
 0x342   : > { %v1249_v5 = vpop.permute.xlu0 %1248  ;;  %v1287_v50 = vpop.permute.xlu1 %1286 }
 0x343   : > { %v1296_v9 = vadd.f32 %v1287_v50, %v1256_v57  ;;  %v1257_v47 = vadd.f32 %v1249_v5, %v1217_v7 }
 0x345   : > { %v3766_v18 = vpop.eup %3765 }
 0x346   : > { %v1510_v61 = vadd.f32 1.0, %v3766_v18  ;;  %v1289_v14 = vpop.permute.xlu0 %1288  ;;  %v1327_v8 = vpop.permute.xlu1 %1326 }
 0x347   : > { %v1336_v4 = vadd.f32 %v1327_v8, %v1296_v9  ;;  %v1297_v11 = vadd.f32 %v1289_v14, %v1257_v47  ;;  %v3952_v9 = vmov 0.0|0.0  }
 0x348   : > { %3769 = vrcp.f32 %v1510_v61  ;;  %3609 = vmatprep.subr.bf16.mxu0 %v3952_v9 }
 0x349   : > { %v3768_v19 = vpop.eup %3767 }
 0x34a   : > { %v1511_v54 = vadd.f32 1.0, %v3768_v19  ;;  %v1329_v43 = vpop.permute.xlu0 %1328  ;;  %v1367_v55 = vpop.permute.xlu1 %1366 }
 0x34b   : > { %v1376_v49 = vadd.f32 %v1367_v55, %v1336_v4  ;;  %v1337_v0 = vadd.f32 %v1329_v43, %v1297_v11 }
 0x34c   : > { %3771 = vrcp.f32 %v1511_v54 }
 0x34e   : > { %v1369_v56 = vpop.permute.xlu0 %1368  ;;  %v1407_v12 = vpop.permute.xlu1 %1406 }
 0x34f   : > { %v1416_v18 = vadd.f32 %v1407_v12, %v1376_v49  ;;  %v1377_v61 = vadd.f32 %v1369_v56, %v1337_v0 }
 0x352   : > { %v3770_v48 = vpop.eup %3769  ;;  %v1409_v44 = vpop.permute.xlu0 %1408 }
 0x353   : > { %v1447_v53 = vpop.permute.xlu1 %1446  ;;  %v4885_v2 = vmul.f32 %v3770_v48, %v1494_v3  ;;  %v1417_v8 = vadd.f32 %v1409_v44, %v1377_v61  ;;  %v3954_v48 = vmov 0.0  }
 0x354   : > { %v1456_v20 = vadd.f32 %v1447_v53, %v1416_v18  ;;  %3477 = vmatprep.mubr.msk.f32.mxu0 %vm3953_vm5, %v3954_v48 }
 0x355   : > { %v1535_v60 = vsel %vm1534_vm4, %v4885_v2, 0.0 }
 0x356   : > { %v3772_v59 = vpop.eup %3771  ;;  %v1449_v50 = vpop.permute.xlu0 %1448  ;;  %1536 = vadd.xlane.f32.xlu1 %v1535_v60 }
 0x357   : > { %v1487_v5 = vpop.permute.xlu1 %1486  ;;  %v4889_v6 = vmul.f32 %v3772_v59, %v1495_v15  ;;  %v1457_v19 = vadd.f32 %v1449_v50, %v1417_v8 }
 0x358   : > { %v1496_v14 = vadd.f32 %v1487_v5, %v1456_v20 }
 0x359   : > { %v1538_v54 = vsel %vm1534_vm4, %v4889_v6, 0.0 }
 0x35a   : > { %v3282_v58 = vmul.f32 -1.442695, %v1496_v14  ;;  %v1489_v3 = vpop.permute.xlu0 %1488  ;;  %1539 = vadd.xlane.f32.xlu0 %v1538_v54 }
 0x35b   : > { %v1497_v43 = vadd.f32 %v1489_v3, %v1457_v19 }
 0x35c   : > { %3773 = vpow2.f32 %v3282_v58 }
 0x35d   : > { %v3283_v55 = vmul.f32 -1.442695, %v1497_v43 }
 0x35f   : > { %3775 = vpow2.f32 %v3283_v55 }
 0x366   : > { %v3774_v1 = vpop.eup %3773 }
 0x367   : > { %v1512_v57 = vadd.f32 1.0, %v3774_v1 }
 0x369   : > { %3777 = vrcp.f32 %v1512_v57  ;;  %v3776_v7 = vpop.eup %3775  ;;  %v5620_v57 = vld [vmem:[#allocation11_spill] sm:$0xff] }
 0x36a   : > { %v1513_v15 = vadd.f32 1.0, %v3776_v7 }
 0x36c   : > { %3779 = vrcp.f32 %v1513_v15 }
 0x373   : > { %v3778_v56 = vpop.eup %3777 }
 0x374   : > { %v4894_v12 = vmul.f32 %v3778_v56, %v1496_v14 }
 0x376   : > { %v1541_v47 = vsel %vm1534_vm4, %v4894_v12, 0.0  ;;  %v3780_v4 = vpop.eup %3779 }
 0x377   : > { %1542 = vadd.xlane.f32.xlu0 %v1541_v47  ;;  %v4898_v11 = vmul.f32 %v3780_v4, %v1497_v43 }
 0x379   : > { %v1544_v49 = vsel %vm1534_vm4, %v4898_v11, 0.0 }
 0x37a   : > { %1545 = vadd.xlane.f32.xlu1 %v1544_v49 }
 0x38b   : > { %2029 = vrot.lane.b32.xlu1 %v4861_v10, %s5619_s29 }
 0x38d   : > { %2027 = vrot.lane.b32.xlu0 %v4855_v51, %s5619_s29 }
 0x38f   : > { %2031 = vrot.lane.b32.xlu1 %v4865_v45, %s5619_s29 }
 0x391   : > { %2033 = vrot.lane.b32.xlu0 %v4869_v13, %s5619_s29  ;;  %v4922_v13 = vld [vmem:[%s5487_s13] sm:$0xf]  ;;  %s5666_s29 = sld [smem:[#allocation55_spill]] }
 0x3e3   : > { %v1537_v44 = vpop.xlane.xlu1 %1536 }
 0x3e7   : > { %v1540_v53 = vpop.xlane.xlu0 %1539 }
 0x3e8   : > { %v3610_v0 = vpack.c.bf16 %v1540_v53, %v1537_v44 }
 0x3ea   : > { %3611 = vmatpush3.bf16.msra.mxu0 %v3610_v0 }
 0x3eb   : > { %3612 = vmatprep.subr.bf16.mxu0 %v3952_v9 }
 0x404   : > { %v1543_v10 = vpop.xlane.xlu0 %1542 }
 0x407   : > { %v1546_v51 = vpop.xlane.xlu1 %1545 }
 0x408   : > { %v2028_v18 = vpop.permute.xlu0 %2027  ;;  %v3613_v20 = vpack.c.bf16 %v1546_v51, %v1543_v10  ;;  %v5621_v10 = vld [vmem:[#allocation13_spill] sm:$0xff] }
 0x409   : > { %v2039_v61 = vsel %vm778_vm0, 0.0, %v2028_v18 }
 0x40a   : > { %v4915_v60 = vsel %vm783_vm1, %v2039_v61, 0.0  ;;  %3614 = vmatpush3.bf16.msra.mxu0 %v3613_v20  ;;  %v5622_v20 = vld [vmem:[#allocation14_spill] sm:$0xff] }
 0x40b   : > { %v2055_v45 = vmul.f32 %v4915_v60, %v4312_v26  ;;  %v2030_v59 = vpop.permute.xlu1 %2029  ;;  %3615 = vmatprep.subr.bf16.mxu0 %v3952_v9  ;;  %v2079_v26 = vmul.f32 %v4915_v60, %v4302_v21  ;;  %v2103_v1 = vmul.f32 %v4915_v60, %v4328_v34  ;;  %v2127_v34 = vmul.f32 %v4915_v60, %v4314_v27 }
 0x40c   : > { %v2040_v50 = vsel %vm778_vm0, 0.0, %v2030_v59  ;;  %v2034_v5 = vpop.permute.xlu0 %2033  ;;  %v2151_v27 = vmul.f32 %v4915_v60, %v4326_v33  ;;  %v2175_v33 = vmul.f32 %v4915_v60, %v4334_v37  ;;  %v2047_v18 = vmul.f32 %v4915_v60, %v5621_v10  ;;  %v5623_v59 = vld [vmem:[#allocation12_spill] sm:$0xff] }
 0x40d   : > { %2063 = vrot.lane.b32.xlu1 %v2055_v45, %s3941_s18  ;;  %v4928_v8 = vsel %vm783_vm1, %v2040_v50, 0.0  ;;  %3478 = vmatmul.mubr.msk.f32.vlgmr.msra.gmra.mrb[8].mxu0 %vm1547_vm6, %v4922_v13  ;;  %v2042_v58 = vsel %vm778_vm0, 0.0, %v2034_v5 }
 0x40e   : > { %v2056_v14 = vmul.f32 %v4928_v8, %v4316_v28  ;;  %3496 = vmatprep.mubr.msk.f32.mxu0 %vm3953_vm5, %v3954_v48  ;;  %v2080_v21 = vmul.f32 %v4928_v8, %v4304_v22  ;;  %v4950_v43 = vsel %vm783_vm1, %v2042_v58, 0.0  ;;  %v2104_v22 = vmul.f32 %v4928_v8, %v4308_v24 }
 0x40f   : > { %v2032_v19 = vpop.permute.xlu1 %2031  ;;  %v2058_v55 = vmul.f32 %v4950_v43, %v4306_v23  ;;  %v2082_v23 = vmul.f32 %v4950_v43, %v4324_v32  ;;  %v2128_v24 = vmul.f32 %v4928_v8, %v4318_v29  ;;  %v2106_v32 = vmul.f32 %v4950_v43, %v4320_v30 }
 0x410   : > { %v2041_v54 = vsel %vm778_vm0, 0.0, %v2032_v19  ;;  %2065 = vrot.lane.b32.xlu0 %v2056_v14, %s3941_s18  ;;  %v2152_v29 = vmul.f32 %v4928_v8, %v4336_v38  ;;  %v2130_v30 = vmul.f32 %v4950_v43, %v4330_v35  ;;  %v2176_v38 = vmul.f32 %v4928_v8, %v4344_v42  ;;  %v5624_v19 = vld [vmem:[#allocation15_spill] sm:$0xff] }
 0x411   : > { %2087 = vrot.lane.b32.xlu1 %v2079_v26, %s3942_s21  ;;  %v4943_v3 = vsel %vm783_vm1, %v2041_v54, 0.0  ;;  %v2154_v35 = vmul.f32 %v4950_v43, %v4342_v41  ;;  %v2178_v42 = vmul.f32 %v4950_v43, %v5620_v57  ;;  %v2051_v45 = vadd.f32 %v2047_v18, %v5622_v20 }
 0x412   : > { %v2057_v28 = vmul.f32 %v4943_v3, %v4322_v31  ;;  %v2081_v31 = vmul.f32 %v4943_v3, %v4310_v25  ;;  %v2105_v25 = vmul.f32 %v4943_v3, %v4332_v36  ;;  %v2129_v36 = vmul.f32 %v4943_v3, %v4340_v40 }
 0x413   : > { %v2153_v40 = vmul.f32 %v4943_v3, %v4338_v39  ;;  %v2177_v37 = vmul.f32 %v4943_v3, %v4429_v52  ;;  %v5014_v39 = vld [vmem:[%s5488_s14] sm:$0xff]  ;;  %v2048_v50 = vmul.f32 %v4928_v8, %v5623_v59 }
 0x414   : > { %2089 = vrot.lane.b32.xlu0 %v2080_v21, %s3942_s21  ;;  %3482 = vmatprep.mubr.msk.f32.mxu1 %vm1120_vm2, %v5014_v39  ;;  %v5625_v21 = vld [vmem:[#allocation16_spill] sm:$0xff] }
 0x415   : > { %2067 = vrot.lane.b32.xlu1 %v2057_v28, %s3941_s18  ;;  %v2052_v58 = vadd.f32 %v2048_v50, %v5624_v19  ;;  %v2049_v28 = vmul.f32 %v4943_v3, %v5625_v21 }
 0x418   : > { %2069 = vrot.lane.b32.xlu0 %v2058_v55, %s3941_s18 }
 0x419   : > { %2111 = vrot.lane.b32.xlu1 %v2103_v1, %s5611_s30 }
 0x41c   : > { %2113 = vrot.lane.b32.xlu0 %v2104_v22, %s5611_s30 }
 0x41d   : > { %2091 = vrot.lane.b32.xlu1 %v2081_v31, %s3942_s21 }
 0x420   : > { %2093 = vrot.lane.b32.xlu0 %v2082_v23, %s3942_s21  ;;  %v5626_v23 = vld [vmem:[#allocation18_spill] sm:$0xff] }
 0x421   : > { %2135 = vrot.lane.b32.xlu1 %v2127_v34, %s5612_s27  ;;  %v2053_v34 = vadd.f32 %v2049_v28, %v5626_v23 }
 0x424   : > { %2137 = vrot.lane.b32.xlu0 %v2128_v24, %s5612_s27  ;;  %v5627_v24 = vld [vmem:[#allocation17_spill] sm:$0xff] }
 0x425   : > { %2115 = vrot.lane.b32.xlu1 %v2105_v25, %s5611_s30  ;;  %v2050_v25 = vmul.f32 %v4950_v43, %v5627_v24 }
 0x428   : > { %2117 = vrot.lane.b32.xlu0 %v2106_v32, %s5611_s30 }
 0x429   : > { %2159 = vrot.lane.b32.xlu1 %v2151_v27, %s5614_s23 }
 0x42c   : > { %2161 = vrot.lane.b32.xlu0 %v2152_v29, %s5614_s23 }
 0x42d   : > { %2139 = vrot.lane.b32.xlu1 %v2129_v36, %s5612_s27 }
 0x430   : > { %2141 = vrot.lane.b32.xlu0 %v2130_v30, %s5612_s27 }
 0x431   : > { %2183 = vrot.lane.b32.xlu1 %v2175_v33, %s5616_s25  ;;  %v5628_v33 = vld [vmem:[#allocation19_spill] sm:$0xff] }
 0x434   : > { %2185 = vrot.lane.b32.xlu0 %v2176_v38, %s5616_s25  ;;  %v2054_v38 = vadd.f32 %v2050_v25, %v5628_v33  ;;  %v5629_v33 = vld [vmem:[#allocation20_spill] sm:$0xff] }
 0x435   : > { %2163 = vrot.lane.b32.xlu1 %v2153_v40, %s5614_s23 }
 0x438   : > { %2165 = vrot.lane.b32.xlu0 %v2154_v35, %s5614_s23 }
 0x439   : > { %2187 = vrot.lane.b32.xlu1 %v2177_v37, %s5616_s25 }
 0x43c   : > { %2189 = vrot.lane.b32.xlu0 %v2178_v42, %s5616_s25 }
 0x47f   : > { %v2064_v41 = vpop.permute.xlu1 %2063 }
 0x480   : > { %v2075_v5 = vadd.f32 %v2064_v41, %v2051_v45 }
 0x482   : > { %v2066_v7 = vpop.permute.xlu0 %2065 }
 0x483   : > { %v2088_v52 = vpop.permute.xlu1 %2087  ;;  %v2076_v55 = vadd.f32 %v2066_v7, %v2052_v58 }
 0x484   : > { %v2099_v54 = vadd.f32 %v2088_v52, %v2075_v5 }
 0x486   : > { %v2090_v15 = vpop.permute.xlu0 %2089 }
 0x487   : > { %v2068_v56 = vpop.permute.xlu1 %2067  ;;  %v2100_v31 = vadd.f32 %v2090_v15, %v2076_v55 }
 0x488   : > { %v2077_v32 = vadd.f32 %v2068_v56, %v2053_v34 }
 0x48a   : > { %v2070_v47 = vpop.permute.xlu0 %2069 }
 0x48b   : > { %v2112_v4 = vpop.permute.xlu1 %2111  ;;  %v2078_v37 = vadd.f32 %v2070_v47, %v2054_v38 }
 0x48c   : > { %v2123_v1 = vadd.f32 %v2112_v4, %v2099_v54 }
 0x48e   : > { %v2114_v49 = vpop.permute.xlu0 %2113 }
 0x48f   : > { %v2092_v44 = vpop.permute.xlu1 %2091  ;;  %v2124_v27 = vadd.f32 %v2114_v49, %v2100_v31 }
 0x490   : > { %v2101_v40 = vadd.f32 %v2092_v44, %v2077_v32  ;;  %v5043_v32 = vld [vmem:[%s5488_s14 + $0x10] sm:$0xff] }
 0x492   : > { %v2094_v53 = vpop.permute.xlu0 %2093 }
 0x493   : > { %v2136_v0 = vpop.permute.xlu1 %2135  ;;  %v2102_v15 = vadd.f32 %v2094_v53, %v2078_v37  ;;  %v5630_v37 = vld [vmem:[#allocation30_spill] sm:$0xff] }
 0x494   : > { %v2147_v8 = vadd.f32 %v2136_v0, %v2123_v1 }
 0x496   : > { %v2138_v51 = vpop.permute.xlu0 %2137 }
 0x497   : > { %v2116_v61 = vpop.permute.xlu1 %2115  ;;  %v2148_v3 = vadd.f32 %v2138_v51, %v2124_v27  ;;  %v5053_v27 = vld [vmem:[%s5488_s14 + $0x18] sm:$0xff] }
 0x498   : > { %v2125_v57 = vadd.f32 %v2116_v61, %v2101_v40 }
 0x49a   : > { %v2118_v26 = vpop.permute.xlu0 %2117 }
 0x49b   : > { %v2160_v14 = vpop.permute.xlu1 %2159  ;;  %v2126_v56 = vadd.f32 %v2118_v26, %v2102_v15 }
 0x49c   : > { %v2171_v29 = vadd.f32 %v2160_v14, %v2147_v8  ;;  %v5037_v8 = vld [vmem:[%s5488_s14 + $0x8] sm:$0xff] }
 0x49e   : > { %v2162_v22 = vpop.permute.xlu0 %2161 }
 0x49f   : > { %v2140_v60 = vpop.permute.xlu1 %2139  ;;  %v2172_v42 = vadd.f32 %v2162_v22, %v2148_v3 }
 0x4a0   : > { %v2149_v4 = vadd.f32 %v2140_v60, %v2125_v57 }
 0x4a2   : > { %v2142_v36 = vpop.permute.xlu0 %2141 }
 0x4a3   : > { %v2184_v30 = vpop.permute.xlu1 %2183  ;;  %v2150_v20 = vadd.f32 %v2142_v36, %v2126_v56  ;;  %v5633_v56 = vld [vmem:[#allocation32_spill] sm:$0xff] }
 0x4a4   : > { %v2195_v35 = vadd.f32 %v2184_v30, %v2171_v29 }
 0x4a6   : > { %v3300_v41 = vmul.f32 -1.442695, %v2195_v35  ;;  %v2186_v7 = vpop.permute.xlu0 %2185 }
 0x4a7   : > { %v2164_v52 = vpop.permute.xlu1 %2163  ;;  %v2196_v43 = vadd.f32 %v2186_v7, %v2172_v42  ;;  %v5631_v42 = vld [vmem:[#allocation21_spill] sm:$0xff] }
 0x4a8   : > { %3781 = vpow2.f32 %v3300_v41  ;;  %v2173_v0 = vadd.f32 %v2164_v52, %v2149_v4  ;;  %v5632_v4 = vld [vmem:[#allocation22_spill] sm:$0xff] }
 0x4a9   : > { %v3301_v49 = vmul.f32 -1.442695, %v2196_v43 }
 0x4aa   : > { %v2166_v10 = vpop.permute.xlu0 %2165 }
 0x4ab   : > { %v2188_v18 = vpop.permute.xlu1 %2187  ;;  %3783 = vpow2.f32 %v3301_v49  ;;  %v2174_v51 = vadd.f32 %v2166_v10, %v2150_v20  ;;  %v5634_v20 = vld [vmem:[#allocation23_spill] sm:$0xff] }
 0x4ac   : > { %v2197_v44 = vadd.f32 %v2188_v18, %v2173_v0 }
 0x4ae   : > { %v3302_v45 = vmul.f32 -1.442695, %v2197_v44  ;;  %v2190_v47 = vpop.permute.xlu0 %2189 }
 0x4af   : > { %v2198_v61 = vadd.f32 %v2190_v47, %v2174_v51  ;;  %v5635_v51 = vld [vmem:[#allocation36_spill] sm:$0xff] }
 0x4b0   : > { %3785 = vpow2.f32 %v3302_v45  ;;  %v5636_v47 = vld [vmem:[#allocation24_spill] sm:$0xff] }
 0x4b1   : > { %v3303_v50 = vmul.f32 -1.442695, %v2198_v61 }
 0x4b2   : > { %v3782_v59 = vpop.eup %3781 }
 0x4b3   : > { %v2211_v5 = vadd.f32 1.0, %v3782_v59  ;;  %3787 = vpow2.f32 %v3303_v50  ;;  %v5637_v59 = vld [vmem:[#allocation25_spill] sm:$0xff] }
 0x4b5   : > { %3789 = vrcp.f32 %v2211_v5  ;;  %v3784_v53 = vpop.eup %3783  ;;  %v5638_v5 = vld [vmem:[#allocation34_spill] sm:$0xff] }
 0x4b6   : > { %v2212_v14 = vadd.f32 1.0, %v3784_v53 }
 0x4b8   : > { %3791 = vrcp.f32 %v2212_v14  ;;  %v5639_v14 = vld [vmem:[#allocation26_spill] sm:$0xff] }
 0x4ba   : > { %v3786_v26 = vpop.eup %3785 }
 0x4bb   : > { %v2213_v19 = vadd.f32 1.0, %v3786_v26 }
 0x4bd   : > { %3793 = vrcp.f32 %v2213_v19  ;;  %v3788_v58 = vpop.eup %3787  ;;  %v5640_v19 = vld [vmem:[#allocation27_spill] sm:$0xff] }
 0x4be   : > { %v2214_v21 = vadd.f32 1.0, %v3788_v58 }
 0x4bf   : > { %v3790_v54 = vpop.eup %3789 }
 0x4c0   : > { %v2223_v28 = vmul.f32 %v3790_v54, %v2195_v35  ;;  %3795 = vrcp.f32 %v2214_v21  ;;  %v5641_v54 = vld [vmem:[#allocation38_spill] sm:$0xff] }
 0x4c2   : > { %2231 = vrot.lane.b32.xlu1 %v2223_v28, %s3949_s17  ;;  %v3792_v55 = vpop.eup %3791  ;;  %v5642_v28 = vld [vmem:[#allocation28_spill] sm:$0xff] }
 0x4c3   : > { %v2224_v1 = vmul.f32 %v3792_v55, %v2196_v43 }
 0x4c5   : > { %2233 = vrot.lane.b32.xlu0 %v2224_v1, %s3949_s17  ;;  %v5643_v1 = vld [vmem:[#allocation29_spill] sm:$0xff] }
 0x4c7   : > { %v3794_v22 = vpop.eup %3793 }
 0x4c8   : > { %v2225_v60 = vmul.f32 %v3794_v22, %v2197_v44 }
 0x4ca   : > { %2235 = vrot.lane.b32.xlu1 %v2225_v60, %s3949_s17  ;;  %v3796_v31 = vpop.eup %3795  ;;  %v5644_v60 = vld [vmem:[#allocation40_spill] sm:$0xff] }
 0x4cb   : > { %v2226_v23 = vmul.f32 %v3796_v31, %v2198_v61 }
 0x4cd   : > { %2237 = vrot.lane.b32.xlu0 %v2226_v23, %s3949_s17  ;;  %v5645_v23 = vld [vmem:[#allocation42_spill] sm:$0xff]  ;;  %s3955_s17 = smov [#allocation2]  }
 0x4e0   : > { %v1617_v34 = vpop.f32.mrb[8].mxu0 }
 0x4e1   : > { %v1622_v24 = vmul.f32 0.0078125, %v1617_v34  ;;  %v3479_v25 = vpop.f32.mrb[9].mxu0 }
 0x4e3   : > { %3480 = vmatprep.subr.msk.mxu1 %vm1635_vm7, %v1622_v24 }
 0x4e4   : > { %3481 = vmatpush3.msk.msra.mxu1 %vm1635_vm7, %v1622_v24  ;;  %v5646_v24 = vld [vmem:[#allocation31_spill] sm:$0xff] }
 0x4e5   : > { %3483 = vmatmul.mubr.msk.f32.vlgmr.msra.gmra.mrb[8].mxu1 %vm1120_vm2, %v5037_v8 }
 0x4e6   : > { %3485 = vmatprep.mubr.msk.f32.mxu1 %vm1120_vm2, %v5043_v32 }
 0x4e9   : > { %3486 = vmatmul.mubr.msk.f32.gmra.mrb[10].mxu1 %vm1120_vm2, %v5053_v27 }
 0x4ea   : > { %3501 = vmatprep.mubr.msk.f32.mxu1 %vm1120_vm2, %v5014_v39 }
 0x534   : > { %v2232_v29 = vpop.permute.xlu1 %2231 }
 0x535   : > { %v2243_v36 = vsel %vm1120_vm2, 0.0, %v2232_v29  ;;  %v5647_v29 = vld [vmem:[#allocation33_spill] sm:$0xff] }
 0x536   : > { %v5061_v30 = vsel %vm1125_vm3, %v2243_v36, 0.0 }
 0x537   : > { %v2259_v38 = vmul.f32 %v5061_v30, %v5629_v33  ;;  %v2234_v40 = vpop.permute.xlu0 %2233  ;;  %v2283_v41 = vmul.f32 %v5061_v30, %v5631_v42  ;;  %v2307_v45 = vmul.f32 %v5061_v30, %v5635_v51  ;;  %v2331_v26 = vmul.f32 %v5061_v30, %v5639_v14  ;;  %v5648_v33 = vld [vmem:[#allocation44_spill] sm:$0xff]  ;;  %v5659_v51 = vld [vmem:[#allocation50_spill] sm:$0xff] }
 0x538   : > { %v2244_v3 = vsel %vm1120_vm2, 0.0, %v2234_v40  ;;  %v2355_v22 = vmul.f32 %v5061_v30, %v5643_v1  ;;  %v2379_v36 = vmul.f32 %v5061_v30, %v5647_v29  ;;  %v5649_v40 = vld [vmem:[#allocation35_spill] sm:$0xff]  ;;  %v5651_v42 = vld [vmem:[#allocation48_spill] sm:$0xff] }
 0x539   : > { %2267 = vrot.lane.b32.xlu1 %v2259_v38, %s3941_s18  ;;  %v5068_v35 = vsel %vm1125_vm3, %v2244_v3, 0.0 }
 0x53a   : > { %v2260_v57 = vmul.f32 %v5068_v35, %v5630_v37  ;;  %v2284_v43 = vmul.f32 %v5068_v35, %v5632_v4  ;;  %v2308_v61 = vmul.f32 %v5068_v35, %v5636_v47  ;;  %v2332_v58 = vmul.f32 %v5068_v35, %v5640_v19  ;;  %v5650_v37 = vld [vmem:[#allocation37_spill] sm:$0xff]  ;;  %v5660_v47 = vld [vmem:[#allocation47_spill] sm:$0xff] }
 0x53b   : > { %v2356_v31 = vmul.f32 %v5068_v35, %v5644_v60  ;;  %v2380_v38 = vmul.f32 %v5068_v35, %v5648_v33  ;;  %v5654_v4 = vld [vmem:[#allocation41_spill] sm:$0xff] }
 0x53c   : > { %v2236_v7 = vpop.permute.xlu1 %2235  ;;  %2269 = vrot.lane.b32.xlu0 %v2260_v57, %s3941_s18 }
 0x53d   : > { %v2245_v52 = vsel %vm1120_vm2, 0.0, %v2236_v7  ;;  %2291 = vrot.lane.b32.xlu1 %v2283_v41, %s3942_s21  ;;  %v2403_v41 = vmul.f32 %v5061_v30, %v5651_v42  ;;  %v5653_v7 = vld [vmem:[#allocation39_spill] sm:$0xff] }
 0x53e   : > { %v5078_v15 = vsel %vm1125_vm3, %v2245_v52, 0.0  ;;  %v2404_v52 = vmul.f32 %v5068_v35, %v5653_v7 }
 0x53f   : > { %v2261_v49 = vmul.f32 %v5078_v15, %v5633_v56  ;;  %v2238_v0 = vpop.permute.xlu0 %2237  ;;  %v2285_v50 = vmul.f32 %v5078_v15, %v5637_v59  ;;  %v2309_v21 = vmul.f32 %v5078_v15, %v5641_v54  ;;  %v2333_v34 = vmul.f32 %v5078_v15, %v5645_v23  ;;  %v5655_v56 = vld [vmem:[#allocation46_spill] sm:$0xff]  ;;  %v5661_v59 = vld [vmem:[#allocation49_spill] sm:$0xff] }
 0x540   : > { %v2246_v10 = vsel %vm1120_vm2, 0.0, %v2238_v0  ;;  %2293 = vrot.lane.b32.xlu0 %v2284_v43, %s3942_s21  ;;  %v2357_v3 = vmul.f32 %v5078_v15, %v5649_v40  ;;  %v2381_v43 = vmul.f32 %v5078_v15, %v5654_v4  ;;  %v5656_v0 = vld [vmem:[#allocation43_spill] sm:$0xff] }
 0x541   : > { %2271 = vrot.lane.b32.xlu1 %v2261_v49, %s3941_s18  ;;  %v5088_v18 = vsel %vm1125_vm3, %v2246_v10, 0.0  ;;  %v2427_v10 = vmul.f32 %v5061_v30, %v5656_v0  ;;  %v5663_v4 = vld [vmem:[#allocation51_spill] sm:$0xff] }
 0x542   : > { %v2262_v44 = vmul.f32 %v5088_v18, %v5634_v20  ;;  %v2286_v53 = vmul.f32 %v5088_v18, %v5638_v5  ;;  %v2310_v55 = vmul.f32 %v5088_v18, %v5642_v28  ;;  %v2334_v25 = vmul.f32 %v5088_v18, %v5646_v24  ;;  %v5658_v20 = vld [vmem:[#allocation45_spill] sm:$0xff] }
 0x543   : > { %v2358_v57 = vmul.f32 %v5088_v18, %v5650_v37  ;;  %v2382_v49 = vmul.f32 %v5088_v18, %v5655_v56  ;;  %v5662_v5 = vld [vmem:[#allocation53_spill] sm:$0xff]  ;;  %v5664_v56 = vld [vmem:[#allocation52_spill] sm:$0xff] }
 0x544   : > { %2273 = vrot.lane.b32.xlu0 %v2262_v44, %s3941_s18  ;;  %s5652_s18 = smov 121   ;;  %v2428_v44 = vmul.f32 %v5068_v35, %v5658_v20 }
 0x545   : > { %2315 = vrot.lane.b32.xlu1 %v2307_v45, %s5611_s30  ;;  %v2405_v45 = vmul.f32 %v5078_v15, %v5659_v51 }
 0x548   : > { %2317 = vrot.lane.b32.xlu0 %v2308_v61, %s5611_s30  ;;  %v2406_v61 = vmul.f32 %v5088_v18, %v5660_v47  ;;  %v2254_v47 = vmul.f32 %v5088_v18, %v4863_v63 }
 0x549   : > { %2295 = vrot.lane.b32.xlu1 %v2285_v50, %s3942_s21  ;;  %v2429_v50 = vmul.f32 %v5078_v15, %v5661_v59 }
 0x54c   : > { %2297 = vrot.lane.b32.xlu0 %v2286_v53, %s3942_s21  ;;  %s5657_s21 = smov 120   ;;  %v2430_v53 = vmul.f32 %v5088_v18, %v5662_v5 }
 0x54d   : > { %2339 = vrot.lane.b32.xlu1 %v2331_v26, %s5612_s27 }
 0x550   : > { %2341 = vrot.lane.b32.xlu0 %v2332_v58, %s5612_s27 }
 0x551   : > { %2319 = vrot.lane.b32.xlu1 %v2309_v21, %s5611_s30 }
 0x554   : > { %2321 = vrot.lane.b32.xlu0 %v2310_v55, %s5611_s30  ;;  %s488_s30 = sand.u32 1, %s3923_s19  }
 0x555   : > { %2363 = vrot.lane.b32.xlu1 %v2355_v22, %s5614_s23 }
 0x558   : > { %2365 = vrot.lane.b32.xlu0 %v2356_v31, %s5614_s23 }
 0x559   : > { %2343 = vrot.lane.b32.xlu1 %v2333_v34, %s5612_s27 }
 0x55c   : > { %2345 = vrot.lane.b32.xlu0 %v2334_v25, %s5612_s27  ;;  %s3272_s27 = sshll.u32 %s488_s30, 6 }
 0x55d   : > { %2387 = vrot.lane.b32.xlu1 %v2379_v36, %s5616_s25 }
 0x560   : > { %2389 = vrot.lane.b32.xlu0 %v2380_v38, %s5616_s25 }
 0x561   : > { %2367 = vrot.lane.b32.xlu1 %v2357_v3, %s5614_s23 }
 0x564   : > { %2369 = vrot.lane.b32.xlu0 %v2358_v57, %s5614_s23  ;;  %s5406_s23 = scalar_lea.vmem [#allocation2], %s3272_s27 }
 0x565   : > { %2411 = vrot.lane.b32.xlu1 %v2403_v41, %s5652_s18  ;;  %s3206_s26 = sshll.u32 %s5406_s23, 4  ;;  %s5427_s26 = int_to_ptr.vmem [resolvable:$true] %s3206_s26 }
 0x568   : > { %2413 = vrot.lane.b32.xlu0 %v2404_v52, %s5652_s18 }
 0x569   : > { %2391 = vrot.lane.b32.xlu1 %v2381_v43, %s5616_s25  ;;  %v2251_v43 = vmul.f32 %v5061_v30, %v5663_v4 }
 0x56c   : > { %2393 = vrot.lane.b32.xlu0 %v2382_v49, %s5616_s25  ;;  %v2252_v49 = vmul.f32 %v5068_v35, %v5664_v56  ;;  %v2258_v35 = vadd.f32 %v2254_v47, %v4871_v17  ;;  %s3340_s25 = sshll.u32 %s4059_s22, 10  ;;  %s5433_s22 = scalar_lea.sflag [#allocation3], %s488_s30 }
 0x56d   : > { %2435 = vrot.lane.b32.xlu1 %v2427_v10, %s5657_s21  ;;  %v5665_v10 = vld [vmem:[#allocation54_spill] sm:$0xff]  ;;  %s5425_s16 = scalar_lea.hbm %s5666_s29, %s3340_s25 }
 0x56e   : > { %v2255_v20 = vadd.f32 %v2251_v43, %v5665_v10 }
 0x570   : > { %2437 = vrot.lane.b32.xlu0 %v2428_v44, %s5657_s21  ;;  %v2253_v44 = vmul.f32 %v5078_v15, %v4859_v46 }
 0x571   : > { %2415 = vrot.lane.b32.xlu1 %v2405_v45, %s5652_s18  ;;  %v2256_v45 = vadd.f32 %v2252_v49, %v4853_v16 }
 0x572   : > { %v2257_v30 = vadd.f32 %v2253_v44, %v4867_v62 }
 0x574   : > { %2417 = vrot.lane.b32.xlu0 %v2406_v61, %s5652_s18  ;;  %s3873_s18 = sshll.u32 %s3955_s17, 4  ;;  %s3874_s18 = int_to_ptr.vmem [resolvable:$false] %s3873_s18 }
 0x575   : > { %2439 = vrot.lane.b32.xlu1 %v2429_v50, %s5657_s21  ;;  %p3876_p0 = scmp.lt.s32.totalorder %s5427_s26, %s3874_s18 }
 0x578   : > { %2441 = vrot.lane.b32.xlu0 %v2430_v53, %s5657_s21  ;;  %s3875_s21 = scalar_lea.vmem %s3874_s18, 2048 }
 0x5ab   : > { %v2268_v54 = vpop.permute.xlu1 %2267 }
 0x5ac   : > { %v2279_v61 = vadd.f32 %v2268_v54, %v2255_v20 }
 0x5ae   : > { %v2270_v21 = vpop.permute.xlu0 %2269 }
 0x5af   : > { %v2292_v28 = vpop.permute.xlu1 %2291  ;;  %v2280_v59 = vadd.f32 %v2270_v21, %v2256_v45 }
 0x5b0   : > { %v2303_v50 = vadd.f32 %v2292_v28, %v2279_v61 }
 0x5b2   : > { %v2294_v55 = vpop.permute.xlu0 %2293 }
 0x5b3   : > { %v2272_v1 = vpop.permute.xlu1 %2271  ;;  %v2304_v5 = vadd.f32 %v2294_v55, %v2280_v59 }
 0x5b6   : > { %v2274_v22 = vpop.permute.xlu0 %2273 }
 0x5b7   : > { %v2316_v60 = vpop.permute.xlu1 %2315 }
 0x5b8   : > { %v3484_v14 = vpop.f32.mrb[8].mxu1 }
 0x5b9   : > { %v1705_v26 = vpop.f32.mrb[9].mxu1  ;;  %1731 = vperm.xlu0 %3748, %v3484_v14   ;;  %v2281_v14 = vadd.f32 %v2272_v1, %v2257_v30 }
 0x5ba   : > { %1726 = vperm.xlu1 %3747, %v1705_v26   ;;  %v2318_v31 = vpop.permute.xlu0 %2317  ;;  %v2327_v26 = vadd.f32 %v2316_v60, %v2303_v50 }
 0x5bb   : > { %v2296_v23 = vpop.permute.xlu1 %2295  ;;  %v2328_v46 = vadd.f32 %v2318_v31, %v2304_v5 }
 0x5bc   : > { %v3487_v19 = vpop.f32.mrb[10].mxu1  ;;  %v2305_v15 = vadd.f32 %v2296_v23, %v2281_v14 }
 0x5bd   : > { %v1715_v58 = vpop.f32.mrb[11].mxu1  ;;  %1741 = vperm.xlu0 %3748, %v3487_v19  }
 0x5be   : > { %1736 = vperm.xlu1 %3747, %v1715_v58   ;;  %v2298_v34 = vpop.permute.xlu0 %2297  ;;  %v2282_v58 = vadd.f32 %v2274_v22, %v2258_v35 }
 0x5bf   : > { %v2340_v24 = vpop.permute.xlu1 %2339 }
 0x5c0   : > { %v2351_v4 = vadd.f32 %v2340_v24, %v2327_v26  ;;  %v2306_v16 = vadd.f32 %v2298_v34, %v2282_v58 }
 0x5c2   : > { %v2342_v25 = vpop.permute.xlu0 %2341 }
 0x5c3   : > { %v2320_v29 = vpop.permute.xlu1 %2319  ;;  %v2352_v43 = vadd.f32 %v2342_v25, %v2328_v46 }
 0x5c4   : > { %v2329_v56 = vadd.f32 %v2320_v29, %v2305_v15 }
 0x5c6   : > { %v2322_v36 = vpop.permute.xlu0 %2321 }
 0x5c7   : > { %v2364_v33 = vpop.permute.xlu1 %2363  ;;  %v2330_v18 = vadd.f32 %v2322_v36, %v2306_v16 }
 0x5c8   : > { %v2375_v63 = vadd.f32 %v2364_v33, %v2351_v4 }
 0x5ca   : > { %v2366_v38 = vpop.permute.xlu0 %2365 }
 0x5cb   : > { %v2344_v40 = vpop.permute.xlu1 %2343  ;;  %v2376_v54 = vadd.f32 %v2366_v38, %v2352_v43 }
 0x5cc   : > { %v2353_v28 = vadd.f32 %v2344_v40, %v2329_v56 }
 0x5ce   : > { %v2346_v3 = vpop.permute.xlu0 %2345 }
 0x5cf   : > { %v2388_v37 = vpop.permute.xlu1 %2387  ;;  %v2354_v49 = vadd.f32 %v2346_v3, %v2330_v18 }
 0x5d0   : > { %v2399_v62 = vadd.f32 %v2388_v37, %v2375_v63 }
 0x5d2   : > { %v2390_v57 = vpop.permute.xlu0 %2389 }
 0x5d3   : > { %v2368_v42 = vpop.permute.xlu1 %2367  ;;  %v2400_v17 = vadd.f32 %v2390_v57, %v2376_v54 }
 0x5d4   : > { %v2377_v10 = vadd.f32 %v2368_v42, %v2353_v28 }
 0x5d6   : > { %v2370_v41 = vpop.permute.xlu0 %2369 }
 0x5d7   : > { %v2412_v7 = vpop.permute.xlu1 %2411  ;;  %v2378_v60 = vadd.f32 %v2370_v41, %v2354_v49 }
 0x5d8   : > { %v2423_v1 = vadd.f32 %v2412_v7, %v2399_v62 }
 0x5da   : > { %v2414_v52 = vpop.permute.xlu0 %2413 }
 0x5db   : > { %v2392_v0 = vpop.permute.xlu1 %2391  ;;  %v2424_v20 = vadd.f32 %v2414_v52, %v2400_v17 }
 0x5dc   : > { %v2401_v22 = vadd.f32 %v2392_v0, %v2377_v10 }
 0x5de   : > { %v2394_v51 = vpop.permute.xlu0 %2393 }
 0x5df   : > { %v2436_v53 = vpop.permute.xlu1 %2435  ;;  %v2402_v23 = vadd.f32 %v2394_v51, %v2378_v60 }
 0x5e0   : > { %v2447_v31 = vadd.f32 %v2436_v53, %v2423_v1 }
 0x5e2   : > { %v2438_v19 = vpop.permute.xlu0 %2437  ;;  %v3304_v36 = vmul.f32 -1.442695, %v2447_v31 }
 0x5e3   : > { %v2416_v21 = vpop.permute.xlu1 %2415  ;;  %v2448_v24 = vadd.f32 %v2438_v19, %v2424_v20 }
 0x5e4   : > { %v2425_v25 = vadd.f32 %v2416_v21, %v2401_v22  ;;  %3797 = vpow2.f32 %v3304_v36 }
 0x5e5   : > { %v3305_v44 = vmul.f32 -1.442695, %v2448_v24 }
 0x5e6   : > { %v2418_v55 = vpop.permute.xlu0 %2417 }
 0x5e7   : > { %v2440_v34 = vpop.permute.xlu1 %2439  ;;  %v2426_v33 = vadd.f32 %v2418_v55, %v2402_v23  ;;  %3799 = vpow2.f32 %v3305_v44 }
 0x5e8   : > { %v2449_v38 = vadd.f32 %v2440_v34, %v2425_v25 }
 0x5ea   : > { %v2442_v29 = vpop.permute.xlu0 %2441  ;;  %v3306_v37 = vmul.f32 -1.442695, %v2449_v38 }
 0x5eb   : > { %v2450_v40 = vadd.f32 %v2442_v29, %v2426_v33 }
 0x5ec   : > { %3801 = vpow2.f32 %v3306_v37 }
 0x5ed   : > { %v3307_v3 = vmul.f32 -1.442695, %v2450_v40 }
 0x5ee   : > { %v3798_v57 = vpop.eup %3797 }
 0x5ef   : > { %3803 = vpow2.f32 %v3307_v3  ;;  %v2463_v41 = vadd.f32 1.0, %v3798_v57 }
 0x5f1   : > { %v3800_v42 = vpop.eup %3799  ;;  %3805 = vrcp.f32 %v2463_v41 }
 0x5f2   : > { %v2464_v52 = vadd.f32 1.0, %v3800_v42 }
 0x5f4   : > { %3807 = vrcp.f32 %v2464_v52 }
 0x5f6   : > { %v3802_v7 = vpop.eup %3801 }
 0x5f7   : > { %v2465_v51 = vadd.f32 1.0, %v3802_v7 }
 0x5f9   : > { %v3804_v0 = vpop.eup %3803  ;;  %3809 = vrcp.f32 %v2465_v51 }
 0x5fa   : > { %v2466_v45 = vadd.f32 1.0, %v3804_v0 }
 0x5fb   : > { %v3806_v19 = vpop.eup %3805 }
 0x5fc   : > { %3811 = vrcp.f32 %v2466_v45  ;;  %v5206_v16 = vmul.f32 %v3806_v19, %v2447_v31 }
 0x5fe   : > { %v3808_v58 = vpop.eup %3807  ;;  %v2487_v21 = vsel %vm1534_vm4, %v5206_v16, 0.0 }
 0x5ff   : > { %v5208_v43 = vmul.f32 %v3808_v58, %v2448_v24 }
 0x601   : > { %v2490_v54 = vsel %vm1534_vm4, %v5208_v43, 0.0 }
 0x603   : > { %v3810_v4 = vpop.eup %3809 }
 0x604   : > { %v5211_v63 = vmul.f32 %v3810_v4, %v2449_v38 }
 0x606   : > { %v3812_v56 = vpop.eup %3811  ;;  %v2493_v62 = vsel %vm1534_vm4, %v5211_v63, 0.0 }
 0x607   : > { %v5213_v18 = vmul.f32 %v3812_v56, %v2450_v40 }
 0x609   : > { %v2496_v28 = vsel %vm1534_vm4, %v5213_v18, 0.0 }
 0x638   : > { %v1732_v47 = vpop.permute.xlu0 %1731 }
 0x639   : > { %v5184_v61 = vsub.f32 %v4889_v6, %v1732_v47  ;;  %v1727_v59 = vpop.permute.xlu1 %1726 }
 0x63a   : > { %v5187_v50 = vsub.f32 %v4885_v2, %v1727_v59 }
 0x63b   : > { %v1749_v30 = vmul.f32 %v5184_v61, %v5184_v61 }
 0x63c   : > { %v1748_v5 = vmul.f32 %v5187_v50, %v5187_v50  ;;  %v1742_v35 = vpop.permute.xlu0 %1741 }
 0x63d   : > { %v5194_v53 = vsub.f32 %v4898_v11, %v1742_v35  ;;  %v1737_v14 = vpop.permute.xlu1 %1736  ;;  %v1755_v26 = vsel %vm1534_vm4, %v1749_v30, 0.0 }
 0x63e   : > { %v5198_v6 = vsub.f32 %v4894_v12, %v1737_v14  ;;  %1756 = vadd.xlane.f32.xlu0 %v1755_v26  ;;  %v1752_v2 = vsel %vm1534_vm4, %v1748_v5, 0.0 }
 0x63f   : > { %v1751_v46 = vmul.f32 %v5194_v53, %v5194_v53  ;;  %1753 = vadd.xlane.f32.xlu1 %v1752_v2 }
 0x640   : > { %v1750_v15 = vmul.f32 %v5198_v6, %v5198_v6 }
 0x641   : > { %v1761_v11 = vsel %vm1534_vm4, %v1751_v46, 0.0 }
 0x642   : > { %v1758_v12 = vsel %vm1534_vm4, %v1750_v15, 0.0 }
 0x643   : > { %1762 = vadd.xlane.f32.xlu1 %v1761_v11  ;;  %1759 = vadd.xlane.f32.xlu0 %v1758_v12 }
 0x647   : > { %2491 = vadd.xlane.f32.xlu1 %v2490_v54  ;;  %2488 = vadd.xlane.f32.xlu0 %v2487_v21  ;;  %v2483_v54 = vld [vmem:[%s5486_s12] sm:$0xff] }
 0x64b   : > { %2497 = vadd.xlane.f32.xlu1 %v2496_v28  ;;  %2494 = vadd.xlane.f32.xlu0 %v2493_v62  ;;  %v2479_v28 = vld [vmem:[%s5485_s11] sm:$0xff]  ;;  %v1531_v62 = vld [vmem:[%s5484_s10 + $0x8] sm:$0xff] }
 0x6cb   : > { %v1757_v55 = vpop.xlane.xlu0 %1756 }
 0x6cc   : > { %v1754_v49 = vpop.xlane.xlu1 %1753 }
 0x6cd   : > { %v3616_v17 = vpack.c.bf16 %v1757_v55, %v1754_v49  ;;  %v1528_v49 = vld [vmem:[%s5483_s9 + $0x10] sm:$0xff] }
 0x6cf   : > { %3617 = vmatpush3.bf16.msra.mxu0 %v3616_v17  ;;  %v2480_v17 = vld [vmem:[%s5485_s11 + $0x8] sm:$0xff] }
 0x6d0   : > { %v1760_v10 = vpop.xlane.xlu0 %1759  ;;  %v1763_v1 = vpop.xlane.xlu1 %1762  ;;  %3618 = vmatprep.subr.bf16.mxu0 %v3952_v9 }
 0x6d1   : > { %v3619_v60 = vpack.c.bf16 %v1763_v1, %v1760_v10  ;;  %v2484_v10 = vld [vmem:[%s5486_s12 + $0x8] sm:$0xff] }
 0x6d3   : > { %3620 = vmatpush3.bf16.msra.mxu0 %v3619_v60 }
 0x6d4   : > { %v2489_v20 = vpop.xlane.xlu0 %2488  ;;  %v2492_v22 = vpop.xlane.xlu1 %2491  ;;  %3621 = vmatprep.subr.bf16.mxu0 %v3952_v9 }
 0x6d5   : > { %v3622_v31 = vpack.c.bf16 %v2492_v22, %v2489_v20 }
 0x6d6   : > { %3497 = vmatmul.mubr.msk.f32.vlgmr.msra.gmra.mrb[10].mxu0 %vm1547_vm6, %v4922_v13 }
 0x6d7   : > { %3623 = vmatpush3.bf16.msra.mxu0 %v3622_v31  ;;  %3515 = vmatprep.mubr.msk.f32.mxu0 %vm3953_vm5, %v3954_v48  ;;  %v2958_v31 = vld [vmem:[%s5477_s3 + $0x8] sm:$0xff] }
 0x6d8   : > { %v2495_v23 = vpop.xlane.xlu0 %2494  ;;  %v2498_v24 = vpop.xlane.xlu1 %2497  ;;  %3624 = vmatprep.subr.bf16.mxu0 %v3952_v9 }
 0x6d9   : > { %v3625_v34 = vpack.c.bf16 %v2498_v24, %v2495_v23  ;;  %v2960_v23 = vld [vmem:[%s5477_s3 + $0x18] sm:$0xff] }
 0x6db   : > { %3626 = vmatpush3.bf16.msra.mxu0 %v3625_v34 }
 0x6dc   : > { %3627 = vmatprep.subr.bf16.mxu0 %v3952_v9 }
 0x6de   : > { %3516 = vmatmul.mubr.msk.f32.vlgmr.msra.gmra.mrb[12].mxu0 %vm1547_vm6, %v4922_v13 }
 0x6df   : > { %3534 = vmatprep.mubr.msk.f32.mxu0 %vm3953_vm5, %v3954_v48 }
 0x7a9   : > { %v1830_v25 = vpop.f32.mrb[10].mxu0 }
 0x7aa   : > { %v1834_v29 = vmul.f32 0.0078125, %v1830_v25  ;;  %v3498_v33 = vpop.f32.mrb[11].mxu0  ;;  %v3633_v25 = vpack.c.bf16 %v2960_v23, %v2958_v31  ;;  %v3065_v31 = vld [vmem:[%s5478_s4 + $0x18] sm:$0xff] }
 0x7ab   : > { %v2959_v33 = vld [vmem:[%s5477_s3 + $0x10] sm:$0xff] }
 0x7ac   : > { %3499 = vmatprep.subr.msk.mxu1 %vm1635_vm7, %v1834_v29 }
 0x7ad   : > { %3500 = vmatpush3.msk.msra.mxu1 %vm1635_vm7, %v1834_v29  ;;  %v2957_v29 = vld [vmem:[%s5477_s3] sm:$0xff] }
 0x7ae   : > { %3502 = vmatmul.mubr.msk.f32.vlgmr.msra.gmra.mrb[12].mxu1 %vm1120_vm2, %v5037_v8 }
 0x7af   : > { %3504 = vmatprep.mubr.msk.f32.mxu1 %vm1120_vm2, %v5043_v32 }
 0x7b1   : > { %v2565_v36 = vpop.f32.mrb[12].mxu0 }
 0x7b2   : > { %v2569_v38 = vmul.f32 0.0078125, %v2565_v36  ;;  %3505 = vmatmul.mubr.msk.f32.gmra.mrb[14].mxu1 %vm1120_vm2, %v5053_v27  ;;  %v3517_v44 = vpop.f32.mrb[13].mxu0 }
 0x7b3   : > { %3520 = vmatprep.mubr.msk.f32.mxu1 %vm1120_vm2, %v5014_v39 }
 0x7b4   : > { %3518 = vmatprep.subr.msk.mxu1 %vm1635_vm7, %v2569_v38 }
 0x7b5   : > { %3519 = vmatpush3.msk.msra.mxu1 %vm1635_vm7, %v2569_v38  ;;  %v3635_v38 = vpack.c.bf16 %v2959_v33, %v2957_v29 }
 0x7b6   : > { %3521 = vmatmul.mubr.msk.f32.vlgmr.msra.gmra.mrb[16].mxu1 %vm1120_vm2, %v5037_v8 }
 0x7b7   : > { %3523 = vmatprep.mubr.msk.f32.mxu1 %vm1120_vm2, %v5043_v32 }
 0x7ba   : > { %3524 = vmatmul.mubr.msk.f32.gmra.mrb[18].mxu1 %vm1120_vm2, %v5053_v27 }
 0x7bb   : > { %3539 = vmatprep.mubr.msk.f32.mxu1 %vm1120_vm2, %v5014_v39 }
 0x881   : > { %v3503_v40 = vpop.f32.mrb[12].mxu1 }
 0x882   : > { %v1904_v37 = vpop.f32.mrb[13].mxu1  ;;  %v1910_v4 = vadd.f32 1e-05, %v3503_v40 }
 0x883   : > { %v1905_v11 = vadd.f32 1e-05, %v1904_v37 }
 0x885   : > { %v3506_v3 = vpop.f32.mrb[14].mxu1  ;;  %3813 = vrsqrt.f32 %v1905_v11 }
 0x886   : > { %v1914_v57 = vpop.f32.mrb[15].mxu1  ;;  %3815 = vrsqrt.f32 %v1910_v4  ;;  %v1920_v21 = vadd.f32 1e-05, %v3506_v3 }
 0x887   : > { %v1915_v12 = vadd.f32 1e-05, %v1914_v57 }
 0x889   : > { %v3522_v42 = vpop.f32.mrb[16].mxu1  ;;  %3817 = vrsqrt.f32 %v1915_v12 }
 0x88a   : > { %2665 = vperm.xlu1 %3747, %v3522_v42   ;;  %v2639_v41 = vpop.f32.mrb[17].mxu1  ;;  %3819 = vrsqrt.f32 %v1920_v21 }
 0x88b   : > { %2660 = vperm.xlu0 %3748, %v2639_v41  }
 0x88d   : > { %v3525_v7 = vpop.f32.mrb[18].mxu1 }
 0x88e   : > { %v2649_v52 = vpop.f32.mrb[19].mxu1 }
 0x88f   : > { %2675 = vperm.xlu0 %3748, %v3525_v7   ;;  %2670 = vperm.xlu1 %3747, %v2649_v52   ;;  %v3814_v56 = vpop.eup %3813 }
 0x909   : > { %v2666_v0 = vpop.permute.xlu1 %2665 }
 0x90a   : > { %v5256_v51 = vsub.f32 %v5208_v43, %v2666_v0  ;;  %v2661_v45 = vpop.permute.xlu0 %2660  ;;  %v1530_v43 = vld [vmem:[%s5484_s10] sm:$0xff] }
 0x90b   : > { %v5259_v47 = vsub.f32 %v5206_v16, %v2661_v45  ;;  %v1526_v16 = vld [vmem:[%s5483_s9] sm:$0xff] }
 0x90c   : > { %v2683_v39 = vmul.f32 %v5256_v51, %v5256_v51 }
 0x90d   : > { %v2682_v59 = vmul.f32 %v5259_v47, %v5259_v47 }
 0x90e   : > { %v2676_v30 = vpop.permute.xlu0 %2675  ;;  %v2671_v5 = vpop.permute.xlu1 %2670  ;;  %v2689_v35 = vsel %vm1534_vm4, %v2683_v39, 0.0 }
 0x90f   : > { %v5267_v14 = vsub.f32 %v5213_v18, %v2676_v30  ;;  %v5270_v26 = vsub.f32 %v5211_v63, %v2671_v5  ;;  %2690 = vadd.xlane.f32.xlu0 %v2689_v35  ;;  %v2686_v19 = vsel %vm1534_vm4, %v2682_v59, 0.0  ;;  %v1527_v63 = vld [vmem:[%s5483_s9 + $0x8] sm:$0xff]  ;;  %v3816_v18 = vpop.eup %3815 }
 0x910   : > { %2687 = vadd.xlane.f32.xlu1 %v2686_v19  ;;  %v3818_v55 = vpop.eup %3817 }
 0x911   : > { %v2685_v2 = vmul.f32 %v5267_v14, %v5267_v14  ;;  %v2684_v58 = vmul.f32 %v5270_v26, %v5270_v26  ;;  %v3820_v1 = vpop.eup %3819 }
 0x913   : > { %v2695_v46 = vsel %vm1534_vm4, %v2685_v2, 0.0  ;;  %v2692_v15 = vsel %vm1534_vm4, %v2684_v58, 0.0 }
 0x914   : > { %2696 = vadd.xlane.f32.xlu1 %v2695_v46  ;;  %2693 = vadd.xlane.f32.xlu0 %v2692_v15 }
 0x925   : > { %1953 = vperm.xlu1 %3747, %v1526_v16  }
 0x929   : > { %1977 = vperm.xlu1 %3747, %v1530_v43  }
 0x92a   : > { %1929 = vperm.xlu0 %3748, %v3814_v56  }
 0x92d   : > { %1958 = vperm.xlu1 %3747, %v1527_v63  }
 0x92e   : > { %1934 = vperm.xlu0 %3748, %v3816_v18  }
 0x931   : > { %2911 = vperm.xlu1 %3747, %v2483_v54  }
 0x932   : > { %2887 = vperm.xlu0 %3748, %v2479_v28   ;;  %v2481_v28 = vld [vmem:[%s5485_s11 + $0x10] sm:$0xff] }
 0x935   : > { %1982 = vperm.xlu1 %3747, %v1531_v62   ;;  %v1532_v62 = vld [vmem:[%s5484_s10 + $0x10] sm:$0xff] }
 0x936   : > { %1939 = vperm.xlu0 %3748, %v3818_v55  }
 0x939   : > { %1963 = vperm.xlu1 %3747, %v1528_v49   ;;  %v1529_v49 = vld [vmem:[%s5483_s9 + $0x18] sm:$0xff] }
 0x93a   : > { %2892 = vperm.xlu0 %3748, %v2480_v17   ;;  %v2485_v17 = vld [vmem:[%s5486_s12 + $0x10] sm:$0xff] }
 0x93d   : > { %2916 = vperm.xlu1 %3747, %v2484_v10  }
 0x93e   : > { %1944 = vperm.xlu0 %3748, %v3820_v1   ;;  %v1533_v1 = vld [vmem:[%s5484_s10 + $0x18] sm:$0xff] }
 0x99c   : > { %v2691_v60 = vpop.xlane.xlu0 %2690 }
 0x99d   : > { %v2688_v20 = vpop.xlane.xlu1 %2687 }
 0x99e   : > { %v3628_v22 = vpack.c.bf16 %v2691_v60, %v2688_v20  ;;  %v2482_v60 = vld [vmem:[%s5485_s11 + $0x18] sm:$0xff] }
 0x99f   : > { %v2486_v20 = vld [vmem:[%s5486_s12 + $0x18] sm:$0xff] }
 0x9a0   : > { %3629 = vmatpush3.bf16.msra.mxu0 %v3628_v22  ;;  %v3063_v22 = vld [vmem:[%s5478_s4 + $0x8] sm:$0xff] }
 0x9a1   : > { %v2694_v24 = vpop.xlane.xlu0 %2693  ;;  %v2697_v34 = vpop.xlane.xlu1 %2696  ;;  %3630 = vmatprep.subr.bf16.mxu0 %v3952_v9  ;;  %v3637_v23 = vpack.c.bf16 %v3065_v31, %v3063_v22 }
 0x9a2   : > { %v3631_v36 = vpack.c.bf16 %v2697_v34, %v2694_v24  ;;  %v3062_v24 = vld [vmem:[%s5478_s4] sm:$0xff]  ;;  %v3064_v34 = vld [vmem:[%s5478_s4 + $0x10] sm:$0xff] }
 0x9a4   : > { %3632 = vmatpush3.bf16.msra.mxu0 %v3631_v36 }
 0x9a5   : > { %v1954_v44 = vpop.permute.xlu1 %1953  ;;  %3634 = vmatprep.subr.bf16.mxu0 %v3633_v25  ;;  %v3639_v25 = vpack.c.bf16 %v3064_v34, %v3062_v24 }
 0x9a7   : > { %3535 = vmatmul.mubr.msk.f32.vlgmr.msra.gmra.mrb[14].mxu0 %vm1547_vm6, %v4922_v13 }
 0x9a8   : > { %3636 = vmatpush1.bf16.msra.mxu0 %v3635_v38  ;;  %3037 = vmatprep.mubr.f32.mxu0 %v3954_v48 }
 0x9a9   : > { %v1930_v9 = vpop.permute.xlu0 %1929  ;;  %v1978_v40 = vpop.permute.xlu1 %1977 }
 0x9aa   : > { %v1947_v37 = vmul.f32 %v1930_v9, %v5187_v50 }
 0x9ac   : > { %v1971_v3 = vmul.f32 %v1954_v44, %v1947_v37 }
 0x9ad   : > { %v1935_v57 = vpop.permute.xlu0 %1934  ;;  %v1959_v42 = vpop.permute.xlu1 %1958 }
 0x9ae   : > { %v1995_v41 = vadd.f32 %v1978_v40, %v1971_v3  ;;  %v1948_v52 = vmul.f32 %v1935_v57, %v5184_v61 }
 0x9b0   : > { %v3296_v7 = vmul.f32 -1.442695, %v1995_v41  ;;  %v1972_v45 = vmul.f32 %v1959_v42, %v1948_v52 }
 0x9b1   : > { %v5324_v0 = vpop.permute.xlu1 %2911  ;;  %v2888_v29 = vpop.permute.xlu0 %2887 }
 0x9b2   : > { %3821 = vpow2.f32 %v3296_v7 }
 0x9b5   : > { %v1983_v39 = vpop.permute.xlu1 %1982  ;;  %v1940_v33 = vpop.permute.xlu0 %1939 }
 0x9b6   : > { %v1996_v13 = vadd.f32 %v1983_v39, %v1972_v45  ;;  %v1949_v57 = vmul.f32 %v1940_v33, %v5198_v6 }
 0x9b8   : > { %v3297_v59 = vmul.f32 -1.442695, %v1996_v13 }
 0x9b9   : > { %v2893_v36 = vpop.permute.xlu0 %2892  ;;  %v1964_v38 = vpop.permute.xlu1 %1963 }
 0x9ba   : > { %3823 = vpow2.f32 %v3297_v59  ;;  %v1973_v7 = vmul.f32 %v1964_v38, %v1949_v57  ;;  %v3863_v57 = vld [vmem:[%s4134_s15 + $0x10] sm:$0xff] }
 0x9bc   : > { %v3822_v30 = vpop.eup %3821 }
 0x9bd   : > { %v2011_v5 = vadd.f32 1.0, %v3822_v30  ;;  %v1945_v44 = vpop.permute.xlu0 %1944  ;;  %v2917_v9 = vpop.permute.xlu1 %2916 }
 0x9bf   : > { %3825 = vrcp.f32 %v2011_v5 }
 0x9c4   : > { %v3824_v35 = vpop.eup %3823 }
 0x9c5   : > { %v2012_v50 = vadd.f32 1.0, %v3824_v35 }
 0x9c7   : > { %3827 = vrcp.f32 %v2012_v50 }
 0x9c9   : > { %v3826_v19 = vpop.eup %3825 }
 0x9ca   : > { %3324 = vmatmul.mubr.msk.f32.vlgmr.msra.gmra.mrb[16].mxu0 %vm1534_vm4, %v3826_v19 }
 0x9cb   : > { %3043 = vmatprep.mubr.f32.mxu0 %v3954_v48 }
 0x9d1   : > { %v3828_v61 = vpop.eup %3827 }
 0x9d2   : > { %3325 = vmatmul.mubr.msk.f32.gmra.mrb[18].mxu0 %vm1534_vm4, %v3828_v61 }
 0x9d3   : > { %3049 = vmatprep.mubr.f32.mxu0 %v3954_v48 }
 0xa7a   : > { %v2764_v2 = vpop.f32.mrb[14].mxu0 }
 0xa7b   : > { %v2768_v58 = vmul.f32 0.0078125, %v2764_v2  ;;  %v3536_v46 = vpop.f32.mrb[15].mxu0 }
 0xa7d   : > { %3537 = vmatprep.subr.msk.mxu1 %vm1635_vm7, %v2768_v58 }
 0xa7e   : > { %3538 = vmatpush3.msk.msra.mxu1 %vm1635_vm7, %v2768_v58 }
 0xa7f   : > { %3540 = vmatmul.mubr.msk.f32.vlgmr.msra.gmra.mrb[20].mxu1 %vm1120_vm2, %v5037_v8  ;;  %3638 = vmatprep.subr.bf16.mxu1 %v3637_v23 }
 0xa80   : > { %3542 = vmatprep.mubr.msk.f32.mxu1 %vm1120_vm2, %v5043_v32  ;;  %3640 = vmatpush1.bf16.msra.mxu1 %v3639_v25 }
 0xa83   : > { %3543 = vmatmul.mubr.msk.f32.gmra.mrb[22].mxu1 %vm1120_vm2, %v5053_v27 }
 0xa84   : > { %3142 = vmatprep.mubr.f32.mxu1 %v3954_v48 }
 0xa9d   : > { %v5339_v15 = vpop.f32.mrb[16].mxu0 }
 0xa9e   : > { %v5341_v11 = vpop.f32.mrb[17].mxu0 }
 0xaa5   : > { %v5343_v4 = vpop.f32.mrb[18].mxu0 }
 0xaa6   : > { %v5345_v16 = vpop.f32.mrb[19].mxu0 }
 0xb52   : > { %v3541_v43 = vpop.f32.mrb[20].mxu1 }
 0xb53   : > { %v2844_v12 = vadd.f32 1e-05, %v3541_v43  ;;  %v2838_v56 = vpop.f32.mrb[21].mxu1 }
 0xb54   : > { %v2839_v8 = vadd.f32 1e-05, %v2838_v56 }
 0xb55   : > { %3829 = vrsqrt.f32 %v2844_v12 }
 0xb56   : > { %3831 = vrsqrt.f32 %v2839_v8  ;;  %v3544_v32 = vpop.f32.mrb[22].mxu1 }
 0xb57   : > { %v2854_v63 = vadd.f32 1e-05, %v3544_v32  ;;  %v2848_v18 = vpop.f32.mrb[23].mxu1 }
 0xb58   : > { %v2849_v27 = vadd.f32 1e-05, %v2848_v18 }
 0xb59   : > { %3833 = vrsqrt.f32 %v2854_v63 }
 0xb5a   : > { %3835 = vrsqrt.f32 %v2849_v27 }
 0xb5f   : > { %v3830_v54 = vpop.eup %3829 }
 0xb60   : > { %v3832_v21 = vpop.eup %3831  ;;  %2868 = vperm.xlu0 %3748, %v3830_v54  }
 0xb61   : > { %2863 = vperm.xlu1 %3747, %v3832_v21  }
 0xb63   : > { %v3834_v55 = vpop.eup %3833 }
 0xb64   : > { %2897 = vperm.xlu0 %3748, %v2481_v28   ;;  %v3836_v10 = vpop.eup %3835 }
 0xb65   : > { %1987 = vperm.xlu1 %3747, %v1532_v62  }
 0xb68   : > { %2878 = vperm.xlu0 %3748, %v3834_v55  }
 0xb69   : > { %1968 = vperm.xlu1 %3747, %v1529_v49  }
 0xb6c   : > { %2873 = vperm.xlu0 %3748, %v3836_v10  }
 0xb6d   : > { %2921 = vperm.xlu1 %3747, %v2485_v17  }
 0xb70   : > { %1992 = vperm.xlu0 %3748, %v1533_v1  }
 0xb71   : > { %2902 = vperm.xlu1 %3747, %v2482_v60  }
 0xb74   : > { %2926 = vperm.xlu0 %3748, %v2486_v20  }
 0xbdf   : > { %v2869_v40 = vpop.permute.xlu0 %2868 }
 0xbe0   : > { %v2882_v37 = vmul.f32 %v2869_v40, %v5256_v51  ;;  %v2864_v3 = vpop.permute.xlu1 %2863 }
 0xbe1   : > { %v2881_v42 = vmul.f32 %v2864_v3, %v5259_v47  ;;  %v1950_v47 = vmul.f32 %v1945_v44, %v5194_v53 }
 0xbe2   : > { %v2906_v41 = vmul.f32 %v2893_v36, %v2882_v37  ;;  %v3862_v36 = vld [vmem:[%s4134_s15 + $0x8] sm:$0xff] }
 0xbe3   : > { %v2905_v52 = vmul.f32 %v2888_v29, %v2881_v42  ;;  %v2898_v45 = vpop.permute.xlu0 %2897  ;;  %v3861_v29 = vld [vmem:[%s4134_s15] sm:$0xff]  ;;  %v3168_v38 = vmul.f32 %v3862_v36, %v5341_v11  ;;  %v3169_v42 = vmul.f32 %v3863_v57, %v5343_v4 }
 0xbe4   : > { %v2930_v39 = vadd.f32 %v2917_v9, %v2906_v41  ;;  %v1988_v13 = vpop.permute.xlu1 %1987  ;;  %v3167_v33 = vmul.f32 %v3861_v29, %v5339_v15  ;;  %v3864_v15 = vld [vmem:[%s4134_s15 + $0x18] sm:$0xff]  ;;  %v3865_v4 = vld [vmem:[%s4134_s15 + $0x20] sm:$0xff] }
 0xbe5   : > { %v2929_v59 = vadd.f32 %v5324_v0, %v2905_v52  ;;  %v1997_v30 = vadd.f32 %v1988_v13, %v1973_v7  ;;  %v3170_v11 = vmul.f32 %v3864_v15, %v5345_v16  ;;  %v3866_v13 = vld [vmem:[%s4134_s15 + $0x28] sm:$0xff] }
 0xbe6   : > { %v3321_v5 = vmul.f32 -1.442695, %v2930_v39 }
 0xbe7   : > { %v3320_v35 = vmul.f32 -1.442695, %v2929_v59  ;;  %v3298_v50 = vmul.f32 -1.442695, %v1997_v30  ;;  %v2879_v19 = vpop.permute.xlu0 %2878 }
 0xbe8   : > { %3837 = vpow2.f32 %v3321_v5  ;;  %v1969_v51 = vpop.permute.xlu1 %1968  ;;  %v2884_v43 = vmul.f32 %v2879_v19, %v5267_v14  ;;  %v3867_v19 = vld [vmem:[%s4134_s15 + $0x30] sm:$0xff] }
 0xbe9   : > { %3839 = vpow2.f32 %v3320_v35  ;;  %v1974_v58 = vmul.f32 %v1969_v51, %v1950_v47 }
 0xbea   : > { %3841 = vpow2.f32 %v3298_v50 }
 0xbeb   : > { %v2874_v6 = vpop.permute.xlu0 %2873 }
 0xbec   : > { %v2883_v61 = vmul.f32 %v2874_v6, %v5270_v26  ;;  %v2922_v2 = vpop.permute.xlu1 %2921 }
 0xbee   : > { %v2907_v46 = vmul.f32 %v2898_v45, %v2883_v61  ;;  %v3868_v61 = vld [vmem:[%s4134_s15 + $0x38] sm:$0xff]  ;;  %s3869_s15 = scalar_lea.vmem %s5427_s26, 1024 }
 0xbef   : > { %v1993_v0 = vpop.permute.xlu0 %1992  ;;  %p3870_p11 = scmp.ne.s32.totalorder %s5427_s26, %s3869_s15  ;;  %p3877_p1 = scmp.lt.s32.totalorder %s3875_s21, %s3869_s15 }
 0xbf0   : > { %v2931_v12 = vadd.f32 %v2922_v2, %v2907_v46  ;;  %v1998_v56 = vadd.f32 %v1993_v0, %v1974_v58  ;;  %v2903_v8 = vpop.permute.xlu1 %2902 }
 0xbf1   : > { %v2908_v32 = vmul.f32 %v2903_v8, %v2884_v43  ;;  %p3871_p12 = pnand %p3870_p11, %p4076_p5  ;;  %p3878_p2 = por %p3877_p1, %p3876_p0 }
 0xbf2   : > { %v3838_v63 = vpop.eup %3837  ;;  %v3322_v18 = vmul.f32 -1.442695, %v2931_v12  ;;  %v3299_v53 = vmul.f32 -1.442695, %v1998_v56 }
 0xbf3   : > { %v3840_v27 = vpop.eup %3839  ;;  %v2927_v54 = vpop.permute.xlu0 %2926  ;;  %v2946_v55 = vadd.f32 1.0, %v3838_v63  ;;  %p3872_p13 = pneg %p3871_p12 }
 0xbf4   : > { %v3842_v21 = vpop.eup %3841  ;;  %v2945_v28 = vadd.f32 1.0, %v3840_v27  ;;  %3843 = vpow2.f32 %v3322_v18  ;;  %v2932_v62 = vadd.f32 %v2927_v54, %v2908_v32 }
 0xbf5   : > { %v2013_v26 = vadd.f32 1.0, %v3842_v21  ;;  %p3879_p3 = pnand %p3878_p2, %p3872_p13 }
 0xbf6   : > { %3845 = vrcp.f32 %v2945_v28  ;;  %v3323_v49 = vmul.f32 -1.442695, %v2932_v62 }
 0xbf7   : > { %3847 = vrcp.f32 %v2013_v26 }
 0xbf8   : > { %3849 = vpow2.f32 %v3299_v53 }
 0xbf9   : > { %3851 = vpow2.f32 %v3323_v49 }
 0xbfa   : > { %3853 = vrcp.f32 %v2946_v55 }
 0xbfe   : > { %v3844_v14 = vpop.eup %3843 }
 0xbff   : > { %v2947_v17 = vadd.f32 1.0, %v3844_v14 }
 0xc00   : > { %v3846_v10 = vpop.eup %3845 }
 0xc01   : > { %v3848_v1 = vpop.eup %3847  ;;  %3855 = vrcp.f32 %v2947_v17  ;;  %3328 = vmatmul.mubr.msk.f32.vlgmr.msra.gmra.mrb[24].mxu1 %vm1534_vm4, %v3846_v10 }
 0xc02   : > { %v3850_v60 = vpop.eup %3849  ;;  %3326 = vmatmul.mubr.msk.f32.gmra.mrb[20].mxu0 %vm1534_vm4, %v3848_v1  ;;  %3148 = vmatprep.mubr.f32.mxu1 %v3954_v48 }
 0xc03   : > { %v3852_v20 = vpop.eup %3851  ;;  %v2014_v22 = vadd.f32 1.0, %v3850_v60  ;;  %3055 = vmatprep.mubr.f32.mxu0 %v3954_v48 }
 0xc04   : > { %v3854_v31 = vpop.eup %3853  ;;  %v2948_v23 = vadd.f32 1.0, %v3852_v20 }
 0xc05   : > { %3857 = vrcp.f32 %v2014_v22  ;;  %3329 = vmatmul.mubr.msk.f32.gmra.mrb[26].mxu1 %vm1534_vm4, %v3854_v31 }
 0xc06   : > { %3859 = vrcp.f32 %v2948_v23  ;;  %3154 = vmatprep.mubr.f32.mxu1 %v3954_v48 }
 0xc0b   : > { %v3856_v24 = vpop.eup %3855 }
 0xc0c   : > { %3330 = vmatmul.mubr.msk.f32.gmra.mrb[28].mxu1 %vm1534_vm4, %v3856_v24 }
 0xc0d   : > { %3160 = vmatprep.mubr.f32.mxu1 %v3954_v48 }
 0xc0f   : > { %v3858_v34 = vpop.eup %3857 }
 0xc10   : > { %v3860_v25 = vpop.eup %3859  ;;  %3327 = vmatmul.mubr.msk.f32.gmra.mrb[22].mxu0 %vm1534_vm4, %v3858_v34 }
 0xc11   : > { %3331 = vmatmul.mubr.msk.f32.gmra.mrb[30].mxu1 %vm1534_vm4, %v3860_v25 }
 0xcd4   : > { %v3144_v44 = vpop.f32.mrb[24].mxu1 }
 0xcd5   : > { %v3051_v9 = vpop.f32.mrb[20].mxu0  ;;  %v3175_v48 = vmul.f32 %v3167_v33, %v3144_v44  ;;  %v3146_v40 = vpop.f32.mrb[25].mxu1 }
 0xcd6   : > { %v3053_v37 = vpop.f32.mrb[21].mxu0  ;;  %v3176_v3 = vmul.f32 %v3168_v38, %v3146_v40  ;;  %v3171_v39 = vmul.f32 %v3865_v4, %v3051_v9 }
 0xcd7   : > { %3183 = vst [vmem:[%s5406_s23] sm:$0xff] %v3175_v48  ;;  %v3172_v59 = vmul.f32 %v3866_v13, %v3053_v37 }
 0xcd8   : > { %3184 = vst [vmem:[%s5406_s23 + $0x8] sm:$0xff] %v3176_v3  ;;  %v3150_v41 = vpop.f32.mrb[26].mxu1 }
 0xcd9   : > { %v3177_v7 = vmul.f32 %v3169_v42, %v3150_v41  ;;  %v3152_v52 = vpop.f32.mrb[27].mxu1 }
 0xcda   : > { %v3178_v45 = vmul.f32 %v3170_v11, %v3152_v52 }
 0xcdb   : > { %3185 = vst [vmem:[%s5406_s23 + $0x10] sm:$0xff] %v3177_v7 }
 0xcdc   : > { %3186 = vst [vmem:[%s5406_s23 + $0x18] sm:$0xff] %v3178_v45 }
 0xcdf   : > { %v3156_v30 = vpop.f32.mrb[28].mxu1 }
 0xce0   : > { %v3179_v5 = vmul.f32 %v3171_v39, %v3156_v30  ;;  %v3158_v16 = vpop.f32.mrb[29].mxu1 }
 0xce1   : > { %v3180_v35 = vmul.f32 %v3172_v59, %v3158_v16 }
 0xce2   : > { %3187 = vst [vmem:[%s5406_s23 + $0x20] sm:$0xff] %v3179_v5 }
 0xce3   : > { %v3057_v50 = vpop.f32.mrb[22].mxu0  ;;  %3188 = vst [vmem:[%s5406_s23 + $0x28] sm:$0xff] %v3180_v35 }
 0xce4   : > { %v3173_v51 = vmul.f32 %v3867_v19, %v3057_v50  ;;  %v3059_v6 = vpop.f32.mrb[23].mxu0  ;;  %v3162_v47 = vpop.f32.mrb[30].mxu1 }
 0xce5   : > { %v3174_v2 = vmul.f32 %v3868_v61, %v3059_v6  ;;  %v3164_v58 = vpop.f32.mrb[31].mxu1 }
 0xce6   : > { %v3181_v46 = vmul.f32 %v3173_v51, %v3162_v47 }
 0xce7   : > { %v3182_v43 = vmul.f32 %v3174_v2, %v3164_v58 }
 0xce8   : > { %3189 = vst [vmem:[%s5406_s23 + $0x30] sm:$0xff] %v3181_v46 }
 0xce9   : > { %3190 = vst [vmem:[%s5406_s23 + $0x38] sm:$0xff] %v3182_v43 }
 0xcea   : > { %3882 = shalt.err (!%p3879_p3)
}
 0xceb   : > { %s3883_s30 = scalar_lea.hbm %s5425_s16, 1024  ;;  %s3887_s25 = scalar_lea.hbm %s5666_s29, 2048 }
 0xcec   : > { %p3884_p4 = scmp.ne.s32.totalorder %s5425_s16, %s3883_s30  ;;  %p3888_p9 = scmp.lt.u32.totalorder %s5425_s16, %s5666_s29 }
 0xced   : > { %p3889_p10 = scmp.lt.u32.totalorder %s3887_s25, %s3883_s30  ;;  %p3891_p12 = scmp.lt.u32.totalorder %s3883_s30, %s5425_s16 }
 0xcee   : > { %p3885_p7 = pnand %p3884_p4, %p4076_p5 }
 0xcef   : > { %p3890_p11 = por %p3889_p10, %p3888_p9 }
 0xcf0   : > { %p3886_p8 = pneg %p3885_p7 }
 0xcf1   : > { %p3892_p13 = por %p3891_p12, %p3890_p11 }
 0xcf3   : > { %p3893_p0 = pnand %p3892_p13, %p3886_p8 }
 0xcf5   : > { %3896 = shalt.err (!%p3893_p0)
}
 0xcf6   : > { %s3956_s15 = smov 256   ;;  %s3957_s17 = smov 16  }
 0xcf7   : > { %3641 = dma.vmem_to_hbm [thread:$0]  (%p4076_p5), %s5427_s26, 1024, %s5425_s16, %s5433_s22, %s3956_s15, %s3956_s15, %s3957_s17  }
 0xcf8 PF: > { %s5667_s18 = sld [smem:[#allocation7_spill]]  ;;  %s5668_s21 = sld [smem:[#allocation5_spill]] }
 0xcfe   : > { %p3647_p1 = scmp.ge.s32.totalorder %s5667_s18, 2  ;;  %s3221_s23 = sand.u32 1, %s5668_s21  }
 0xcff   : > { %s3222_s30 = scalar_lea.sflag [#allocation3], %s3221_s23 }
 0xd00   : > { %p3644_p2 = pnand %p3647_p1, %p4080_p6 }
 0xd02   : > { %3914 = dma.done.wait (!%p3644_p2), %s3222_s30, 1024  }
 0xd03   : > { %3916 = vsyncadd (!%p3644_p2), %s3222_s30, 4294966272  ;;  %s5670_s21 = sld [smem:[#allocation8_spill]]  ;;  %s5671_s25 = sld [smem:[#allocation6_spill]] }
 0xd04   : > { %s5672_s20 = sld [smem:[#allocation9_spill]]  ;;  %s5673_s18 = smov %s3923_s19 }
 0xd09   : > { %p25_p3 = scmp.ge.s32.totalorder %s5670_s21, 4   ;;  %s5674_s19 = smov %s5671_s25 }
 0xd0b   :  { %27 = sbr.rel (!%p25_p3) target bundleno = 5 (0x5), region = 115 }
 0xd12   :  { %3227 = vsyncpa [#allocation3], 1 }
 0xd13   :  { %3229 = vsyncpa [#allocation3 + $0x1], 1 }

</bundles_post_ra>
